<compile_context>
chip_gen: v6e
topology: v6e:2x2x1
jax: 0.10.0
libtpu: 0.0.40
codegen_flags: <defaults>
</compile_context>

<pallas_src>
import math

import jax
import jax.numpy as jnp
from jax.experimental import pallas as pl
from jax.experimental.pallas import tpu as pltpu


def _round_up(x, m):
    return ((x + m - 1) // m) * m


def _full_spec(arr):
    nd = arr.ndim
    return pl.BlockSpec(tuple(arr.shape), lambda *_: (0,) * nd)


# ============================================================================
# Fused Encoder kernel: backbone proj (+ReLU) -> mean-pool -> ai2v / ag2v.
# One program per batch element (grid=(B,), parallel).
# ============================================================================
def _encoder_kernel(patches_ref, bb_w_ref, bb_b_ref,
                    ai2v_w_ref, ai2v_b_ref, ag2v_w_ref, ag2v_b_ref,
                    v_ref, vg_ref):
    f32, bf16 = jnp.float32, jnp.bfloat16
    R = patches_ref.shape[0]

    x = patches_ref[...].astype(bf16)                                    # [R, Pdp]
    feat = jnp.maximum(
        jnp.dot(x, bb_w_ref[...], preferred_element_type=f32) + bb_b_ref[...], 0.0)
    feat_b = feat.astype(bf16)                                           # [R, 2048]

    # V = relu(ai2v(feat))   (columns pre-padded to 128 -> lane-dense store)
    v_ref[...] = jnp.maximum(
        jnp.dot(feat_b, ai2v_w_ref[...], preferred_element_type=f32) + ai2v_b_ref[...],
        0.0).astype(v_ref.dtype)

    # v_g = relu(ag2v(mean_R(feat)))
    ag = (jnp.sum(feat, axis=0, keepdims=True) * (1.0 / R)).astype(bf16)  # [1, 2048]
    vg_ref[...] = jnp.maximum(
        jnp.dot(ag, ag2v_w_ref[...], preferred_element_type=f32) + ag2v_b_ref[...],
        0.0).astype(vg_ref.dtype)


def encoder_pallas(patches_pad, params):
    B, R, Pdp = patches_pad.shape
    VP = params["enc_ai2v_w"].shape[1]
    GP = params["enc_ag2v_w"].shape[1]
    return pl.pallas_call(
        _encoder_kernel,
        grid=(B,),
        in_specs=[
            pl.BlockSpec((None, R, Pdp), lambda b: (b, 0, 0)),
            _full_spec(params["enc_bb_w"]),
            _full_spec(params["enc_bb_b"]),
            _full_spec(params["enc_ai2v_w"]),
            _full_spec(params["enc_ai2v_b"]),
            _full_spec(params["enc_ag2v_w"]),
            _full_spec(params["enc_ag2v_b"]),
        ],
        out_specs=(
            pl.BlockSpec((None, R, VP), lambda b: (b, 0, 0)),
            pl.BlockSpec((None, 1, GP), lambda b: (b, 0, 0)),
        ),
        out_shape=(jax.ShapeDtypeStruct((B, R, VP), jnp.bfloat16),
                   jax.ShapeDtypeStruct((B, 1, GP), jnp.bfloat16)),
        compiler_params=pltpu.CompilerParams(
            dimension_semantics=("parallel",),
            vmem_limit_bytes=32 * 1024 * 1024),
    )(patches_pad, params["enc_bb_w"], params["enc_bb_b"],
      params["enc_ai2v_w"], params["enc_ai2v_b"],
      params["enc_ag2v_w"], params["enc_ag2v_b"])


# ============================================================================
# Fused Decoder kernel: x-projection GEMM + LSTM recurrence + Sentinel +
# Adaptive attention + score head.  One program per batch element.
# ============================================================================
def _decoder_kernel(emb_ref, vg_ref, v_ref,
                    wx_emb_ref, wx_vg_ref, bx_ref, whh_ref, h2s_ref,
                    v2att_ref, hatt_ref, s2att_ref, attw_ref,
                    mlp_w_ref, h2sc_w_ref, bsc_ref,
                    scores_ref, att_ref,
                    gx_scr, hid_scr, mem_scr, hprev_scr):
    f32, bf16 = jnp.float32, jnp.bfloat16
    TP, E = emb_ref.shape
    R = v_ref.shape[0]
    H = whh_ref.shape[0]
    HP = whh_ref.shape[1] // 4          # per-gate lane-aligned width (128)
    AP = v2att_ref.shape[1]             # attention dim padded to 128 lanes

    emb = emb_ref[...].astype(bf16)                                      # [TP, E]
    vg = vg_ref[...][:, :E]                                              # [1, E] bf16

    # ---- x projection for LSTM gates + sentinel x2s, fused (one GEMM per operand);
    #      v_g contribution computed once and broadcast over time ----
    gx = (jnp.dot(emb, wx_emb_ref[...], preferred_element_type=f32)
          + jnp.dot(vg, wx_vg_ref[...], preferred_element_type=f32)
          + bx_ref[...])                                                 # [TP, 5*HP]
    gx_scr[...] = gx

    # ---- LSTM recurrence: only h @ W_hh per step; gates at 128-lane offsets ----
    whh = whh_ref[...]

    def step(t, carry):
        h, c = carry
        hprev_scr[pl.ds(t, 1), :] = h
        row = gx_scr[pl.ds(t, 1), :]                                     # [1, 5*HP]
        z = row[:, :4 * HP] + jnp.dot(h.astype(bf16), whh,
                                      preferred_element_type=f32)        # [1, 4*HP]
        i_g = jax.nn.sigmoid(z[:, 0:H])
        f_g = jax.nn.sigmoid(z[:, HP:HP + H])
        g_g = jnp.tanh(z[:, 2 * HP:2 * HP + H])
        o_g = jax.nn.sigmoid(z[:, 3 * HP:3 * HP + H])
        c = f_g * c + i_g * g_g
        h = o_g * jnp.tanh(c)
        hid_scr[pl.ds(t, 1), :] = h
        mem_scr[pl.ds(t, 1), :] = c
        return (h, c)

    zero = jnp.zeros((1, H), f32)
    jax.lax.fori_loop(0, TP, step, (zero, zero), unroll=True)

    hid = hid_scr[...]                                                   # [TP, H]
    hid_b = hid.astype(bf16)

    # ---- Sentinel: s = sigmoid(x2s(x) + h2s(h_{t-1})) * tanh(mem) ----
    sx = gx_scr[:, 4 * HP:4 * HP + H]                                    # [TP, H]
    gate = jax.nn.sigmoid(
        sx + jnp.dot(hprev_scr[...].astype(bf16), h2s_ref[...],
                     preferred_element_type=f32))
    s = gate * jnp.tanh(mem_scr[...])                                    # [TP, H]
    s_b = s.astype(bf16)

    # ---- Adaptive attention ----
    v_b = v_ref[...][:, :H]                                              # [R, H] bf16
    vw = jnp.dot(v_b, v2att_ref[...], preferred_element_type=f32)        # [R, AP]
    hw_all = jnp.dot(hid_b, hatt_ref[...], preferred_element_type=f32)   # [TP, 2*AP]
    hw, hw2 = hw_all[:, :AP], hw_all[:, AP:]
    sw = jnp.dot(s_b, s2att_ref[...], preferred_element_type=f32)        # [TP, AP]
    wa = attw_ref[...]                                                   # [1, AP]

    zv = jnp.sum(jnp.tanh(hw[:, None, :] + vw[None, :, :]) * wa[None, :, :],
                 axis=-1)                                                # [TP, R]
    zs = jnp.sum(jnp.tanh(sw + hw2) * wa, axis=-1, keepdims=True)        # [TP, 1]

    # softmax over (zv || zs) without any lane concatenation
    m = jnp.maximum(jnp.max(zv, axis=-1, keepdims=True), zs)
    ev = jnp.exp(zv - m)
    es = jnp.exp(zs - m)
    inv = pl.reciprocal(jnp.sum(ev, axis=-1, keepdims=True) + es, approx=True)
    alpha = ev * inv                                                     # [TP, R]
    beta = es * inv                                                      # [TP, 1]

    c_hat = beta * s + jnp.dot(alpha.astype(bf16), v_b,
                               preferred_element_type=f32)               # [TP, H]

    # ---- Scores: mlp(c_hat) + h2score(hid), merged bias ----
    scores_ref[...] = (
        jnp.dot(c_hat.astype(bf16), mlp_w_ref[...], preferred_element_type=f32)
        + jnp.dot(hid_b, h2sc_w_ref[...], preferred_element_type=f32)
        + bsc_ref[...])

    # ---- Packed attention output [TP, 128]: zero-fill + two stores (no concat) ----
    att_ref[...] = jnp.zeros_like(att_ref)
    att_ref[:, :R] = alpha * (1.0 - beta)
    att_ref[:, R:R + 1] = beta


def decoder_pallas(emb_pad, vg_e, v_e, params, T):
    B, TP, E = emb_pad.shape
    R, VP = v_e.shape[1], v_e.shape[2]
    GP = vg_e.shape[2]
    H = params["dec_whh"].shape[0]
    HP = params["dec_whh"].shape[1] // 4
    AP = params["dec_v2att"].shape[1]
    W = params["dec_mlp_w"].shape[1]

    scores, att = pl.pallas_call(
        _decoder_kernel,
        grid=(B,),
        in_specs=[
            pl.BlockSpec((None, TP, E), lambda b: (b, 0, 0)),
            pl.BlockSpec((None, 1, GP), lambda b: (b, 0, 0)),
            pl.BlockSpec((None, R, VP), lambda b: (b, 0, 0)),
            _full_spec(params["dec_wx_emb"]),
            _full_spec(params["dec_wx_vg"]),
            _full_spec(params["dec_bx"]),
            _full_spec(params["dec_whh"]),
            _full_spec(params["dec_h2s"]),
            _full_spec(params["dec_v2att"]),
            _full_spec(params["dec_hatt"]),
            _full_spec(params["dec_s2att"]),
            _full_spec(params["dec_attw"]),
            _full_spec(params["dec_mlp_w"]),
            _full_spec(params["dec_h2sc_w"]),
            _full_spec(params["dec_bsc"]),
        ],
        out_specs=(
            pl.BlockSpec((None, TP, W), lambda b: (b, 0, 0)),
            pl.BlockSpec((None, TP, AP), lambda b: (b, 0, 0)),
        ),
        out_shape=(jax.ShapeDtypeStruct((B, TP, W), jnp.float32),
                   jax.ShapeDtypeStruct((B, TP, AP), jnp.float32)),
        scratch_shapes=[pltpu.VMEM((TP, 5 * HP), jnp.float32),
                        pltpu.VMEM((TP, H), jnp.float32),
                        pltpu.VMEM((TP, H), jnp.float32),
                        pltpu.VMEM((TP, H), jnp.float32)],
        compiler_params=pltpu.CompilerParams(
            dimension_semantics=("parallel",),
            vmem_limit_bytes=32 * 1024 * 1024),
    )(emb_pad, vg_e, v_e,
      params["dec_wx_emb"], params["dec_wx_vg"], params["dec_bx"],
      params["dec_whh"], params["dec_h2s"],
      params["dec_v2att"], params["dec_hatt"], params["dec_s2att"], params["dec_attw"],
      params["dec_mlp_w"], params["dec_h2sc_w"], params["dec_bsc"])

    scores = scores[:, :T, :]
    atten_weights = att[:, :T, :R]
    beta = att[:, :T, R:R + 1]
    return scores, atten_weights, beta


# ----------------------------------------------------------------------------
# Plain-JAX glue
# ----------------------------------------------------------------------------
def extract_patches(img, patch):
    """img NCHW -> [B, (H/p)*(W/p), C*p*p] (row-major regions)."""
    B, C, Hh, Ww = img.shape
    gh, gw = Hh // patch, Ww // patch
    x = img.reshape(B, C, gh, patch, gw, patch)
    x = jnp.transpose(x, (0, 2, 4, 1, 3, 5))
    return x.reshape(B, gh * gw, C * patch * patch)


def pack_padded(scores, lengths):
    """Replicates pack_padded_sequence(batch_first=True).data and .batch_sizes."""
    lengths = [int(l) for l in lengths]
    assert lengths == sorted(lengths, reverse=True), "lengths must be sorted descending"
    chunks, batch_sizes = [], []
    for t in range(max(lengths)):
        n = sum(1 for l in lengths if l > t)
        chunks.append(scores[:n, t, :])
        batch_sizes.append(n)
    return jnp.concatenate(chunks, axis=0), jnp.asarray(batch_sizes, dtype=jnp.int32)


# ----------------------------------------------------------------------------
# Parameter initialization: synthetic weights, pre-padded / pre-fused / bf16 ONCE.
# ----------------------------------------------------------------------------
def init_params(key, emb_dim, num_words, hidden_dim, patch_dim,
                feat_ch=2048, att_dim=49):
    E, H, W = emb_dim, hidden_dim, num_words
    assert H == 2 * E, "Sentinel requires hidden_dim == 2*emb_dim (as in the reference)"
    HP = _round_up(H, 128)       # per-LSTM-gate lane-aligned width
    AP = _round_up(att_dim, 128)
    VP = _round_up(H, 128)       # lane-dense width of V output
    GP = _round_up(E, 128)       # lane-dense width of v_g output
    Pdp = _round_up(patch_dim, 128)

    ks = jax.random.split(key, 20)

    def u(k, shape, fan_in):
        lim = 1.0 / math.sqrt(fan_in)
        return jax.random.uniform(k, shape, jnp.float32, -lim, lim)

    def pad_cols(w, n):
        return jnp.pad(w, ((0, 0), (0, n - w.shape[1])))

    def pad_gates(w):  # [*, 4H] -> [*, 4*HP], each gate zero-padded to a 128-lane slot
        parts = [jnp.pad(w[:, g * H:(g + 1) * H], ((0, 0), (0, HP - H))) for g in range(4)]
        return jnp.concatenate(parts, axis=1)

    p = {}
    # ---- Encoder (backbone stand-in + ai2v / ag2v) ----
    p["enc_bb_w"] = jnp.pad(u(ks[0], (patch_dim, feat_ch), patch_dim),
                            ((0, Pdp - patch_dim), (0, 0))).astype(jnp.bfloat16)
    p["enc_bb_b"] = jnp.zeros((1, feat_ch), jnp.float32)
    p["enc_ai2v_w"] = pad_cols(u(ks[1], (feat_ch, H), feat_ch), VP).astype(jnp.bfloat16)
    p["enc_ai2v_b"] = jnp.zeros((1, VP), jnp.float32)
    p["enc_ag2v_w"] = pad_cols(u(ks[2], (feat_ch, E), feat_ch), GP).astype(jnp.bfloat16)
    p["enc_ag2v_b"] = jnp.zeros((1, GP), jnp.float32)

    # ---- Decoder ----
    p["embed"] = 0.1 * jax.random.normal(ks[3], (W, E), jnp.float32)
    wih = u(ks[4], (2 * E, 4 * H), H)
    whh = u(ks[5], (H, 4 * H), H)
    b_lstm = u(ks[6], (1, 4 * H), H)                 # b_ih + b_hh combined
    x2s = u(ks[7], (H, H), H)                        # Sentinel.x2s (applied to x, 2E == H)
    h2s = u(ks[8], (H, H), 2 * E)                    # Sentinel.h2s (applied to h_{t-1})
    # fused x weight: [LSTM gates (lane-padded) | x2s (lane-padded)], split emb / v_g rows
    wx = jnp.concatenate([pad_gates(wih), pad_cols(x2s, HP)], axis=1)    # [2E, 5*HP]
    p["dec_wx_emb"] = wx[:E].astype(jnp.bfloat16)
    p["dec_wx_vg"] = wx[E:].astype(jnp.bfloat16)
    p["dec_bx"] = jnp.concatenate([pad_gates(b_lstm), jnp.zeros((1, HP), jnp.float32)],
                                  axis=1)
    p["dec_whh"] = pad_gates(whh).astype(jnp.bfloat16)
    p["dec_h2s"] = h2s.astype(jnp.bfloat16)

    v2att = u(ks[9], (H, att_dim), H)
    h2att = u(ks[10], (H, att_dim), H)
    h2att2 = u(ks[11], (H, att_dim), H)
    s2att = u(ks[12], (H, att_dim), H)
    attw = u(ks[13], (1, att_dim), att_dim)
    p["dec_v2att"] = pad_cols(v2att, AP).astype(jnp.bfloat16)
    p["dec_hatt"] = jnp.concatenate([pad_cols(h2att, AP), pad_cols(h2att2, AP)],
                                    axis=1).astype(jnp.bfloat16)
    p["dec_s2att"] = pad_cols(s2att, AP).astype(jnp.bfloat16)
    p["dec_attw"] = pad_cols(attw, AP)               # f32, zero beyond att_dim

    p["dec_mlp_w"] = u(ks[14], (H, W), H).astype(jnp.bfloat16)
    p["dec_h2sc_w"] = u(ks[15], (H, W), H).astype(jnp.bfloat16)
    # mlp bias is zero-initialized in the reference; merge with h2score bias
    p["dec_bsc"] = u(ks[16], (1, W), H)
    return p


# ----------------------------------------------------------------------------
# Full CapGenerator.forward
# ----------------------------------------------------------------------------
def cap_generator_forward(params, img, caps, lengths, patch=8):
    # ---------------- Encoder (single fused kernel, batch-parallel grid) ----------------
    patches = extract_patches(img, patch)                        # [B, R, Pd]
    B, R, Pd = patches.shape
    assert R == 49, "reference attention is hard-coded for 7x7 = 49 regions"
    Pdp = params["enc_bb_w"].shape[0]
    patches_pad = jnp.pad(patches, ((0, 0), (0, 0), (0, Pdp - Pd)))
    v_e, vg_e = encoder_pallas(patches_pad, params)              # bf16 [B,R,128], [B,1,128]
    # TODO(synk): pretrained ResNet-101 backbone replaced by the patch projection above.

    # ---------------- Decoder (single fused kernel, batch-parallel grid) ----------------
    emb = params["embed"][caps]                                  # [B, T, E]
    T = emb.shape[1]
    TP = _round_up(T, 8)                                         # sublane-aligned time
    emb_pad = jnp.pad(emb, ((0, 0), (0, TP - T), (0, 0)))
    scores, atten_weights, beta = decoder_pallas(emb_pad, vg_e, v_e, params, T)

    packed_data, batch_sizes = pack_padded(scores, lengths)
    return packed_data, batch_sizes, atten_weights, beta


# ----------------------------------------------------------------------------
# Main
# ----------------------------------------------------------------------------
if __name__ == "__main__":
    EMB_DIM, HIDDEN_DIM, NUM_WORDS = 32, 64, 128   # hidden_dim == 2*emb_dim (required)
    B, T = 2, 6
    PATCH, IMG_SIZE = 8, 56                        # 56/8 = 7 -> 7x7 = 49 regions

    key = jax.random.PRNGKey(0)
    k_img, k_caps, k_par = jax.random.split(key, 3)
    img_inputs = jax.random.normal(k_img, (B, 3, IMG_SIZE, IMG_SIZE), jnp.float32)
    caps = jax.random.randint(k_caps, (B, T), 0, NUM_WORDS)
    lengths = [6, 4]                               # sorted descending

    params = init_params(k_par, EMB_DIM, NUM_WORDS, HIDDEN_DIM, 3 * PATCH * PATCH)
    packed_data, batch_sizes, attn, beta = cap_generator_forward(
        params, img_inputs, caps, lengths, patch=PATCH)
    jax.block_until_ready(packed_data)
    jax.block_until_ready(attn)
    jax.block_until_ready(beta)
    assert packed_data.shape == (sum(lengths), NUM_WORDS)
    assert attn.shape == (B, T, 49)
    assert beta.shape == (B, T, 1)
    print("KERNEL_OK")
</pallas_src>

<mosaic_0001>
module attributes {stable_mosaic.version = 11 : i64} {
  func.func @_encoder_kernel(%arg0: i32, %arg1: memref<1x49x256xf32, #tpu.memory_space<vmem>>, %arg2: memref<256x2048xbf16, #tpu.memory_space<vmem>>, %arg3: memref<1x2048xf32, #tpu.memory_space<vmem>>, %arg4: memref<2048x128xbf16, #tpu.memory_space<vmem>>, %arg5: memref<1x128xf32, #tpu.memory_space<vmem>>, %arg6: memref<2048x128xbf16, #tpu.memory_space<vmem>>, %arg7: memref<1x128xf32, #tpu.memory_space<vmem>>, %arg8: memref<1x49x128xbf16, #tpu.memory_space<vmem>>, %arg9: memref<1x1x128xbf16, #tpu.memory_space<vmem>>) attributes {dimension_semantics = [#tpu.dimension_semantics<parallel>], iteration_bounds = array<i64: 2>, scalar_prefetch = 0 : i64, scratch_operands = 0 : i64, tpu.core_type = #tpu.core_type<tc>, window_params = [{transform_indices = @transform_0, window_bounds = array<i64: 1, 49, 256>}, {pipeline_mode = #tpu.pipeline_mode<synchronous>, transform_indices = @transform_1, window_bounds = array<i64: 256, 2048>}, {pipeline_mode = #tpu.pipeline_mode<synchronous>, transform_indices = @transform_2, window_bounds = array<i64: 1, 2048>}, {pipeline_mode = #tpu.pipeline_mode<synchronous>, transform_indices = @transform_3, window_bounds = array<i64: 2048, 128>}, {pipeline_mode = #tpu.pipeline_mode<synchronous>, transform_indices = @transform_4, window_bounds = array<i64: 1, 128>}, {pipeline_mode = #tpu.pipeline_mode<synchronous>, transform_indices = @transform_5, window_bounds = array<i64: 2048, 128>}, {pipeline_mode = #tpu.pipeline_mode<synchronous>, transform_indices = @transform_6, window_bounds = array<i64: 1, 128>}, {transform_indices = @transform_7, window_bounds = array<i64: 1, 49, 128>}, {transform_indices = @transform_8, window_bounds = array<i64: 1, 1, 128>}]} {
    %c0 = arith.constant 0 : index
    %c0_0 = arith.constant 0 : index
    %c0_1 = arith.constant 0 : index
    %0 = vector.load %arg1[%c0, %c0_0, %c0_1] : memref<1x49x256xf32, #tpu.memory_space<vmem>>, vector<1x49x256xf32>
    %1 = vector.shape_cast %0 : vector<1x49x256xf32> to vector<49x256xf32>
    %2 = arith.truncf %1 : vector<49x256xf32> to vector<49x256xbf16>
    %c0_2 = arith.constant 0 : index
    %c0_3 = arith.constant 0 : index
    %3 = vector.load %arg2[%c0_2, %c0_3] : memref<256x2048xbf16, #tpu.memory_space<vmem>>, vector<256x2048xbf16>
    %cst = arith.constant dense<0.000000e+00> : vector<49x2048xf32>
    %4 = tpu.matmul %2, %3, %cst {dimension_numbers = #tpu.dot_dimension_numbers<[1], [0], [0], [1], [0, 0, 1, 1], [], []>} : vector<49x256xbf16>, vector<256x2048xbf16>, vector<49x2048xf32> -> vector<49x2048xf32>
    %c0_4 = arith.constant 0 : index
    %c0_5 = arith.constant 0 : index
    %5 = vector.load %arg3[%c0_4, %c0_5] : memref<1x2048xf32, #tpu.memory_space<vmem>>, vector<1x2048xf32>
    %6 = vector.broadcast %5 : vector<1x2048xf32> to vector<49x2048xf32>
    %7 = arith.addf %4, %6 : vector<49x2048xf32>
    %cst_6 = arith.constant 0.000000e+00 : f32
    %8 = vector.broadcast %cst_6 : f32 to vector<49x2048xf32>
    %9 = arith.maximumf %7, %8 : vector<49x2048xf32>
    %10 = arith.truncf %9 : vector<49x2048xf32> to vector<49x2048xbf16>
    %c0_7 = arith.constant 0 : index
    %c0_8 = arith.constant 0 : index
    %11 = vector.load %arg4[%c0_7, %c0_8] : memref<2048x128xbf16, #tpu.memory_space<vmem>>, vector<2048x128xbf16>
    %cst_9 = arith.constant dense<0.000000e+00> : vector<49x128xf32>
    %12 = tpu.matmul %10, %11, %cst_9 {dimension_numbers = #tpu.dot_dimension_numbers<[1], [0], [0], [1], [0, 0, 1, 1], [], []>} : vector<49x2048xbf16>, vector<2048x128xbf16>, vector<49x128xf32> -> vector<49x128xf32>
    %c0_10 = arith.constant 0 : index
    %c0_11 = arith.constant 0 : index
    %13 = vector.load %arg5[%c0_10, %c0_11] : memref<1x128xf32, #tpu.memory_space<vmem>>, vector<1x128xf32>
    %14 = vector.broadcast %13 : vector<1x128xf32> to vector<49x128xf32>
    %15 = arith.addf %12, %14 : vector<49x128xf32>
    %cst_12 = arith.constant 0.000000e+00 : f32
    %16 = vector.broadcast %cst_12 : f32 to vector<49x128xf32>
    %17 = arith.maximumf %15, %16 : vector<49x128xf32>
    %18 = arith.truncf %17 : vector<49x128xf32> to vector<49x128xbf16>
    %c0_13 = arith.constant 0 : index
    %c0_14 = arith.constant 0 : index
    %c0_15 = arith.constant 0 : index
    %19 = vector.load %arg8[%c0_13, %c0_14, %c0_15] : memref<1x49x128xbf16, #tpu.memory_space<vmem>>, vector<1x49x128xbf16>
    %20 = vector.shape_cast %19 : vector<1x49x128xbf16> to vector<49x128xbf16>
    %21 = vector.shape_cast %18 : vector<49x128xbf16> to vector<1x49x128xbf16>
    tpu.vector_store %arg8[%c0_13, %c0_14, %c0_15], %21 {strides = array<i32>} : memref<1x49x128xbf16, #tpu.memory_space<vmem>>, vector<1x49x128xbf16>,
    %cst_16 = arith.constant dense<0.000000e+00> : vector<2048xf32>
    %22 = vector.multi_reduction <add>, %9, %cst_16 [0] : vector<49x2048xf32> to vector<2048xf32>
    %23 = vector.shape_cast %22 : vector<2048xf32> to vector<1x2048xf32>
    %cst_17 = arith.constant 0.0204081628 : f32
    %24 = vector.broadcast %cst_17 : f32 to vector<1x2048xf32>
    %25 = arith.mulf %23, %24 : vector<1x2048xf32>
    %26 = arith.truncf %25 : vector<1x2048xf32> to vector<1x2048xbf16>
    %c0_18 = arith.constant 0 : index
    %c0_19 = arith.constant 0 : index
    %27 = vector.load %arg6[%c0_18, %c0_19] : memref<2048x128xbf16, #tpu.memory_space<vmem>>, vector<2048x128xbf16>
    %cst_20 = arith.constant dense<0.000000e+00> : vector<1x128xf32>
    %28 = tpu.matmul %26, %27, %cst_20 {dimension_numbers = #tpu.dot_dimension_numbers<[1], [0], [0], [1], [0, 0, 1, 1], [], []>} : vector<1x2048xbf16>, vector<2048x128xbf16>, vector<1x128xf32> -> vector<1x128xf32>
    %c0_21 = arith.constant 0 : index
    %c0_22 = arith.constant 0 : index
    %29 = vector.load %arg7[%c0_21, %c0_22] : memref<1x128xf32, #tpu.memory_space<vmem>>, vector<1x128xf32>
    %30 = arith.addf %28, %29 : vector<1x128xf32>
    %cst_23 = arith.constant 0.000000e+00 : f32
    %31 = vector.broadcast %cst_23 : f32 to vector<1x128xf32>
    %32 = arith.maximumf %30, %31 : vector<1x128xf32>
    %33 = arith.truncf %32 : vector<1x128xf32> to vector<1x128xbf16>
    %c0_24 = arith.constant 0 : index
    %c0_25 = arith.constant 0 : index
    %c0_26 = arith.constant 0 : index
    %34 = vector.load %arg9[%c0_24, %c0_25, %c0_26] : memref<1x1x128xbf16, #tpu.memory_space<vmem>>, vector<1x1x128xbf16>
    %35 = vector.shape_cast %34 : vector<1x1x128xbf16> to vector<1x128xbf16>
    %36 = vector.shape_cast %33 : vector<1x128xbf16> to vector<1x1x128xbf16>
    tpu.vector_store %arg9[%c0_24, %c0_25, %c0_26], %36 {strides = array<i32>} : memref<1x1x128xbf16, #tpu.memory_space<vmem>>, vector<1x1x128xbf16>,
    return
  }
  func.func @transform_0(%arg0: i32) -> (i32, i32, i32) {
    %c0_i32 = arith.constant 0 : i32
    %c0_i32_0 = arith.constant 0 : i32
    %c0_i32_1 = arith.constant 0 : i32
    return %arg0, %c0_i32, %c0_i32_0 : i32, i32, i32
  }
  func.func @transform_1(%arg0: i32) -> (i32, i32) {
    %c0_i32 = arith.constant 0 : i32
    %c0_i32_0 = arith.constant 0 : i32
    %c0_i32_1 = arith.constant 0 : i32
    return %c0_i32, %c0_i32_0 : i32, i32
  }
  func.func @transform_2(%arg0: i32) -> (i32, i32) {
    %c0_i32 = arith.constant 0 : i32
    %c0_i32_0 = arith.constant 0 : i32
    %c0_i32_1 = arith.constant 0 : i32
    return %c0_i32, %c0_i32_0 : i32, i32
  }
  func.func @transform_3(%arg0: i32) -> (i32, i32) {
    %c0_i32 = arith.constant 0 : i32
    %c0_i32_0 = arith.constant 0 : i32
    %c0_i32_1 = arith.constant 0 : i32
    return %c0_i32, %c0_i32_0 : i32, i32
  }
  func.func @transform_4(%arg0: i32) -> (i32, i32) {
    %c0_i32 = arith.constant 0 : i32
    %c0_i32_0 = arith.constant 0 : i32
    %c0_i32_1 = arith.constant 0 : i32
    return %c0_i32, %c0_i32_0 : i32, i32
  }
  func.func @transform_5(%arg0: i32) -> (i32, i32) {
    %c0_i32 = arith.constant 0 : i32
    %c0_i32_0 = arith.constant 0 : i32
    %c0_i32_1 = arith.constant 0 : i32
    return %c0_i32, %c0_i32_0 : i32, i32
  }
  func.func @transform_6(%arg0: i32) -> (i32, i32) {
    %c0_i32 = arith.constant 0 : i32
    %c0_i32_0 = arith.constant 0 : i32
    %c0_i32_1 = arith.constant 0 : i32
    return %c0_i32, %c0_i32_0 : i32, i32
  }
  func.func @transform_7(%arg0: i32) -> (i32, i32, i32) {
    %c0_i32 = arith.constant 0 : i32
    %c0_i32_0 = arith.constant 0 : i32
    %c0_i32_1 = arith.constant 0 : i32
    return %arg0, %c0_i32, %c0_i32_0 : i32, i32, i32
  }
  func.func @transform_8(%arg0: i32) -> (i32, i32, i32) {
    %c0_i32 = arith.constant 0 : i32
    %c0_i32_0 = arith.constant 0 : i32
    %c0_i32_1 = arith.constant 0 : i32
    return %arg0, %c0_i32, %c0_i32_0 : i32, i32, i32
  }
}

</mosaic_0001>

<bundles_post_ra>
// kernel: tpu_custom_call.1
= control target key start
LH: loop header
LB: loop body
LE: loop exit
PB: predicated region body
PF: predicated region fallthrough
CT: control target
= control target key end

     0   :  { %14 = vsyncpa [#allocation3], 0  ;;  %s8353_s0 = inlined_call_operand.vmem [shape: f32[2,49,256], index: 0, kind: input, shape index: {}]   ;;  %s8354_s1 = inlined_call_operand.hbm [shape: bf16[256,2048], index: 1, kind: input, shape index: {}]   ;;  %s8355_s2 = inlined_call_operand.vmem [shape: f32[1,2048], index: 2, kind: input, shape index: {}]   ;;  %s8356_s3 = inlined_call_operand.hbm [shape: bf16[2048,128], index: 3, kind: input, shape index: {}]   ;;  %s8357_s4 = inlined_call_operand.vmem [shape: f32[1,128], index: 4, kind: input, shape index: {}]   ;;  %s8358_s5 = inlined_call_operand.hbm [shape: bf16[2048,128], index: 5, kind: input, shape index: {}]   ;;  %s8359_s6 = inlined_call_operand.vmem [shape: f32[1,128], index: 6, kind: input, shape index: {}]   ;;  %s8360_s7 = inlined_call_operand.vmem [shape: bf16[2,49,128], index: 7, kind: output, shape index: {0}]   ;;  %s8361_s8 = inlined_call_operand.vmem [shape: bf16[2,1,128], index: 8, kind: output, shape index: {1}]  }
   0x1   :  { %15 = vsyncpa [#allocation5], 0  ;;  %s7539_s27 = smov 0  }
   0x2 LB: > { %s7545_s28 = sadd.s32 4294967295, %s7486_s27   ;;  %p6041_p0 = scmp.ge.s32.totalorder %s7486_s27, 1  ;;  %s7486_s27 = sphi %s7539_s27, %s21_s27  }
   0x3   : > { %p230_p1 = scmp.lt.s32.totalorder %s7486_s27, 3  ;;  %s7488_s29 = smov [#allocation4]  }
   0x4   : > { %s258_s30 = sshll.u32 %s7488_s29, 4  ;;  %p7118_p3 = scmp.eq.s32.totalorder %s7545_s28, 0  ;;  %s259_s30 = int_to_ptr.vmem [resolvable:$true] %s258_s30 }
   0x5   : > { %p7549_p2 = pnand %p6041_p0, %p230_p1  ;;  %s7489_s10 = smov [#allocation2]  }
   0x6   : > { %s242_s11 = sshll.u32 %s7489_s10, 4  ;;  %s7490_s13 = smov [#allocation6]   ;;  %s7556_s11 = int_to_ptr.vmem [resolvable:$true] %s242_s11 }
   0x7   : > { %p7108_p4 = pneg %p7549_p2  ;;  %s274_s14 = sshll.u32 %s7490_s13, 4  ;;  %s7564_s14 = int_to_ptr.vmem [resolvable:$true] %s274_s14 }
   0x8   : > { %s7405_s15 = scalar_lea.vmem %s259_s30, 16384  ;;  %p7413_p10 = scmp.lt.s32.totalorder %s259_s30, %s259_s30 }
   0x9   : > { %p7560_p5 = pnand %p7118_p3, %p7108_p4  ;;  %p7406_p7 = scmp.ne.s32.totalorder %s259_s30, %s7405_s15 }
   0xa   : > { %p7414_p11 = scmp.lt.s32.totalorder %s7405_s15, %s7405_s15 }
   0xb   : > { %p7396_p6 = pneg %p7560_p5 }
   0xc   : > { %p7415_p12 = por %p7414_p11, %p7413_p10 }
   0xd   : > { %p7408_p8 = pnand %p7406_p7, %p7396_p6 }
   0xf   : > { %p7409_p9 = pneg %p7408_p8 }
  0x11   : > { %p7416_p13 = pnand %p7415_p12, %p7409_p9 }
  0x13   : > { %7419 = shalt.err (!%p7416_p13)
}
  0x14   : > { %s7491_s16 = smov 64   ;;  %s7492_s17 = smov 4  }
  0x15   : > { %7114 = dma.hbm_to_vmem [thread:$0]  (!%p7560_p5), %s8356_s3, 16384, %s259_s30, [#allocation5], %s7491_s16, %s7491_s16, %s7492_s17  }
  0x16   : > { %s7431_s20 = scalar_lea.vmem %s7556_s11, 32768  ;;  %p7439_p7 = scmp.lt.s32.totalorder %s7556_s11, %s7556_s11 }
  0x17   : > { %p7432_p0 = scmp.ne.s32.totalorder %s7556_s11, %s7431_s20  ;;  %p7440_p8 = scmp.lt.s32.totalorder %s7431_s20, %s7431_s20 }
  0x19   : > { %p7434_p1 = pnand %p7432_p0, %p7396_p6  ;;  %p7441_p9 = por %p7440_p8, %p7439_p7 }
  0x1b   : > { %p7435_p4 = pneg %p7434_p1 }
  0x1d   : > { %p7442_p10 = pnand %p7441_p9, %p7435_p4 }
  0x1f   : > { %7445 = shalt.err (!%p7442_p10)
}
  0x20   : > { %s7493_s21 = smov 1024   ;;  %s7457_s24 = scalar_lea.vmem %s7564_s14, 16384 }
  0x21   : > { %7111 = dma.hbm_to_vmem [thread:$0]  (!%p7560_p5), %s8354_s1, 32768, %s7556_s11, [#allocation3], %s7493_s21, %s7493_s21, %s7491_s16  }
  0x22   : > { %p7458_p11 = scmp.ne.s32.totalorder %s7564_s14, %s7457_s24  ;;  %p7465_p0 = scmp.lt.s32.totalorder %s7564_s14, %s7564_s14 }
  0x23   : > { %p7466_p1 = scmp.lt.s32.totalorder %s7457_s24, %s7457_s24 }
  0x24   : > { %p7460_p12 = pnand %p7458_p11, %p7396_p6 }
  0x25   : > { %p7467_p4 = por %p7466_p1, %p7465_p0 }
  0x26   : > { %p7461_p13 = pneg %p7460_p12 }
  0x28   : > { %p7468_p7 = pnand %p7467_p4, %p7461_p13 }
  0x2a   : > { %7471 = shalt.err (!%p7468_p7)
}
  0x2b   : > { %7117 = dma.hbm_to_vmem [thread:$0]  (!%p7560_p5), %s8358_s5, 16384, %s7564_s14, [#allocation5], %s7491_s16, %s7491_s16, %s7492_s17  }
  0x2c   : > { %301 = sbr.rel (%p7549_p2) target bundleno = 853 (0x355), region = 48 }
  0x31   : > { %7477 = dma.done.wait (%p7118_p3), [#allocation3], 32768  }
  0x32   : > { %7479 = vsyncadd (%p7118_p3), [#allocation3], 4294934528 }
  0x33   : > { %7481 = dma.done.wait (%p7118_p3), [#allocation5], 32768  }
  0x34   : > { %7483 = vsyncadd (%p7118_p3), [#allocation5], 4294934528  ;;  %v494_v0 = vld [vmem:[#allocation2 + $0x380] sm:$0xff]  ;;  %v495_v2 = vld [vmem:[#allocation2 + $0x388] sm:$0xff]  ;;  %p346_p2 = scmp.lt.s32.totalorder %s7545_s28, 1  ;;  %vm4331_vm0 = vcmask 1040384  }
  0x35   : > { %v502_v1 = vld [vmem:[#allocation2 + $0x3c0] sm:$0xff]  ;;  %v503_v4 = vld [vmem:[#allocation2 + $0x3c8] sm:$0xff]  ;;  %vm4332_vm1 = vsmask.f32 256 }
  0x36   : > { %v6165_v3 = vcombine.high %v494_v0, %v502_v1  ;;  %v6164_v5 = vcombine.low %v494_v0, %v502_v1  ;;  %v478_v6 = vld [vmem:[#allocation2 + $0x300] sm:$0xff]  ;;  %v6167_v8 = vcombine.high %v495_v2, %v503_v4  ;;  %v6166_v9 = vcombine.low %v495_v2, %v503_v4  ;;  %v479_v11 = vld [vmem:[#allocation2 + $0x308] sm:$0xff]  ;;  %s8385_s28 = smov (!%p346_p2, %s7545_s28), 1  ;;  %vm8333_vm2 = vmand %vm4331_vm0, %vm4332_vm1 }
  0x37   : > { %v486_v7 = vld [vmem:[#allocation2 + $0x340] sm:$0xff]  ;;  %v487_v12 = vld [vmem:[#allocation2 + $0x348] sm:$0xff]  ;;  %s7094_s29 = smul.u32 112, %s8385_s28  ;;  %s358_s25 = scalar_lea.vmem %s8361_s8, %s8385_s28 }
  0x38   : > { %v6149_v10 = vcombine.high %v478_v6, %v486_v7  ;;  %v462_v13 = vld [vmem:[#allocation2 + $0x280] sm:$0xff]  ;;  %2002 = vmatprep.subr.bf16.mxu0 %v6165_v3  ;;  %v6151_v14 = vcombine.high %v479_v11, %v487_v12  ;;  %v463_v16 = vld [vmem:[#allocation2 + $0x288] sm:$0xff]  ;;  %2073 = vmatprep.subr.bf16.mxu1 %v6167_v8  ;;  %v6148_v18 = vcombine.low %v478_v6, %v486_v7  ;;  %s7095_s17 = smul.u32 28, %s8385_s28 }
  0x39   : > { %v470_v15 = vld [vmem:[#allocation2 + $0x2c0] sm:$0xff]  ;;  %v471_v17 = vld [vmem:[#allocation2 + $0x2c8] sm:$0xff]  ;;  %2003 = vmatpush1.bf16.msra.mxu0 %v6164_v5  ;;  %2074 = vmatpush1.bf16.msra.mxu1 %v6166_v9  ;;  %v6150_v19 = vcombine.low %v479_v11, %v487_v12  ;;  %s7620_s10 = scalar_lea.vmem %s8353_s0, %s7094_s29 }
  0x3a   : > { %2004 = vmatprep.subr.bf16.mxu0 %v6149_v10  ;;  %v6133_v20 = vcombine.high %v462_v13, %v470_v15  ;;  %2075 = vmatprep.subr.bf16.mxu1 %v6151_v14  ;;  %v6135_v21 = vcombine.high %v463_v16, %v471_v17  ;;  %v446_v22 = vld [vmem:[#allocation2 + $0x200] sm:$0xff]  ;;  %v447_v24 = vld [vmem:[#allocation2 + $0x208] sm:$0xff]  ;;  %v6132_v26 = vcombine.low %v462_v13, %v470_v15  ;;  %v363_v54 = vld [vmem:[%s7620_s10 + $0x18] sm:$0xff]  ;;  %s8322_s20 = scalar_lea.vmem %s8360_s7, %s7095_s17 }
  0x3b   : > { %v454_v23 = vld [vmem:[#allocation2 + $0x240] sm:$0xff]  ;;  %v455_v25 = vld [vmem:[#allocation2 + $0x248] sm:$0xff]  ;;  %v6134_v27 = vcombine.low %v463_v16, %v471_v17 }
  0x3c   : > { %v6117_v28 = vcombine.high %v446_v22, %v454_v23  ;;  %v6119_v29 = vcombine.high %v447_v24, %v455_v25  ;;  %v430_v30 = vld [vmem:[#allocation2 + $0x180] sm:$0xff]  ;;  %v431_v32 = vld [vmem:[#allocation2 + $0x188] sm:$0xff]  ;;  %v6116_v34 = vcombine.low %v446_v22, %v454_v23  ;;  %v6118_v35 = vcombine.low %v447_v24, %v455_v25 }
  0x3d   : > { %2005 = vmatpush1.bf16.msra.mxu0 %v6148_v18  ;;  %2076 = vmatpush1.bf16.msra.mxu1 %v6150_v19  ;;  %v438_v31 = vld [vmem:[#allocation2 + $0x1c0] sm:$0xff]  ;;  %v439_v33 = vld [vmem:[#allocation2 + $0x1c8] sm:$0xff] }
  0x3e   : > { %2006 = vmatprep.subr.bf16.mxu0 %v6133_v20  ;;  %2077 = vmatprep.subr.bf16.mxu1 %v6135_v21  ;;  %v6101_v36 = vcombine.high %v430_v30, %v438_v31  ;;  %v6103_v37 = vcombine.high %v431_v32, %v439_v33  ;;  %v414_v38 = vld [vmem:[#allocation2 + $0x100] sm:$0xff]  ;;  %v415_v40 = vld [vmem:[#allocation2 + $0x108] sm:$0xff]  ;;  %v6100_v42 = vcombine.low %v430_v30, %v438_v31 }
  0x3f   : > { %v422_v39 = vld [vmem:[#allocation2 + $0x140] sm:$0xff]  ;;  %v423_v41 = vld [vmem:[#allocation2 + $0x148] sm:$0xff]  ;;  %v6102_v43 = vcombine.low %v431_v32, %v439_v33 }
  0x40   : > { %v6085_v44 = vcombine.high %v414_v38, %v422_v39  ;;  %v6087_v45 = vcombine.high %v415_v40, %v423_v41  ;;  %v398_v46 = vld [vmem:[#allocation2 + $0x80] sm:$0xff]  ;;  %v399_v48 = vld [vmem:[#allocation2 + $0x88] sm:$0xff]  ;;  %v6084_v50 = vcombine.low %v414_v38, %v422_v39  ;;  %v6086_v51 = vcombine.low %v415_v40, %v423_v41 }
  0x41   : > { %2007 = vmatpush1.bf16.msra.mxu0 %v6132_v26  ;;  %2078 = vmatpush1.bf16.msra.mxu1 %v6134_v27  ;;  %v406_v47 = vld [vmem:[#allocation2 + $0xc0] sm:$0xff]  ;;  %v407_v49 = vld [vmem:[#allocation2 + $0xc8] sm:$0xff] }
  0x42   : > { %2008 = vmatprep.subr.bf16.mxu0 %v6117_v28  ;;  %2079 = vmatprep.subr.bf16.mxu1 %v6119_v29  ;;  %v6069_v52 = vcombine.high %v398_v46, %v406_v47  ;;  %v361_v53 = vld [vmem:[%s7620_s10 + $0x8] sm:$0xff]  ;;  %v6071_v55 = vcombine.high %v399_v48, %v407_v49  ;;  %v382_v56 = vld [vmem:[#allocation2] sm:$0xff]  ;;  %v6068_v61 = vcombine.low %v398_v46, %v406_v47 }
  0x43   : > { %v390_v57 = vld [vmem:[#allocation2 + $0x40] sm:$0xff]  ;;  %v7624_v58 = vpack.c.bf16 %v363_v54, %v361_v53  ;;  %v383_v59 = vld [vmem:[#allocation2 + $0x8] sm:$0xff]  ;;  %v6070_v62 = vcombine.low %v399_v48, %v407_v49 }
  0x44   : > { %v391_v60 = vld [vmem:[#allocation2 + $0x48] sm:$0xff]  ;;  %v6053_v63 = vcombine.high %v382_v56, %v390_v57  ;;  %v622_v1 = vld [vmem:[#allocation2 + $0x780] sm:$0xff]  ;;  %v6052_v5 = vcombine.low %v382_v56, %v390_v57 }
  0x45   : > { %2009 = vmatpush1.bf16.msra.mxu0 %v6116_v34  ;;  %2080 = vmatpush1.bf16.msra.mxu1 %v6118_v35  ;;  %v6055_v0 = vcombine.high %v383_v59, %v391_v60  ;;  %v630_v2 = vld [vmem:[#allocation2 + $0x7c0] sm:$0xff]  ;;  %v623_v3 = vld [vmem:[#allocation2 + $0x788] sm:$0xff]  ;;  %v6054_v6 = vcombine.low %v383_v59, %v391_v60 }
  0x46   : > { %2010 = vmatprep.subr.bf16.mxu0 %v6101_v36  ;;  %2081 = vmatprep.subr.bf16.mxu1 %v6103_v37  ;;  %v631_v4 = vld [vmem:[#allocation2 + $0x7c8] sm:$0xff]  ;;  %v6293_v7 = vcombine.high %v622_v1, %v630_v2  ;;  %v606_v9 = vld [vmem:[#allocation2 + $0x700] sm:$0xff]  ;;  %v6292_v13 = vcombine.low %v622_v1, %v630_v2  ;;  %v496_v2 = vld [vmem:[#allocation2 + $0x390] sm:$0xff] }
  0x47   : > { %2034 = vmatprep.mubr.bf16.mxu0 %v7624_v58  ;;  %2105 = vmatprep.mubr.bf16.mxu1 %v7624_v58  ;;  %v6295_v8 = vcombine.high %v623_v3, %v631_v4  ;;  %v614_v10 = vld [vmem:[#allocation2 + $0x740] sm:$0xff]  ;;  %v607_v11 = vld [vmem:[#allocation2 + $0x708] sm:$0xff]  ;;  %v6294_v14 = vcombine.low %v623_v3, %v631_v4  ;;  %v504_v3 = vld [vmem:[#allocation2 + $0x3d0] sm:$0xff] }
  0x48   : > { %v615_v12 = vld [vmem:[#allocation2 + $0x748] sm:$0xff]  ;;  %v6277_v15 = vcombine.high %v606_v9, %v614_v10  ;;  %v590_v17 = vld [vmem:[#allocation2 + $0x680] sm:$0xff]  ;;  %v6276_v21 = vcombine.low %v606_v9, %v614_v10  ;;  %v497_v4 = vld [vmem:[#allocation2 + $0x398] sm:$0xff]  ;;  %v6169_v10 = vcombine.high %v496_v2, %v504_v3 }
  0x49   : > { %2011 = vmatpush1.bf16.msra.mxu0 %v6100_v42  ;;  %2082 = vmatpush1.bf16.msra.mxu1 %v6102_v43  ;;  %v6279_v16 = vcombine.high %v607_v11, %v615_v12  ;;  %v598_v18 = vld [vmem:[#allocation2 + $0x6c0] sm:$0xff]  ;;  %v591_v19 = vld [vmem:[#allocation2 + $0x688] sm:$0xff]  ;;  %v6278_v22 = vcombine.low %v607_v11, %v615_v12  ;;  %v480_v12 = vld [vmem:[#allocation2 + $0x310] sm:$0xff] }
  0x4a   : > { %2012 = vmatprep.subr.bf16.mxu0 %v6085_v44  ;;  %2083 = vmatprep.subr.bf16.mxu1 %v6087_v45  ;;  %v599_v20 = vld [vmem:[#allocation2 + $0x6c8] sm:$0xff]  ;;  %v6261_v23 = vcombine.high %v590_v17, %v598_v18  ;;  %v574_v25 = vld [vmem:[#allocation2 + $0x600] sm:$0xff]  ;;  %v6260_v29 = vcombine.low %v590_v17, %v598_v18  ;;  %v367_v18 = vld [vmem:[%s7620_s10 + $0x38] sm:$0xff] }
  0x4b   : > { %v6263_v24 = vcombine.high %v591_v19, %v599_v20  ;;  %v582_v26 = vld [vmem:[#allocation2 + $0x640] sm:$0xff]  ;;  %v575_v27 = vld [vmem:[#allocation2 + $0x608] sm:$0xff]  ;;  %v6262_v30 = vcombine.low %v591_v19, %v599_v20  ;;  %v6168_v19 = vcombine.low %v496_v2, %v504_v3  ;;  %v400_v2 = vld [vmem:[#allocation2 + $0x90] sm:$0xff] }
  0x4c   : > { %v583_v28 = vld [vmem:[#allocation2 + $0x648] sm:$0xff]  ;;  %v6245_v31 = vcombine.high %v574_v25, %v582_v26  ;;  %v558_v33 = vld [vmem:[#allocation2 + $0x580] sm:$0xff]  ;;  %v6244_v37 = vcombine.low %v574_v25, %v582_v26  ;;  %v472_v25 = vld [vmem:[#allocation2 + $0x2d0] sm:$0xff] }
  0x4d   : > { %2013 = vmatpush1.bf16.msra.mxu0 %v6084_v50  ;;  %2084 = vmatpush1.bf16.msra.mxu1 %v6086_v51  ;;  %v6247_v32 = vcombine.high %v575_v27, %v583_v28  ;;  %v566_v34 = vld [vmem:[#allocation2 + $0x5c0] sm:$0xff]  ;;  %v559_v35 = vld [vmem:[#allocation2 + $0x588] sm:$0xff]  ;;  %v6246_v38 = vcombine.low %v575_v27, %v583_v28  ;;  %v465_v26 = vld [vmem:[#allocation2 + $0x298] sm:$0xff] }
  0x4e   : > { %2014 = vmatprep.subr.bf16.mxu0 %v6069_v52  ;;  %2085 = vmatprep.subr.bf16.mxu1 %v6071_v55  ;;  %v567_v36 = vld [vmem:[#allocation2 + $0x5c8] sm:$0xff]  ;;  %v6229_v39 = vcombine.high %v558_v33, %v566_v34  ;;  %v542_v41 = vld [vmem:[#allocation2 + $0x500] sm:$0xff]  ;;  %v6228_v45 = vcombine.low %v558_v33, %v566_v34  ;;  %v473_v27 = vld [vmem:[#allocation2 + $0x2d8] sm:$0xff] }
  0x4f   : > { %v6231_v40 = vcombine.high %v559_v35, %v567_v36  ;;  %v550_v42 = vld [vmem:[#allocation2 + $0x540] sm:$0xff]  ;;  %v543_v43 = vld [vmem:[#allocation2 + $0x508] sm:$0xff]  ;;  %v6230_v46 = vcombine.low %v559_v35, %v567_v36  ;;  %v448_v33 = vld [vmem:[#allocation2 + $0x210] sm:$0xff]  ;;  %v6139_v35 = vcombine.high %v465_v26, %v473_v27 }
  0x50   : > { %v551_v44 = vld [vmem:[#allocation2 + $0x548] sm:$0xff]  ;;  %v6213_v47 = vcombine.high %v542_v41, %v550_v42  ;;  %v526_v49 = vld [vmem:[#allocation2 + $0x480] sm:$0xff]  ;;  %v6212_v53 = vcombine.low %v542_v41, %v550_v42  ;;  %v456_v34 = vld [vmem:[#allocation2 + $0x250] sm:$0xff]  ;;  %v6138_v42 = vcombine.low %v465_v26, %v473_v27 }
  0x51   : > { %2015 = vmatpush1.bf16.msra.mxu0 %v6068_v61  ;;  %2086 = vmatpush1.bf16.msra.mxu1 %v6070_v62  ;;  %v6215_v48 = vcombine.high %v543_v43, %v551_v44  ;;  %v534_v50 = vld [vmem:[#allocation2 + $0x4c0] sm:$0xff]  ;;  %v527_v51 = vld [vmem:[#allocation2 + $0x488] sm:$0xff]  ;;  %v6214_v54 = vcombine.low %v543_v43, %v551_v44  ;;  %v449_v36 = vld [vmem:[#allocation2 + $0x218] sm:$0xff]  ;;  %v6121_v43 = vcombine.high %v448_v33, %v456_v34 }
  0x52   : > { %2016 = vmatprep.subr.bf16.mxu0 %v6053_v63  ;;  %2087 = vmatprep.subr.bf16.mxu1 %v6055_v0  ;;  %v535_v52 = vld [vmem:[#allocation2 + $0x4c8] sm:$0xff]  ;;  %v6197_v55 = vcombine.high %v526_v49, %v534_v50  ;;  %v510_v57 = vld [vmem:[#allocation2 + $0x400] sm:$0xff]  ;;  %v6196_v62 = vcombine.low %v526_v49, %v534_v50  ;;  %v432_v44 = vld [vmem:[#allocation2 + $0x190] sm:$0xff] }
  0x53   : > { %v6199_v56 = vcombine.high %v527_v51, %v535_v52  ;;  %v518_v59 = vld [vmem:[#allocation2 + $0x440] sm:$0xff]  ;;  %v511_v60 = vld [vmem:[#allocation2 + $0x408] sm:$0xff]  ;;  %v6198_v63 = vcombine.low %v527_v51, %v535_v52  ;;  %v370_v50 = vld [vmem:[%s7620_s10 + $0x50] sm:$0xff]  ;;  %v6120_v52 = vcombine.low %v448_v33, %v456_v34 }
  0x54   : > { %v519_v61 = vld [vmem:[#allocation2 + $0x448] sm:$0xff]  ;;  %v6181_v0 = vcombine.high %v510_v57, %v518_v59  ;;  %v368_v49 = vld [vmem:[%s7620_s10 + $0x40] sm:$0xff]  ;;  %v441_v51 = vld [vmem:[#allocation2 + $0x1d8] sm:$0xff] }
  0x55   : > { %2017 = vmatpush1.bf16.msra.mxu0 %v6052_v5  ;;  %2088 = vmatpush1.bf16.msra.mxu1 %v6054_v6  ;;  %v6183_v1 = vcombine.high %v511_v60, %v519_v61  ;;  %v505_v5 = vld [vmem:[#allocation2 + $0x3d8] sm:$0xff]  ;;  %v6180_v6 = vcombine.low %v510_v57, %v518_v59  ;;  %v6182_v9 = vcombine.low %v511_v60, %v519_v61  ;;  %v365_v17 = vld [vmem:[%s7620_s10 + $0x28] sm:$0xff]  ;;  %v408_v3 = vld [vmem:[#allocation2 + $0xd0] sm:$0xff] }
  0x56   : > { %2018 = vmatprep.subr.bf16.mxu0 %v6293_v7  ;;  %2089 = vmatprep.subr.bf16.mxu1 %v6295_v8  ;;  %v360_v7 = vld [vmem:[%s7620_s10] sm:$0xff]  ;;  %v362_v8 = vld [vmem:[%s7620_s10 + $0x10] sm:$0xff]  ;;  %v6171_v11 = vcombine.high %v497_v4, %v505_v5  ;;  %v6170_v20 = vcombine.low %v497_v4, %v505_v5  ;;  %v417_v57 = vld [vmem:[#allocation2 + $0x118] sm:$0xff] }
  0x57   : > { %v425_v59 = vld [vmem:[#allocation2 + $0x158] sm:$0xff]  ;;  %v373_v61 = vld [vmem:[%s7620_s10 + $0x68] sm:$0x1] }
  0x58   : > { %v401_v4 = vld [vmem:[#allocation2 + $0x98] sm:$0xff]  ;;  %v6091_v5 = vcombine.high %v417_v57, %v425_v59 }
  0x59   : > { %2019 = vmatpush2.bf16.msra.mxu0 %v6292_v13  ;;  %2090 = vmatpush2.bf16.msra.mxu1 %v6294_v14  ;;  %v488_v13 = vld [vmem:[#allocation2 + $0x350] sm:$0xff]  ;;  %v481_v14 = vld [vmem:[#allocation2 + $0x318] sm:$0xff] }
  0x5a   : > { %2020 = vmatprep.subr.bf16.mxu0 %v6277_v15  ;;  %2091 = vmatprep.subr.bf16.mxu1 %v6279_v16  ;;  %v7630_v15 = vpack.c.bf16 %v362_v8, %v360_v7  ;;  %v489_v16 = vld [vmem:[#allocation2 + $0x358] sm:$0xff]  ;;  %v6152_v28 = vcombine.low %v480_v12, %v488_v13  ;;  %v372_v7 = vld [vmem:[%s7620_s10 + $0x60] sm:$0x1] }
  0x5b   : > { %v409_v8 = vld [vmem:[#allocation2 + $0xd8] sm:$0xff] }
  0x5c   : > { %v633_v27 = vld [vmem:[#allocation2 + $0x7d8] sm:$0xff] }
  0x5d   : > { %2021 = vmatpush2.bf16.msra.mxu0 %v6276_v21  ;;  %2092 = vmatpush2.bf16.msra.mxu1 %v6278_v22  ;;  %v6153_v21 = vcombine.high %v480_v12, %v488_v13  ;;  %v6155_v22 = vcombine.high %v481_v14, %v489_v16  ;;  %v384_v12 = vld [vmem:[#allocation2 + $0x10] sm:$0xff]  ;;  %v609_v33 = vld [vmem:[#allocation2 + $0x718] sm:$0xff] }
  0x5e   : > { %2022 = vmatprep.subr.bf16.mxu0 %v6261_v23  ;;  %2093 = vmatprep.subr.bf16.mxu1 %v6263_v24  ;;  %v7634_v23 = vpack.c.bf16 %v367_v18, %v365_v17  ;;  %v464_v24 = vld [vmem:[#allocation2 + $0x290] sm:$0xff]  ;;  %v393_v17 = vld [vmem:[#allocation2 + $0x58] sm:$0xff]  ;;  %v7664_v18 = vpack.c.bf16 %v372_v7, %v372_v7 }
  0x5f   : > { %v6136_v41 = vcombine.low %v464_v24, %v472_v25  ;;  %v392_v13 = vld [vmem:[#allocation2 + $0x50] sm:$0xff] }
  0x61   : > { %2023 = vmatpush2.bf16.msra.mxu0 %v6260_v29  ;;  %2094 = vmatpush2.bf16.msra.mxu1 %v6262_v30  ;;  %v364_v29 = vld [vmem:[%s7620_s10 + $0x20] sm:$0xff]  ;;  %v366_v30 = vld [vmem:[%s7620_s10 + $0x30] sm:$0xff] }
  0x62   : > { %2024 = vmatprep.subr.bf16.mxu0 %v6245_v31  ;;  %2095 = vmatprep.subr.bf16.mxu1 %v6247_v32  ;;  %v6154_v31 = vcombine.low %v481_v14, %v489_v16  ;;  %v6137_v32 = vcombine.high %v464_v24, %v472_v25  ;;  %v385_v14 = vld [vmem:[#allocation2 + $0x18] sm:$0xff]  ;;  %v6075_v16 = vcombine.high %v401_v4, %v409_v8  ;;  %v632_v24 = vld [vmem:[#allocation2 + $0x7d0] sm:$0xff] }
  0x63   : > { %v625_v25 = vld [vmem:[#allocation2 + $0x798] sm:$0xff]  ;;  %v6059_v26 = vcombine.high %v385_v14, %v393_v17 }
  0x64   : > { %v6299_v34 = vcombine.high %v625_v25, %v633_v27 }
  0x65   : > { %2025 = vmatpush2.bf16.msra.mxu0 %v6244_v37  ;;  %2096 = vmatpush2.bf16.msra.mxu1 %v6246_v38  ;;  %v457_v37 = vld [vmem:[#allocation2 + $0x258] sm:$0xff]  ;;  %v369_v38 = vld [vmem:[%s7620_s10 + $0x48] sm:$0xff] }
  0x66   : > { %2026 = vmatprep.subr.bf16.mxu0 %v6229_v39  ;;  %2097 = vmatprep.subr.bf16.mxu1 %v6231_v40  ;;  %v7643_v39 = vpack.c.bf16 %v366_v30, %v364_v29  ;;  %v371_v40 = vld [vmem:[%s7620_s10 + $0x58] sm:$0xff]  ;;  %v6058_v29 = vcombine.low %v385_v14, %v393_v17 }
  0x67   : > { %v529_v14 = vld [vmem:[#allocation2 + $0x498] sm:$0xff] }
  0x68   : > { %v537_v17 = vld [vmem:[#allocation2 + $0x4d8] sm:$0xff] }
  0x69   : > { %2027 = vmatpush2.bf16.msra.mxu0 %v6228_v45  ;;  %2098 = vmatpush2.bf16.msra.mxu1 %v6230_v46  ;;  %v440_v45 = vld [vmem:[#allocation2 + $0x1d0] sm:$0xff]  ;;  %v433_v46 = vld [vmem:[#allocation2 + $0x198] sm:$0xff] }
  0x6a   : > { %2028 = vmatprep.subr.bf16.mxu0 %v6213_v47  ;;  %2099 = vmatprep.subr.bf16.mxu1 %v6215_v48  ;;  %v6123_v47 = vcombine.high %v449_v36, %v457_v37  ;;  %v7646_v48 = vpack.c.bf16 %v371_v40, %v369_v38  ;;  %v6107_v60 = vcombine.high %v433_v46, %v441_v51  ;;  %v592_v40 = vld [vmem:[#allocation2 + $0x690] sm:$0xff] }
  0x6d   : > { %2029 = vmatpush2.bf16.msra.mxu0 %v6212_v53  ;;  %2100 = vmatpush2.bf16.msra.mxu1 %v6214_v54  ;;  %v416_v53 = vld [vmem:[#allocation2 + $0x110] sm:$0xff]  ;;  %v6122_v54 = vcombine.low %v449_v36, %v457_v37  ;;  %v6298_v37 = vcombine.low %v625_v25, %v633_v27  ;;  %v513_v25 = vld [vmem:[#allocation2 + $0x418] sm:$0xff] }
  0x6e   : > { %2030 = vmatprep.subr.bf16.mxu0 %v6197_v55  ;;  %2101 = vmatprep.subr.bf16.mxu1 %v6199_v56  ;;  %v6105_v55 = vcombine.high %v432_v44, %v440_v45  ;;  %v424_v56 = vld [vmem:[#allocation2 + $0x150] sm:$0xff]  ;;  %v521_v27 = vld [vmem:[#allocation2 + $0x458] sm:$0xff] }
  0x71   : > { %2031 = vmatpush2.bf16.msra.mxu0 %v6196_v62  ;;  %2102 = vmatpush2.bf16.msra.mxu1 %v6198_v63  ;;  %v7655_v62 = vpack.c.bf16 %v370_v50, %v368_v49  ;;  %v6104_v63 = vcombine.low %v432_v44, %v440_v45  ;;  %v601_v44 = vld [vmem:[#allocation2 + $0x6d8] sm:$0xff]  ;;  %v576_v49 = vld [vmem:[#allocation2 + $0x610] sm:$0xff] }
  0x72   : > { %2032 = vmatprep.subr.bf16.mxu0 %v6181_v0  ;;  %2103 = vmatprep.subr.bf16.mxu1 %v6183_v1  ;;  %v6106_v0 = vcombine.low %v433_v46, %v441_v51  ;;  %v6089_v1 = vcombine.high %v416_v53, %v424_v56  ;;  %v584_v50 = vld [vmem:[#allocation2 + $0x650] sm:$0xff]  ;;  %v577_v51 = vld [vmem:[#allocation2 + $0x618] sm:$0xff] }
  0x75   : > { %2033 = vmatpush2.bf16.msra.mxu0 %v6180_v6  ;;  %2104 = vmatpush2.bf16.msra.mxu1 %v6182_v9  ;;  %v7657_v6 = vpack.c.bf16 %v373_v61, %v373_v61  ;;  %v6088_v9 = vcombine.low %v416_v53, %v424_v56  ;;  %v585_v53 = vld [vmem:[#allocation2 + $0x658] sm:$0xff]  ;;  %v6249_v56 = vcombine.high %v576_v49, %v584_v50 }
  0x76   : > { %2144 = vmatprep.subr.bf16.mxu0 %v6169_v10  ;;  %2215 = vmatprep.subr.bf16.mxu1 %v6171_v11  ;;  %v6090_v10 = vcombine.low %v417_v57, %v425_v59  ;;  %v6073_v11 = vcombine.high %v400_v2, %v408_v3  ;;  %v560_v57 = vld [vmem:[#allocation2 + $0x590] sm:$0xff]  ;;  %v6251_v61 = vcombine.high %v577_v51, %v585_v53 }
  0x77   : > { %v568_v59 = vld [vmem:[#allocation2 + $0x5d0] sm:$0xff] }
  0x78   : > { %2035 = vmatmul.mubr.bf16.vlgmr.msra.gmra.mxu0 %v7630_v15  ;;  %2106 = vmatmul.mubr.bf16.vlgmr.msra.gmra.mxu1 %v7630_v15 }
  0x79   : > { %2145 = vmatpush1.bf16.msra.mxu0 %v6168_v19  ;;  %2216 = vmatpush1.bf16.msra.mxu1 %v6170_v20  ;;  %v6072_v19 = vcombine.low %v400_v2, %v408_v3  ;;  %v6074_v20 = vcombine.low %v401_v4, %v409_v8  ;;  %v6233_v2 = vcombine.high %v560_v57, %v568_v59  ;;  %v544_v3 = vld [vmem:[#allocation2 + $0x510] sm:$0xff]  ;;  %v553_v8 = vld [vmem:[#allocation2 + $0x558] sm:$0xff] }
  0x7a   : > { %2146 = vmatprep.subr.bf16.mxu0 %v6153_v21  ;;  %2217 = vmatprep.subr.bf16.mxu1 %v6155_v22  ;;  %v6057_v21 = vcombine.high %v384_v12, %v392_v13  ;;  %v624_v22 = vld [vmem:[#allocation2 + $0x790] sm:$0xff] }
  0x7b   : > { %2044 = vmatprep.mubr.bf16.mxu0 %v7634_v23  ;;  %2115 = vmatprep.mubr.bf16.mxu1 %v7634_v23  ;;  %v6297_v30 = vcombine.high %v624_v22, %v632_v24  ;;  %v6296_v36 = vcombine.low %v624_v22, %v632_v24  ;;  %v552_v4 = vld [vmem:[#allocation2 + $0x550] sm:$0xff] }
  0x7c   : > { %v512_v22 = vld [vmem:[#allocation2 + $0x410] sm:$0xff] }
  0x7d   : > { %2147 = vmatpush1.bf16.msra.mxu0 %v6152_v28  ;;  %2218 = vmatpush1.bf16.msra.mxu1 %v6154_v31  ;;  %v6056_v28 = vcombine.low %v384_v12, %v392_v13  ;;  %v608_v31 = vld [vmem:[#allocation2 + $0x710] sm:$0xff] }
  0x7e   : > { %2148 = vmatprep.subr.bf16.mxu0 %v6137_v32  ;;  %2219 = vmatprep.subr.bf16.mxu1 %v6139_v35  ;;  %v616_v32 = vld [vmem:[#allocation2 + $0x750] sm:$0xff]  ;;  %v617_v35 = vld [vmem:[#allocation2 + $0x758] sm:$0xff] }
  0x7f   : > { %v6281_v38 = vcombine.high %v608_v31, %v616_v32  ;;  %v6280_v45 = vcombine.low %v608_v31, %v616_v32  ;;  %v6282_v46 = vcombine.low %v609_v33, %v617_v35  ;;  %v528_v12 = vld [vmem:[#allocation2 + $0x490] sm:$0xff]  ;;  %v498_v31 = vld [vmem:[#allocation2 + $0x3a0] sm:$0xff] }
  0x80   : > { %2045 = vmatmul.mubr.bf16.gmra.mxu0 %v7643_v39  ;;  %2116 = vmatmul.mubr.bf16.gmra.mxu1 %v7643_v39  ;;  %v536_v13 = vld [vmem:[#allocation2 + $0x4d0] sm:$0xff]  ;;  %v506_v32 = vld [vmem:[#allocation2 + $0x3e0] sm:$0xff] }
  0x81   : > { %2149 = vmatpush1.bf16.msra.mxu0 %v6136_v41  ;;  %2220 = vmatpush1.bf16.msra.mxu1 %v6138_v42  ;;  %v600_v41 = vld [vmem:[#allocation2 + $0x6d0] sm:$0xff]  ;;  %v593_v42 = vld [vmem:[#allocation2 + $0x698] sm:$0xff] }
  0x82   : > { %2150 = vmatprep.subr.bf16.mxu0 %v6121_v43  ;;  %2221 = vmatprep.subr.bf16.mxu1 %v6123_v47  ;;  %v6283_v43 = vcombine.high %v609_v33, %v617_v35  ;;  %v6265_v47 = vcombine.high %v592_v40, %v600_v41  ;;  %v520_v24 = vld [vmem:[#allocation2 + $0x450] sm:$0xff]  ;;  %v499_v33 = vld [vmem:[#allocation2 + $0x3a8] sm:$0xff] }
  0x83   : > { %2054 = vmatprep.mubr.bf16.mxu0 %v7646_v48  ;;  %2125 = vmatprep.mubr.bf16.mxu1 %v7646_v48  ;;  %v507_v35 = vld [vmem:[#allocation2 + $0x3e8] sm:$0xff] }
  0x85   : > { %2151 = vmatpush1.bf16.msra.mxu0 %v6120_v52  ;;  %2222 = vmatpush1.bf16.msra.mxu1 %v6122_v54  ;;  %v6267_v52 = vcombine.high %v593_v42, %v601_v44  ;;  %v6264_v54 = vcombine.low %v592_v40, %v600_v41  ;;  %v482_v40 = vld [vmem:[#allocation2 + $0x320] sm:$0xff] }
  0x86   : > { %2152 = vmatprep.subr.bf16.mxu0 %v6105_v55  ;;  %2223 = vmatprep.subr.bf16.mxu1 %v6107_v60  ;;  %v6266_v55 = vcombine.low %v593_v42, %v601_v44  ;;  %v561_v60 = vld [vmem:[#allocation2 + $0x598] sm:$0xff]  ;;  %v490_v41 = vld [vmem:[#allocation2 + $0x360] sm:$0xff]  ;;  %v483_v42 = vld [vmem:[#allocation2 + $0x328] sm:$0xff] }
  0x87   : > { %v491_v44 = vld [vmem:[#allocation2 + $0x368] sm:$0xff] }
  0x88   : > { %2055 = vmatmul.mubr.bf16.gmra.mxu0 %v7655_v62  ;;  %2126 = vmatmul.mubr.bf16.gmra.mxu1 %v7655_v62 }
  0x89   : > { %2153 = vmatpush1.bf16.msra.mxu0 %v6104_v63  ;;  %2224 = vmatpush1.bf16.msra.mxu1 %v6106_v0  ;;  %v569_v63 = vld [vmem:[#allocation2 + $0x5d8] sm:$0xff]  ;;  %v6248_v0 = vcombine.low %v576_v49, %v584_v50  ;;  %v6159_v49 = vcombine.high %v483_v42, %v491_v44  ;;  %v466_v50 = vld [vmem:[#allocation2 + $0x2a0] sm:$0xff] }
  0x8a   : > { %2154 = vmatprep.subr.bf16.mxu0 %v6089_v1  ;;  %2225 = vmatprep.subr.bf16.mxu1 %v6091_v5  ;;  %v6250_v1 = vcombine.low %v577_v51, %v585_v53  ;;  %v545_v5 = vld [vmem:[#allocation2 + $0x518] sm:$0xff]  ;;  %v6235_v7 = vcombine.high %v561_v60, %v569_v63  ;;  %v474_v51 = vld [vmem:[#allocation2 + $0x2e0] sm:$0xff]  ;;  %v475_v53 = vld [vmem:[#allocation2 + $0x2e8] sm:$0xff] }
  0x8b   : > { %2064 = vmatprep.mubr.bf16.mxu0 %v7657_v6  ;;  %2135 = vmatprep.mubr.bf16.mxu1 %v7657_v6 }
  0x8d   : > { %2155 = vmatpush1.bf16.msra.mxu0 %v6088_v9  ;;  %2226 = vmatpush1.bf16.msra.mxu1 %v6090_v10  ;;  %v6232_v9 = vcombine.low %v560_v57, %v568_v59  ;;  %v6234_v10 = vcombine.low %v561_v60, %v569_v63  ;;  %v450_v59 = vld [vmem:[#allocation2 + $0x220] sm:$0xff]  ;;  %v459_v63 = vld [vmem:[#allocation2 + $0x268] sm:$0xff] }
  0x8e   : > { %2156 = vmatprep.subr.bf16.mxu0 %v6073_v11  ;;  %2227 = vmatprep.subr.bf16.mxu1 %v6075_v16  ;;  %v6217_v11 = vcombine.high %v544_v3, %v552_v4  ;;  %v6219_v16 = vcombine.high %v545_v5, %v553_v8  ;;  %v458_v60 = vld [vmem:[#allocation2 + $0x260] sm:$0xff] }
  0x90   : > { %2065 = vmatmul.mubr.bf16.gmra.mxu0 %v7664_v18  ;;  %2136 = vmatmul.mubr.bf16.gmra.mxu1 %v7664_v18 }
  0x91   : > { %2157 = vmatpush1.bf16.msra.mxu0 %v6072_v19  ;;  %2228 = vmatpush1.bf16.msra.mxu1 %v6074_v20  ;;  %v6216_v19 = vcombine.low %v544_v3, %v552_v4  ;;  %v6218_v20 = vcombine.low %v545_v5, %v553_v8  ;;  %v434_v4 = vld [vmem:[#allocation2 + $0x1a0] sm:$0xff]  ;;  %v443_v8 = vld [vmem:[#allocation2 + $0x1e8] sm:$0xff] }
  0x92   : > { %2158 = vmatprep.subr.bf16.mxu0 %v6057_v21  ;;  %2229 = vmatprep.subr.bf16.mxu1 %v6059_v26  ;;  %v6201_v21 = vcombine.high %v528_v12, %v536_v13  ;;  %v6203_v26 = vcombine.high %v529_v14, %v537_v17  ;;  %v442_v5 = vld [vmem:[#allocation2 + $0x1e0] sm:$0xff] }
  0x93   : > { %2176 = vmatprep.mubr.bf16.mxu0 %v7624_v58  ;;  %2247 = vmatprep.mubr.bf16.mxu1 %v7624_v58 }
  0x95   : > { %2159 = vmatpush1.bf16.msra.mxu0 %v6056_v28  ;;  %2230 = vmatpush1.bf16.msra.mxu1 %v6058_v29  ;;  %v6200_v28 = vcombine.low %v528_v12, %v536_v13  ;;  %v6202_v29 = vcombine.low %v529_v14, %v537_v17  ;;  %v418_v13 = vld [vmem:[#allocation2 + $0x120] sm:$0xff]  ;;  %v427_v17 = vld [vmem:[#allocation2 + $0x168] sm:$0xff] }
  0x96   : > { %2160 = vmatprep.subr.bf16.mxu0 %v6297_v30  ;;  %2231 = vmatprep.subr.bf16.mxu1 %v6299_v34  ;;  %v6185_v30 = vcombine.high %v512_v22, %v520_v24  ;;  %v6187_v34 = vcombine.high %v513_v25, %v521_v27  ;;  %v426_v14 = vld [vmem:[#allocation2 + $0x160] sm:$0xff] }
  0x99   : > { %2161 = vmatpush2.bf16.msra.mxu0 %v6296_v36  ;;  %2232 = vmatpush2.bf16.msra.mxu1 %v6298_v37  ;;  %v6184_v36 = vcombine.low %v512_v22, %v520_v24  ;;  %v6186_v37 = vcombine.low %v513_v25, %v521_v27  ;;  %v402_v24 = vld [vmem:[#allocation2 + $0xa0] sm:$0xff]  ;;  %v411_v27 = vld [vmem:[#allocation2 + $0xe8] sm:$0xff] }
  0x9a   : > { %2162 = vmatprep.subr.bf16.mxu0 %v6281_v38  ;;  %2233 = vmatprep.subr.bf16.mxu1 %v6283_v43  ;;  %v6173_v38 = vcombine.high %v498_v31, %v506_v32  ;;  %v6175_v43 = vcombine.high %v499_v33, %v507_v35  ;;  %v410_v25 = vld [vmem:[#allocation2 + $0xe0] sm:$0xff] }
  0x9d   : > { %2163 = vmatpush2.bf16.msra.mxu0 %v6280_v45  ;;  %2234 = vmatpush2.bf16.msra.mxu1 %v6282_v46  ;;  %v6172_v45 = vcombine.low %v498_v31, %v506_v32  ;;  %v6174_v46 = vcombine.low %v499_v33, %v507_v35  ;;  %v386_v32 = vld [vmem:[#allocation2 + $0x20] sm:$0xff]  ;;  %v395_v35 = vld [vmem:[#allocation2 + $0x68] sm:$0xff] }
  0x9e   : > { %2164 = vmatprep.subr.bf16.mxu0 %v6265_v47  ;;  %2235 = vmatprep.subr.bf16.mxu1 %v6267_v52  ;;  %v6157_v47 = vcombine.high %v482_v40, %v490_v41  ;;  %v467_v52 = vld [vmem:[#allocation2 + $0x2a8] sm:$0xff]  ;;  %v394_v33 = vld [vmem:[#allocation2 + $0x60] sm:$0xff] }
  0x9f   : > { %v6143_v57 = vcombine.high %v467_v52, %v475_v53 }
  0xa1   : > { %2165 = vmatpush2.bf16.msra.mxu0 %v6264_v54  ;;  %2236 = vmatpush2.bf16.msra.mxu1 %v6266_v55  ;;  %v6156_v54 = vcombine.low %v482_v40, %v490_v41  ;;  %v6158_v55 = vcombine.low %v483_v42, %v491_v44  ;;  %v626_v41 = vld [vmem:[#allocation2 + $0x7a0] sm:$0xff]  ;;  %v635_v44 = vld [vmem:[#allocation2 + $0x7e8] sm:$0xff] }
  0xa2   : > { %2166 = vmatprep.subr.bf16.mxu0 %v6249_v56  ;;  %2237 = vmatprep.subr.bf16.mxu1 %v6251_v61  ;;  %v6141_v56 = vcombine.high %v466_v50, %v474_v51  ;;  %v451_v61 = vld [vmem:[#allocation2 + $0x228] sm:$0xff]  ;;  %v634_v42 = vld [vmem:[#allocation2 + $0x7e0] sm:$0xff] }
  0xa3   : > { %v6127_v3 = vcombine.high %v451_v61, %v459_v63 }
  0xa5   : > { %2167 = vmatpush2.bf16.msra.mxu0 %v6248_v0  ;;  %2238 = vmatpush2.bf16.msra.mxu1 %v6250_v1  ;;  %v6140_v0 = vcombine.low %v466_v50, %v474_v51  ;;  %v6142_v1 = vcombine.low %v467_v52, %v475_v53  ;;  %v6301_v50 = vcombine.high %v626_v41, %v634_v42  ;;  %v611_v52 = vld [vmem:[#allocation2 + $0x728] sm:$0xff] }
  0xa6   : > { %2168 = vmatprep.subr.bf16.mxu0 %v6233_v2  ;;  %2239 = vmatprep.subr.bf16.mxu1 %v6235_v7  ;;  %v6125_v2 = vcombine.high %v450_v59, %v458_v60  ;;  %v435_v7 = vld [vmem:[#allocation2 + $0x1a8] sm:$0xff] }
  0xa7   : > { %v6111_v12 = vcombine.high %v435_v7, %v443_v8  ;;  %v619_v53 = vld [vmem:[#allocation2 + $0x768] sm:$0xff] }
  0xa9   : > { %2169 = vmatpush2.bf16.msra.mxu0 %v6232_v9  ;;  %2240 = vmatpush2.bf16.msra.mxu1 %v6234_v10  ;;  %v6124_v9 = vcombine.low %v450_v59, %v458_v60  ;;  %v6126_v10 = vcombine.low %v451_v61, %v459_v63  ;;  %v595_v60 = vld [vmem:[#allocation2 + $0x6a8] sm:$0xff]  ;;  %v6287_v63 = vcombine.high %v611_v52, %v619_v53 }
  0xaa   : > { %2170 = vmatprep.subr.bf16.mxu0 %v6217_v11  ;;  %2241 = vmatprep.subr.bf16.mxu1 %v6219_v16  ;;  %v6109_v11 = vcombine.high %v434_v4, %v442_v5  ;;  %v419_v16 = vld [vmem:[#allocation2 + $0x128] sm:$0xff] }
  0xab   : > { %v6095_v22 = vcombine.high %v419_v16, %v427_v17  ;;  %v603_v61 = vld [vmem:[#allocation2 + $0x6e8] sm:$0xff] }
  0xad   : > { %2171 = vmatpush2.bf16.msra.mxu0 %v6216_v19  ;;  %2242 = vmatpush2.bf16.msra.mxu1 %v6218_v20  ;;  %v6108_v19 = vcombine.low %v434_v4, %v442_v5  ;;  %v6110_v20 = vcombine.low %v435_v7, %v443_v8  ;;  %v579_v5 = vld [vmem:[#allocation2 + $0x628] sm:$0xff]  ;;  %v6271_v8 = vcombine.high %v595_v60, %v603_v61 }
  0xae   : > { %2172 = vmatprep.subr.bf16.mxu0 %v6201_v21  ;;  %2243 = vmatprep.subr.bf16.mxu1 %v6203_v26  ;;  %v6093_v21 = vcombine.high %v418_v13, %v426_v14  ;;  %v403_v26 = vld [vmem:[#allocation2 + $0xa8] sm:$0xff] }
  0xaf   : > { %v6079_v31 = vcombine.high %v403_v26, %v411_v27  ;;  %v587_v7 = vld [vmem:[#allocation2 + $0x668] sm:$0xff] }
  0xb1   : > { %2173 = vmatpush2.bf16.msra.mxu0 %v6200_v28  ;;  %2244 = vmatpush2.bf16.msra.mxu1 %v6202_v29  ;;  %v6092_v28 = vcombine.low %v418_v13, %v426_v14  ;;  %v6094_v29 = vcombine.low %v419_v16, %v427_v17  ;;  %v563_v14 = vld [vmem:[#allocation2 + $0x5a8] sm:$0xff]  ;;  %v6255_v17 = vcombine.high %v579_v5, %v587_v7 }
  0xb2   : > { %2174 = vmatprep.subr.bf16.mxu0 %v6185_v30  ;;  %2245 = vmatprep.subr.bf16.mxu1 %v6187_v34  ;;  %v6077_v30 = vcombine.high %v402_v24, %v410_v25  ;;  %v387_v34 = vld [vmem:[#allocation2 + $0x28] sm:$0xff] }
  0xb3   : > { %v6063_v40 = vcombine.high %v387_v34, %v395_v35  ;;  %v571_v16 = vld [vmem:[#allocation2 + $0x5e8] sm:$0xff] }
  0xb5   : > { %2175 = vmatpush2.bf16.msra.mxu0 %v6184_v36  ;;  %2246 = vmatpush2.bf16.msra.mxu1 %v6186_v37  ;;  %v6076_v36 = vcombine.low %v402_v24, %v410_v25  ;;  %v6078_v37 = vcombine.low %v403_v26, %v411_v27  ;;  %v547_v25 = vld [vmem:[#allocation2 + $0x528] sm:$0xff]  ;;  %v6239_v27 = vcombine.high %v563_v14, %v571_v16 }
  0xb6   : > { %2286 = vmatprep.subr.bf16.mxu0 %v6173_v38  ;;  %2357 = vmatprep.subr.bf16.mxu1 %v6175_v43  ;;  %v6061_v38 = vcombine.high %v386_v32, %v394_v33  ;;  %v627_v43 = vld [vmem:[#allocation2 + $0x7a8] sm:$0xff] }
  0xb7   : > { %v6303_v51 = vcombine.high %v627_v43, %v635_v44  ;;  %v555_v26 = vld [vmem:[#allocation2 + $0x568] sm:$0xff] }
  0xb8   : > { %2177 = vmatmul.mubr.bf16.vlgmr.msra.gmra.mxu0 %v7630_v15  ;;  %2248 = vmatmul.mubr.bf16.vlgmr.msra.gmra.mxu1 %v7630_v15 }
  0xb9   : > { %2287 = vmatpush1.bf16.msra.mxu0 %v6172_v45  ;;  %2358 = vmatpush1.bf16.msra.mxu1 %v6174_v46  ;;  %v6060_v45 = vcombine.low %v386_v32, %v394_v33  ;;  %v610_v46 = vld [vmem:[#allocation2 + $0x720] sm:$0xff] }
  0xba   : > { %2288 = vmatprep.subr.bf16.mxu0 %v6157_v47  ;;  %2359 = vmatprep.subr.bf16.mxu1 %v6159_v49  ;;  %v618_v47 = vld [vmem:[#allocation2 + $0x760] sm:$0xff]  ;;  %v6062_v49 = vcombine.low %v387_v34, %v395_v35  ;;  %v531_v34 = vld [vmem:[#allocation2 + $0x4a8] sm:$0xff] }
  0xbb   : > { %2186 = vmatprep.mubr.bf16.mxu0 %v7634_v23  ;;  %2257 = vmatprep.mubr.bf16.mxu1 %v7634_v23  ;;  %v6285_v59 = vcombine.high %v610_v46, %v618_v47  ;;  %v530_v32 = vld [vmem:[#allocation2 + $0x4a0] sm:$0xff]  ;;  %v539_v35 = vld [vmem:[#allocation2 + $0x4e8] sm:$0xff] }
  0xbc   : > { %v538_v33 = vld [vmem:[#allocation2 + $0x4e0] sm:$0xff] }
  0xbd   : > { %2289 = vmatpush1.bf16.msra.mxu0 %v6156_v54  ;;  %2360 = vmatpush1.bf16.msra.mxu1 %v6158_v55  ;;  %v6300_v54 = vcombine.low %v626_v41, %v634_v42  ;;  %v594_v55 = vld [vmem:[#allocation2 + $0x6a0] sm:$0xff]  ;;  %v6205_v41 = vcombine.high %v530_v32, %v538_v33  ;;  %v515_v42 = vld [vmem:[#allocation2 + $0x428] sm:$0xff] }
  0xbe   : > { %2290 = vmatprep.subr.bf16.mxu0 %v6141_v56  ;;  %2361 = vmatprep.subr.bf16.mxu1 %v6143_v57  ;;  %v602_v56 = vld [vmem:[#allocation2 + $0x6e0] sm:$0xff]  ;;  %v6302_v57 = vcombine.low %v627_v43, %v635_v44  ;;  %v523_v43 = vld [vmem:[#allocation2 + $0x468] sm:$0xff]  ;;  %v6207_v44 = vcombine.high %v531_v34, %v539_v35 }
  0xbf   : > { %v6269_v4 = vcombine.high %v594_v55, %v602_v56 }
  0xc0   : > { %2187 = vmatmul.mubr.bf16.gmra.mxu0 %v7643_v39  ;;  %2258 = vmatmul.mubr.bf16.gmra.mxu1 %v7643_v39 }
  0xc1   : > { %2291 = vmatpush1.bf16.msra.mxu0 %v6140_v0  ;;  %2362 = vmatpush1.bf16.msra.mxu1 %v6142_v1  ;;  %v6284_v0 = vcombine.low %v610_v46, %v618_v47  ;;  %v578_v1 = vld [vmem:[#allocation2 + $0x620] sm:$0xff]  ;;  %v500_v46 = vld [vmem:[#allocation2 + $0x3b0] sm:$0xff] }
  0xc2   : > { %2292 = vmatprep.subr.bf16.mxu0 %v6125_v2  ;;  %2363 = vmatprep.subr.bf16.mxu1 %v6127_v3  ;;  %v586_v2 = vld [vmem:[#allocation2 + $0x660] sm:$0xff]  ;;  %v6286_v3 = vcombine.low %v611_v52, %v619_v53  ;;  %v508_v47 = vld [vmem:[#allocation2 + $0x3f0] sm:$0xff]  ;;  %v501_v52 = vld [vmem:[#allocation2 + $0x3b8] sm:$0xff] }
  0xc3   : > { %2196 = vmatprep.mubr.bf16.mxu0 %v7646_v48  ;;  %2267 = vmatprep.mubr.bf16.mxu1 %v7646_v48  ;;  %v6253_v13 = vcombine.high %v578_v1, %v586_v2  ;;  %v509_v53 = vld [vmem:[#allocation2 + $0x3f8] sm:$0xff] }
  0xc5   : > { %2293 = vmatpush1.bf16.msra.mxu0 %v6124_v9  ;;  %2364 = vmatpush1.bf16.msra.mxu1 %v6126_v10  ;;  %v6268_v9 = vcombine.low %v594_v55, %v602_v56  ;;  %v562_v10 = vld [vmem:[#allocation2 + $0x5a0] sm:$0xff]  ;;  %v484_v55 = vld [vmem:[#allocation2 + $0x330] sm:$0xff] }
  0xc6   : > { %2294 = vmatprep.subr.bf16.mxu0 %v6109_v11  ;;  %2365 = vmatprep.subr.bf16.mxu1 %v6111_v12  ;;  %v570_v11 = vld [vmem:[#allocation2 + $0x5e0] sm:$0xff]  ;;  %v6270_v12 = vcombine.low %v595_v60, %v603_v61  ;;  %v492_v56 = vld [vmem:[#allocation2 + $0x370] sm:$0xff]  ;;  %v485_v60 = vld [vmem:[#allocation2 + $0x338] sm:$0xff] }
  0xc7   : > { %v6237_v24 = vcombine.high %v562_v10, %v570_v11  ;;  %v493_v61 = vld [vmem:[#allocation2 + $0x378] sm:$0xff] }
  0xc8   : > { %2197 = vmatmul.mubr.bf16.gmra.mxu0 %v7655_v62  ;;  %2268 = vmatmul.mubr.bf16.gmra.mxu1 %v7655_v62 }
  0xc9   : > { %2295 = vmatpush1.bf16.msra.mxu0 %v6108_v19  ;;  %2366 = vmatpush1.bf16.msra.mxu1 %v6110_v20  ;;  %v6252_v19 = vcombine.low %v578_v1, %v586_v2  ;;  %v546_v20 = vld [vmem:[#allocation2 + $0x520] sm:$0xff]  ;;  %v468_v1 = vld [vmem:[#allocation2 + $0x2b0] sm:$0xff] }
  0xca   : > { %2296 = vmatprep.subr.bf16.mxu0 %v6093_v21  ;;  %2367 = vmatprep.subr.bf16.mxu1 %v6095_v22  ;;  %v554_v21 = vld [vmem:[#allocation2 + $0x560] sm:$0xff]  ;;  %v6254_v22 = vcombine.low %v579_v5, %v587_v7  ;;  %v476_v2 = vld [vmem:[#allocation2 + $0x2f0] sm:$0xff]  ;;  %v469_v5 = vld [vmem:[#allocation2 + $0x2b8] sm:$0xff] }
  0xcb   : > { %2206 = vmatprep.mubr.bf16.mxu0 %v7657_v6  ;;  %2277 = vmatprep.mubr.bf16.mxu1 %v7657_v6  ;;  %v477_v7 = vld [vmem:[#allocation2 + $0x2f8] sm:$0xff] }
  0xcd   : > { %2297 = vmatpush1.bf16.msra.mxu0 %v6092_v28  ;;  %2368 = vmatpush1.bf16.msra.mxu1 %v6094_v29  ;;  %v6236_v28 = vcombine.low %v562_v10, %v570_v11  ;;  %v6238_v29 = vcombine.low %v563_v14, %v571_v16  ;;  %v6162_v10 = vcombine.low %v485_v60, %v493_v61  ;;  %v453_v16 = vld [vmem:[#allocation2 + $0x238] sm:$0xff] }
  0xce   : > { %2298 = vmatprep.subr.bf16.mxu0 %v6077_v30  ;;  %2369 = vmatprep.subr.bf16.mxu1 %v6079_v31  ;;  %v6221_v30 = vcombine.high %v546_v20, %v554_v21  ;;  %v6223_v31 = vcombine.high %v547_v25, %v555_v26  ;;  %v6145_v11 = vcombine.high %v468_v1, %v476_v2 }
  0xcf   : > { %v6147_v14 = vcombine.high %v469_v5, %v477_v7 }
  0xd0   : > { %2207 = vmatmul.mubr.bf16.gmra.mxu0 %v7664_v18  ;;  %2278 = vmatmul.mubr.bf16.gmra.mxu1 %v7664_v18 }
  0xd1   : > { %2299 = vmatpush1.bf16.msra.mxu0 %v6076_v36  ;;  %2370 = vmatpush1.bf16.msra.mxu1 %v6078_v37  ;;  %v6220_v36 = vcombine.low %v546_v20, %v554_v21  ;;  %v514_v37 = vld [vmem:[#allocation2 + $0x420] sm:$0xff]  ;;  %v6146_v20 = vcombine.low %v469_v5, %v477_v7  ;;  %v613_v5 = vld [vmem:[#allocation2 + $0x738] sm:$0xff] }
  0xd2   : > { %2300 = vmatprep.subr.bf16.mxu0 %v6061_v38  ;;  %2371 = vmatprep.subr.bf16.mxu1 %v6063_v40  ;;  %v522_v38 = vld [vmem:[#allocation2 + $0x460] sm:$0xff]  ;;  %v6222_v40 = vcombine.low %v547_v25, %v555_v26  ;;  %v437_v26 = vld [vmem:[#allocation2 + $0x1b8] sm:$0xff] }
  0xd3   : > { %2318 = vmatprep.mubr.bf16.mxu0 %v7624_v58  ;;  %2389 = vmatprep.mubr.bf16.mxu1 %v7624_v58  ;;  %v621_v7 = vld [vmem:[#allocation2 + $0x778] sm:$0xff] }
  0xd5   : > { %2301 = vmatpush1.bf16.msra.mxu0 %v6060_v45  ;;  %2372 = vmatpush1.bf16.msra.mxu1 %v6062_v49  ;;  %v6204_v45 = vcombine.low %v530_v32, %v538_v33  ;;  %v6206_v49 = vcombine.low %v531_v34, %v539_v35  ;;  %v428_v32 = vld [vmem:[#allocation2 + $0x170] sm:$0xff]  ;;  %v421_v34 = vld [vmem:[#allocation2 + $0x138] sm:$0xff] }
  0xd6   : > { %2302 = vmatprep.subr.bf16.mxu0 %v6301_v50  ;;  %2373 = vmatprep.subr.bf16.mxu1 %v6303_v51  ;;  %v6189_v50 = vcombine.high %v514_v37, %v522_v38  ;;  %v6191_v51 = vcombine.high %v515_v42, %v523_v43  ;;  %v429_v35 = vld [vmem:[#allocation2 + $0x178] sm:$0xff] }
  0xd9   : > { %2303 = vmatpush2.bf16.msra.mxu0 %v6300_v54  ;;  %2374 = vmatpush2.bf16.msra.mxu1 %v6302_v57  ;;  %v6188_v54 = vcombine.low %v514_v37, %v522_v38  ;;  %v6190_v57 = vcombine.low %v515_v42, %v523_v43  ;;  %v404_v37 = vld [vmem:[#allocation2 + $0xb0] sm:$0xff]  ;;  %v405_v42 = vld [vmem:[#allocation2 + $0xb8] sm:$0xff] }
  0xda   : > { %2304 = vmatprep.subr.bf16.mxu0 %v6285_v59  ;;  %2375 = vmatprep.subr.bf16.mxu1 %v6287_v63  ;;  %v6177_v59 = vcombine.high %v500_v46, %v508_v47  ;;  %v6179_v63 = vcombine.high %v501_v52, %v509_v53  ;;  %v412_v38 = vld [vmem:[#allocation2 + $0xf0] sm:$0xff]  ;;  %v413_v43 = vld [vmem:[#allocation2 + $0xf8] sm:$0xff] }
  0xdd   : > { %2305 = vmatpush2.bf16.msra.mxu0 %v6284_v0  ;;  %2376 = vmatpush2.bf16.msra.mxu1 %v6286_v3  ;;  %v6176_v0 = vcombine.low %v500_v46, %v508_v47  ;;  %v6178_v3 = vcombine.low %v501_v52, %v509_v53  ;;  %v388_v46 = vld [vmem:[#allocation2 + $0x30] sm:$0xff]  ;;  %v397_v52 = vld [vmem:[#allocation2 + $0x78] sm:$0xff]  ;;  %v6083_v53 = vcombine.high %v405_v42, %v413_v43 }
  0xde   : > { %2306 = vmatprep.subr.bf16.mxu0 %v6269_v4  ;;  %2377 = vmatprep.subr.bf16.mxu1 %v6271_v8  ;;  %v6161_v4 = vcombine.high %v484_v55, %v492_v56  ;;  %v6163_v8 = vcombine.high %v485_v60, %v493_v61  ;;  %v396_v47 = vld [vmem:[#allocation2 + $0x70] sm:$0xff]  ;;  %v629_v60 = vld [vmem:[#allocation2 + $0x7b8] sm:$0xff] }
  0xdf   : > { %v637_v61 = vld [vmem:[#allocation2 + $0x7f8] sm:$0xff] }
  0xe1   : > { %2307 = vmatpush2.bf16.msra.mxu0 %v6268_v9  ;;  %2378 = vmatpush2.bf16.msra.mxu1 %v6270_v12  ;;  %v6160_v9 = vcombine.low %v484_v55, %v492_v56  ;;  %v452_v12 = vld [vmem:[#allocation2 + $0x230] sm:$0xff] }
  0xe2   : > { %2308 = vmatprep.subr.bf16.mxu0 %v6253_v13  ;;  %2379 = vmatprep.subr.bf16.mxu1 %v6255_v17  ;;  %v460_v13 = vld [vmem:[#allocation2 + $0x270] sm:$0xff]  ;;  %v461_v17 = vld [vmem:[#allocation2 + $0x278] sm:$0xff] }
  0xe3   : > { %v6129_v21 = vcombine.high %v452_v12, %v460_v13  ;;  %v6131_v25 = vcombine.high %v453_v16, %v461_v17  ;;  %v628_v55 = vld [vmem:[#allocation2 + $0x7b0] sm:$0xff] }
  0xe4   : > { %v636_v56 = vld [vmem:[#allocation2 + $0x7f0] sm:$0xff] }
  0xe5   : > { %2309 = vmatpush2.bf16.msra.mxu0 %v6252_v19  ;;  %2380 = vmatpush2.bf16.msra.mxu1 %v6254_v22  ;;  %v6144_v19 = vcombine.low %v468_v1, %v476_v2  ;;  %v436_v22 = vld [vmem:[#allocation2 + $0x1b0] sm:$0xff] }
  0xe6   : > { %2310 = vmatprep.subr.bf16.mxu0 %v6237_v24  ;;  %2381 = vmatprep.subr.bf16.mxu1 %v6239_v27  ;;  %v444_v24 = vld [vmem:[#allocation2 + $0x1f0] sm:$0xff]  ;;  %v445_v27 = vld [vmem:[#allocation2 + $0x1f8] sm:$0xff] }
  0xe7   : > { %v6115_v33 = vcombine.high %v437_v26, %v445_v27  ;;  %v612_v1 = vld [vmem:[#allocation2 + $0x730] sm:$0xff] }
  0xe8   : > { %v620_v2 = vld [vmem:[#allocation2 + $0x770] sm:$0xff] }
  0xe9   : > { %2311 = vmatpush2.bf16.msra.mxu0 %v6236_v28  ;;  %2382 = vmatpush2.bf16.msra.mxu1 %v6238_v29  ;;  %v6128_v28 = vcombine.low %v452_v12, %v460_v13  ;;  %v6130_v29 = vcombine.low %v453_v16, %v461_v17  ;;  %v6306_v12 = vcombine.low %v629_v60, %v637_v61  ;;  %v605_v16 = vld [vmem:[#allocation2 + $0x6f8] sm:$0xff] }
  0xea   : > { %2312 = vmatprep.subr.bf16.mxu0 %v6221_v30  ;;  %2383 = vmatprep.subr.bf16.mxu1 %v6223_v31  ;;  %v6113_v30 = vcombine.high %v436_v22, %v444_v24  ;;  %v420_v31 = vld [vmem:[#allocation2 + $0x130] sm:$0xff]  ;;  %v6289_v13 = vcombine.high %v612_v1, %v620_v2  ;;  %v6291_v17 = vcombine.high %v613_v5, %v621_v7 }
  0xed   : > { %2313 = vmatpush2.bf16.msra.mxu0 %v6220_v36  ;;  %2384 = vmatpush2.bf16.msra.mxu1 %v6222_v40  ;;  %v6112_v36 = vcombine.low %v436_v22, %v444_v24  ;;  %v6114_v40 = vcombine.low %v437_v26, %v445_v27  ;;  %v6290_v22 = vcombine.low %v613_v5, %v621_v7  ;;  %v581_v24 = vld [vmem:[#allocation2 + $0x638] sm:$0xff] }
  0xee   : > { %2314 = vmatprep.subr.bf16.mxu0 %v6205_v41  ;;  %2385 = vmatprep.subr.bf16.mxu1 %v6207_v44  ;;  %v6097_v41 = vcombine.high %v420_v31, %v428_v32  ;;  %v6099_v44 = vcombine.high %v421_v34, %v429_v35 }
  0xf1   : > { %2315 = vmatpush2.bf16.msra.mxu0 %v6204_v45  ;;  %2386 = vmatpush2.bf16.msra.mxu1 %v6206_v49  ;;  %v6096_v45 = vcombine.low %v420_v31, %v428_v32  ;;  %v6098_v49 = vcombine.low %v421_v34, %v429_v35  ;;  %v565_v32 = vld [vmem:[#allocation2 + $0x5b8] sm:$0xff] }
  0xf2   : > { %2316 = vmatprep.subr.bf16.mxu0 %v6189_v50  ;;  %2387 = vmatprep.subr.bf16.mxu1 %v6191_v51  ;;  %v6081_v50 = vcombine.high %v404_v37, %v412_v38  ;;  %v389_v51 = vld [vmem:[#allocation2 + $0x38] sm:$0xff] }
  0xf5   : > { %2317 = vmatpush2.bf16.msra.mxu0 %v6188_v54  ;;  %2388 = vmatpush2.bf16.msra.mxu1 %v6190_v57  ;;  %v6080_v54 = vcombine.low %v404_v37, %v412_v38  ;;  %v6082_v57 = vcombine.low %v405_v42, %v413_v43  ;;  %v556_v37 = vld [vmem:[#allocation2 + $0x570] sm:$0xff]  ;;  %v557_v42 = vld [vmem:[#allocation2 + $0x578] sm:$0xff] }
  0xf6   : > { %2428 = vmatprep.subr.bf16.mxu0 %v6177_v59  ;;  %2499 = vmatprep.subr.bf16.mxu1 %v6179_v63  ;;  %v6065_v59 = vcombine.high %v388_v46, %v396_v47  ;;  %v6067_v63 = vcombine.high %v389_v51, %v397_v52 }
  0xf8   : > { %2319 = vmatmul.mubr.bf16.vlgmr.msra.gmra.mxu0 %v7630_v15  ;;  %2390 = vmatmul.mubr.bf16.vlgmr.msra.gmra.mxu1 %v7630_v15 }
  0xf9   : > { %2429 = vmatpush1.bf16.msra.mxu0 %v6176_v0  ;;  %2500 = vmatpush1.bf16.msra.mxu1 %v6178_v3  ;;  %v6064_v0 = vcombine.low %v388_v46, %v396_v47  ;;  %v6066_v3 = vcombine.low %v389_v51, %v397_v52  ;;  %v540_v51 = vld [vmem:[#allocation2 + $0x4f0] sm:$0xff]  ;;  %v533_v52 = vld [vmem:[#allocation2 + $0x4b8] sm:$0xff] }
  0xfa   : > { %2430 = vmatprep.subr.bf16.mxu0 %v6161_v4  ;;  %2501 = vmatprep.subr.bf16.mxu1 %v6163_v8  ;;  %v6305_v4 = vcombine.high %v628_v55, %v636_v56  ;;  %v6307_v8 = vcombine.high %v629_v60, %v637_v61  ;;  %v516_v60 = vld [vmem:[#allocation2 + $0x430] sm:$0xff] }
  0xfb   : > { %2328 = vmatprep.mubr.bf16.mxu0 %v7634_v23  ;;  %2399 = vmatprep.mubr.bf16.mxu1 %v7634_v23  ;;  %v524_v61 = vld [vmem:[#allocation2 + $0x470] sm:$0xff] }
  0xfd   : > { %2431 = vmatpush1.bf16.msra.mxu0 %v6160_v9  ;;  %2502 = vmatpush1.bf16.msra.mxu1 %v6162_v10  ;;  %v6304_v9 = vcombine.low %v628_v55, %v636_v56  ;;  %v596_v10 = vld [vmem:[#allocation2 + $0x6b0] sm:$0xff] }
  0xfe   : > { %2432 = vmatprep.subr.bf16.mxu0 %v6145_v11  ;;  %2503 = vmatprep.subr.bf16.mxu1 %v6147_v14  ;;  %v604_v11 = vld [vmem:[#allocation2 + $0x6f0] sm:$0xff]  ;;  %v597_v14 = vld [vmem:[#allocation2 + $0x6b8] sm:$0xff] }
  0xff   : > { %v6275_v26 = vcombine.high %v597_v14, %v605_v16  ;;  %v6272_v27 = vcombine.low %v596_v10, %v604_v11 }
 0x100   : > { %2329 = vmatmul.mubr.bf16.gmra.mxu0 %v7643_v39  ;;  %2400 = vmatmul.mubr.bf16.gmra.mxu1 %v7643_v39 }
 0x101   : > { %2433 = vmatpush1.bf16.msra.mxu0 %v6144_v19  ;;  %2504 = vmatpush1.bf16.msra.mxu1 %v6146_v20  ;;  %v6288_v19 = vcombine.low %v612_v1, %v620_v2  ;;  %v580_v20 = vld [vmem:[#allocation2 + $0x630] sm:$0xff] }
 0x102   : > { %2434 = vmatprep.subr.bf16.mxu0 %v6129_v21  ;;  %2505 = vmatprep.subr.bf16.mxu1 %v6131_v25  ;;  %v588_v21 = vld [vmem:[#allocation2 + $0x670] sm:$0xff]  ;;  %v589_v25 = vld [vmem:[#allocation2 + $0x678] sm:$0xff] }
 0x103   : > { %2338 = vmatprep.mubr.bf16.mxu0 %v7646_v48  ;;  %2409 = vmatprep.mubr.bf16.mxu1 %v7646_v48  ;;  %v6257_v31 = vcombine.high %v580_v20, %v588_v21  ;;  %v6259_v34 = vcombine.high %v581_v24, %v589_v25  ;;  %v6256_v35 = vcombine.low %v580_v20, %v588_v21  ;;  %v7143_v20 = vld [vmem:[#allocation4 + $0xf0] sm:$0xff]  }
 0x104   : > { %v6258_v38 = vcombine.low %v581_v24, %v589_v25 }
 0x105   : > { %2435 = vmatpush1.bf16.msra.mxu0 %v6128_v28  ;;  %2506 = vmatpush1.bf16.msra.mxu1 %v6130_v29  ;;  %v564_v28 = vld [vmem:[#allocation2 + $0x5b0] sm:$0xff] }
 0x106   : > { %2436 = vmatprep.subr.bf16.mxu0 %v6113_v30  ;;  %2507 = vmatprep.subr.bf16.mxu1 %v6115_v33  ;;  %v572_v29 = vld [vmem:[#allocation2 + $0x5f0] sm:$0xff]  ;;  %v6274_v30 = vcombine.low %v597_v14, %v605_v16  ;;  %v573_v33 = vld [vmem:[#allocation2 + $0x5f8] sm:$0xff]  ;;  %v7711_v14 = vld [vmem:[%s8355_s2] sm:$0xff] }
 0x107   : > { %v6243_v43 = vcombine.high %v565_v32, %v573_v33  ;;  %v6242_v46 = vcombine.low %v565_v32, %v573_v33  ;;  %v7140_v16 = vld [vmem:[#allocation4 + $0x38] sm:$0xff]   ;;  %v7147_v33 = vld [vmem:[#allocation4 + $0xe8] sm:$0xff]  }
 0x108   : > { %2339 = vmatmul.mubr.bf16.gmra.mxu0 %v7655_v62  ;;  %2410 = vmatmul.mubr.bf16.gmra.mxu1 %v7655_v62 }
 0x109   : > { %2437 = vmatpush1.bf16.msra.mxu0 %v6112_v36  ;;  %2508 = vmatpush1.bf16.msra.mxu1 %v6114_v40  ;;  %v548_v36 = vld [vmem:[#allocation2 + $0x530] sm:$0xff]  ;;  %v6241_v40 = vcombine.high %v564_v28, %v572_v29 }
 0x10a   : > { %2438 = vmatprep.subr.bf16.mxu0 %v6097_v41  ;;  %2509 = vmatprep.subr.bf16.mxu1 %v6099_v44  ;;  %v549_v41 = vld [vmem:[#allocation2 + $0x538] sm:$0xff]  ;;  %v642_v44 = vlaneseq  ;;  %v6225_v47 = vcombine.high %v548_v36, %v556_v37  ;;  %v6224_v55 = vcombine.low %v548_v36, %v556_v37 }
 0x10b   : > { %2348 = vmatprep.mubr.bf16.mxu0 %v7657_v6  ;;  %2419 = vmatprep.mubr.bf16.mxu1 %v7657_v6  ;;  %v6226_v56 = vcombine.low %v549_v41, %v557_v42 }
 0x10d   : > { %2439 = vmatpush1.bf16.msra.mxu0 %v6096_v45  ;;  %2510 = vmatpush1.bf16.msra.mxu1 %v6098_v49  ;;  %v6240_v45 = vcombine.low %v564_v28, %v572_v29  ;;  %v6227_v49 = vcombine.high %v549_v41, %v557_v42 }
 0x10e   : > { %2440 = vmatprep.subr.bf16.mxu0 %v6081_v50  ;;  %2511 = vmatprep.subr.bf16.mxu1 %v6083_v53  ;;  %v532_v50 = vld [vmem:[#allocation2 + $0x4b0] sm:$0xff]  ;;  %v541_v53 = vld [vmem:[#allocation2 + $0x4f8] sm:$0xff] }
 0x10f   : > { %v6210_v7 = vcombine.low %v533_v52, %v541_v53 }
 0x110   : > { %2349 = vmatmul.mubr.bf16.gmra.mxu0 %v7664_v18  ;;  %2420 = vmatmul.mubr.bf16.gmra.mxu1 %v7664_v18 }
 0x111   : > { %2441 = vmatpush1.bf16.msra.mxu0 %v6080_v54  ;;  %2512 = vmatpush1.bf16.msra.mxu1 %v6082_v57  ;;  %v7702_v54 = vshrl.u32 %v642_v44, 7  ;;  %v6209_v57 = vcombine.high %v532_v50, %v540_v51  ;;  %v7150_v44 = vld [vmem:[#allocation4 + $0x60] sm:$0xff]  }
 0x112   : > { %2442 = vmatprep.subr.bf16.mxu0 %v6065_v59  ;;  %2513 = vmatprep.subr.bf16.mxu1 %v6067_v63  ;;  %v6211_v59 = vcombine.high %v533_v52, %v541_v53  ;;  %v517_v63 = vld [vmem:[#allocation2 + $0x438] sm:$0xff] }
 0x113   : > { %2460 = vmatprep.mubr.bf16.mxu0 %v7624_v58  ;;  %2531 = vmatprep.mubr.bf16.mxu1 %v7624_v58  ;;  %v6273_v58 = vcombine.high %v596_v10, %v604_v11  ;;  %v8364_v1 = vsub.s32 0, %v7702_v54  ;;  %v8363_v2 = vsub.s32 1, %v7702_v54  ;;  %v8362_v5 = vsub.s32 3, %v7702_v54  ;;  %v7138_v10 = vld [vmem:[#allocation4 + $0x78] sm:$0xff]  }
 0x114   : > { %v6192_v11 = vcombine.low %v516_v60, %v524_v61 }
 0x115   : > { %2443 = vmatpush1.bf16.msra.mxu0 %v6064_v0  ;;  %2514 = vmatpush1.bf16.msra.mxu1 %v6066_v3  ;;  %v525_v0 = vld [vmem:[#allocation2 + $0x478] sm:$0xff]  ;;  %v6208_v3 = vcombine.low %v532_v50, %v540_v51  ;;  %v7736_v29 = vrot.slane %v7711_v14, %v8362_v5  ;;  %v7151_v50 = vld [vmem:[#allocation4 + $0xe0] sm:$0xff]  }
 0x116   : > { %2444 = vmatprep.subr.bf16.mxu0 %v6305_v4  ;;  %2515 = vmatprep.subr.bf16.mxu1 %v6307_v8  ;;  %v8365_v4 = vsub.s32 2, %v7702_v54  ;;  %v6193_v8 = vcombine.high %v516_v60, %v524_v61 }
 0x118   : > { %v7716_v21 = vrot.slane %v7711_v14, %v8365_v4 }
 0x119   : > { %2445 = vmatpush2.bf16.msra.mxu0 %v6304_v9  ;;  %2516 = vmatpush2.bf16.msra.mxu1 %v6306_v12  ;;  %v6195_v9 = vcombine.high %v517_v63, %v525_v0  ;;  %v7139_v12 = vld [vmem:[#allocation4 + $0xf8] sm:$0xff]  }
 0x11a   : > { %2446 = vmatprep.subr.bf16.mxu0 %v6289_v13  ;;  %2517 = vmatprep.subr.bf16.mxu1 %v6291_v17  ;;  %v6194_v13 = vcombine.low %v517_v63, %v525_v0  ;;  %v7141_v17 = vld [vmem:[#allocation4 + $0xb8] sm:$0xff]  }
 0x11d   : > { %2447 = vmatpush2.bf16.msra.mxu0 %v6288_v19  ;;  %2518 = vmatpush2.bf16.msra.mxu1 %v6290_v22  ;;  %v7142_v19 = vld [vmem:[#allocation4 + $0x70] sm:$0xff]   ;;  %v7721_v22 = vrot.slane %v7711_v14, %v8364_v1 }
 0x11e   : > { %2448 = vmatprep.subr.bf16.mxu0 %v6273_v58  ;;  %2519 = vmatprep.subr.bf16.mxu1 %v6275_v26  ;;  %v7144_v58 = vld [vmem:[#allocation4 + $0x30] sm:$0xff]   ;;  %v7728_v26 = vrot.slane %v7711_v14, %v8363_v2 }
 0x121   : > { %2449 = vmatpush2.bf16.msra.mxu0 %v6272_v27  ;;  %2520 = vmatpush2.bf16.msra.mxu1 %v6274_v30  ;;  %v7145_v30 = vld [vmem:[#allocation4 + $0xb0] sm:$0xff]  }
 0x122   : > { %2450 = vmatprep.subr.bf16.mxu0 %v6257_v31  ;;  %2521 = vmatprep.subr.bf16.mxu1 %v6259_v34  ;;  %v7146_v31 = vld [vmem:[#allocation4 + $0x68] sm:$0xff]  }
 0x125   : > { %2451 = vmatpush2.bf16.msra.mxu0 %v6256_v35  ;;  %2522 = vmatpush2.bf16.msra.mxu1 %v6258_v38  ;;  %v7148_v38 = vld [vmem:[#allocation4 + $0x28] sm:$0xff]  }
 0x126   : > { %2452 = vmatprep.subr.bf16.mxu0 %v6241_v40  ;;  %2523 = vmatprep.subr.bf16.mxu1 %v6243_v43 }
 0x129   : > { %2453 = vmatpush2.bf16.msra.mxu0 %v6240_v45  ;;  %2524 = vmatpush2.bf16.msra.mxu1 %v6242_v46 }
 0x12a   : > { %2454 = vmatprep.subr.bf16.mxu0 %v6225_v47  ;;  %2525 = vmatprep.subr.bf16.mxu1 %v6227_v49 }
 0x12d   : > { %2455 = vmatpush2.bf16.msra.mxu0 %v6224_v55  ;;  %2526 = vmatpush2.bf16.msra.mxu1 %v6226_v56  ;;  %v7152_v55 = vld [vmem:[#allocation4 + $0x20] sm:$0xff]  }
 0x12e   : > { %2456 = vmatprep.subr.bf16.mxu0 %v6209_v57  ;;  %2527 = vmatprep.subr.bf16.mxu1 %v6211_v59 }
 0x131   : > { %2457 = vmatpush2.bf16.msra.mxu0 %v6208_v3  ;;  %2528 = vmatpush2.bf16.msra.mxu1 %v6210_v7 }
 0x132   : > { %2458 = vmatprep.subr.bf16.mxu0 %v6193_v8  ;;  %2529 = vmatprep.subr.bf16.mxu1 %v6195_v9  ;;  %v7153_v9 = vld [vmem:[#allocation4 + $0xa0] sm:$0xff]  }
 0x135   : > { %2459 = vmatpush2.bf16.msra.mxu0 %v6192_v11  ;;  %2530 = vmatpush2.bf16.msra.mxu1 %v6194_v13 }
 0x136   : > { %6598 = vmatprep.subr.bf16.mxu0 %v7138_v10  ;;  %6638 = vmatprep.subr.bf16.mxu1 %v7139_v12  ;;  %v7154_v10 = vld [vmem:[#allocation4 + $0x58] sm:$0xff]  }
 0x138   : > { %v2036_v24 = vpop.f32.mrf.mxu0  ;;  %2461 = vmatmul.mubr.bf16.vlgmr.msra.gmra.mxu0 %v7630_v15  ;;  %v2107_v25 = vpop.f32.mrf.mxu1  ;;  %2532 = vmatmul.mubr.bf16.vlgmr.msra.gmra.mxu1 %v7630_v15 }
 0x139   : > { %6599 = vmatpush3.bf16.msra.mxu0 %v7140_v16  ;;  %v7731_v27 = vadd.f32 %v2107_v25, %v7716_v21  ;;  %6639 = vmatpush3.bf16.msra.mxu1 %v7141_v17  ;;  %v7739_v15 = vadd.f32 %v2036_v24, %v7721_v22  ;;  %v7155_v16 = vld [vmem:[#allocation4 + $0xd8] sm:$0xff]  }
 0x13a   : > { %v2038_v28 = vpop.f32.mrf.mxu0  ;;  %6600 = vmatprep.subr.bf16.mxu0 %v7142_v19  ;;  %v2109_v32 = vpop.f32.mrf.mxu1  ;;  %6640 = vmatprep.subr.bf16.mxu1 %v7143_v20  ;;  %v7156_v17 = vld [vmem:[#allocation4 + $0x18] sm:$0xff]  }
 0x13b   : > { %2470 = vmatprep.mubr.bf16.mxu0 %v7634_v23  ;;  %2541 = vmatprep.mubr.bf16.mxu1 %v7634_v23  ;;  %v7744_v35 = vadd.f32 %v2038_v28, %v7728_v26  ;;  %v2572_v40 = vmax.f32 %v7731_v27, 0.0  ;;  %v7751_v41 = vadd.f32 %v2109_v32, %v7736_v29  ;;  %v7149_v23 = vld [vmem:[#allocation4 + $0xa8] sm:$0xff]   ;;  %v2570_v45 = vmax.f32 %v7739_v15, 0.0  ;;  %v7157_v25 = vld [vmem:[#allocation4 + $0x98] sm:$0xff]   ;;  %v7176_v27 = vld [vmem:[#allocation4 + $0x130] sm:$0xff]  }
 0x13c   : > { %v2040_v34 = vpop.f32.mrf.mxu0  ;;  %v2111_v37 = vpop.f32.mrf.mxu1 }
 0x13d   : > { %v7747_v36 = vadd.f32 %v2040_v34, %v7721_v22  ;;  %6601 = vmatpush3.bf16.msra.mxu0 %v7144_v58  ;;  %v7754_v42 = vadd.f32 %v2111_v37, %v7716_v21  ;;  %6641 = vmatpush3.bf16.msra.mxu1 %v7145_v30  ;;  %v2571_v56 = vmax.f32 %v7744_v35, 0.0  ;;  %v2573_v63 = vmax.f32 %v7751_v41, 0.0 }
 0x13e   : > { %v2042_v43 = vpop.f32.mrf.mxu0  ;;  %6602 = vmatprep.subr.bf16.mxu0 %v7146_v31  ;;  %v2113_v49 = vpop.f32.mrf.mxu1  ;;  %6642 = vmatprep.subr.bf16.mxu1 %v7147_v33  ;;  %v7158_v33 = vld [vmem:[#allocation4 + $0x50] sm:$0xff]  }
 0x13f   : > { %v2586_v46 = vmax.f32 %v7747_v36, 0.0  ;;  %v7759_v47 = vadd.f32 %v2042_v43, %v7728_v26  ;;  %v2588_v51 = vmax.f32 %v7754_v42, 0.0  ;;  %v7763_v52 = vadd.f32 %v2113_v49, %v7736_v29  ;;  %v7159_v43 = vld [vmem:[#allocation4 + $0xd0] sm:$0xff]   ;;  %v7178_v42 = vld [vmem:[#allocation4 + $0x168] sm:$0xff]  }
 0x140   : > { %v2046_v53 = vpop.f32.mrf.mxu0  ;;  %2471 = vmatmul.mubr.bf16.gmra.mxu0 %v7643_v39  ;;  %v2117_v61 = vpop.f32.mrf.mxu1  ;;  %2542 = vmatmul.mubr.bf16.gmra.mxu1 %v7643_v39 }
 0x141   : > { %v4337_v57 = vadd.f32 %v2586_v46, %v2570_v45  ;;  %v2587_v59 = vmax.f32 %v7759_v47, 0.0  ;;  %v7773_v60 = vadd.f32 %v2046_v53, %v7721_v22  ;;  %6603 = vmatpush3.bf16.msra.mxu0 %v7148_v38  ;;  %v4364_v0 = vadd.f32 %v2588_v51, %v2572_v40  ;;  %6643 = vmatpush3.bf16.msra.mxu1 %v7149_v23  ;;  %v7160_v53 = vld [vmem:[#allocation4 + $0x10] sm:$0xff]  }
 0x142   : > { %v2589_v3 = vmax.f32 %v7763_v52, 0.0  ;;  %v7783_v7 = vadd.f32 %v2117_v61, %v7716_v21  ;;  %v2048_v8 = vpop.f32.mrf.mxu0  ;;  %6604 = vmatprep.subr.bf16.mxu0 %v7150_v44  ;;  %v2119_v13 = vpop.f32.mrf.mxu1  ;;  %6644 = vmatprep.subr.bf16.mxu1 %v7151_v50 }
 0x143   : > { %v4351_v39 = vadd.f32 %v2587_v59, %v2571_v56  ;;  %v2602_v11 = vmax.f32 %v7773_v60, 0.0  ;;  %v7791_v12 = vadd.f32 %v2048_v8, %v7728_v26  ;;  %2480 = vmatprep.mubr.bf16.mxu0 %v7646_v48  ;;  %v7800_v58 = vadd.f32 %v2119_v13, %v7736_v29  ;;  %2551 = vmatprep.mubr.bf16.mxu1 %v7646_v48  ;;  %v7161_v8 = vld [vmem:[#allocation4 + $0x90] sm:$0xff]   ;;  %v7181_v60 = vld [vmem:[#allocation4 + $0x1a8] sm:$0xff]  }
 0x144   : > { %v4377_v19 = vadd.f32 %v2589_v3, %v2573_v63  ;;  %v8368_v20 = vmax.f32 %v7783_v7, 0.0  ;;  %v2050_v24 = vpop.f32.mrf.mxu0  ;;  %v2121_v32 = vpop.f32.mrf.mxu1  ;;  %v2685_v35 = vpack.c.bf16 %v2589_v3, %v2573_v63  ;;  %v7171_v63 = vld [vmem:[#allocation4 + $0x1f8] sm:$0xff]  }
 0x145   : > { %v4338_v28 = vadd.f32 %v4337_v57, %v2602_v11  ;;  %v2603_v30 = vmax.f32 %v7791_v12, 0.0  ;;  %v7807_v31 = vadd.f32 %v2050_v24, %v7721_v22  ;;  %6605 = vmatpush3.bf16.msra.mxu0 %v7152_v55  ;;  %v2605_v37 = vmax.f32 %v7800_v58, 0.0  ;;  %6645 = vmatpush3.bf16.msra.mxu1 %v7153_v9 }
 0x146   : > { %v4365_v34 = vadd.f32 %v4364_v0, %v8368_v20  ;;  %v7813_v38 = vadd.f32 %v2121_v32, %v7716_v21  ;;  %v2052_v48 = vpop.f32.mrf.mxu0  ;;  %6606 = vmatprep.subr.bf16.mxu0 %v7154_v10  ;;  %v2123_v50 = vpop.f32.mrf.mxu1  ;;  %6646 = vmatprep.subr.bf16.mxu1 %v7155_v16  ;;  %v7162_v16 = vld [vmem:[#allocation4 + $0x48] sm:$0xff]   ;;  %v2684_v12 = vpack.c.bf16 %v2588_v51, %v2572_v40  ;;  %v7177_v40 = vld [vmem:[#allocation4 + $0x1b0] sm:$0xff]  }
 0x147   : > { %v4352_v23 = vadd.f32 %v4351_v39, %v2603_v30  ;;  %v2618_v44 = vmax.f32 %v7807_v31, 0.0  ;;  %v7819_v49 = vadd.f32 %v2052_v48, %v7728_v26  ;;  %v4378_v55 = vadd.f32 %v4377_v19, %v2605_v37  ;;  %v7163_v48 = vld [vmem:[#allocation4 + $0xc8] sm:$0xff]   ;;  %v7184_v31 = vld [vmem:[#allocation4 + $0x120] sm:$0xff]  }
 0x148   : > { %v8366_v57 = vmax.f32 %v7813_v38, 0.0  ;;  %v7825_v61 = vadd.f32 %v2123_v50, %v7736_v29  ;;  %v2056_v0 = vpop.f32.mrf.mxu0  ;;  %2481 = vmatmul.mubr.bf16.gmra.mxu0 %v7655_v62  ;;  %v2127_v13 = vpop.f32.mrf.mxu1  ;;  %2552 = vmatmul.mubr.bf16.gmra.mxu1 %v7655_v62 }
 0x149   : > { %v4339_v9 = vadd.f32 %v4338_v28, %v2618_v44  ;;  %v2619_v10 = vmax.f32 %v7819_v49, 0.0  ;;  %v7832_v39 = vadd.f32 %v2056_v0, %v7721_v22  ;;  %6607 = vmatpush3.bf16.msra.mxu0 %v7156_v17  ;;  %v7839_v32 = vadd.f32 %v2127_v13, %v7716_v21  ;;  %6647 = vmatpush3.bf16.msra.mxu1 %v7157_v25 }
 0x14a   : > { %v4366_v19 = vadd.f32 %v4365_v34, %v8366_v57  ;;  %v2621_v24 = vmax.f32 %v7825_v61, 0.0  ;;  %v2058_v28 = vpop.f32.mrf.mxu0  ;;  %6608 = vmatprep.subr.bf16.mxu0 %v7158_v33  ;;  %v2129_v17 = vpop.f32.mrf.mxu1  ;;  %6648 = vmatprep.subr.bf16.mxu1 %v7159_v43  ;;  %v7164_v34 = vld [vmem:[#allocation4 + $0x8] sm:$0xff]   ;;  %v2698_v51 = vpack.c.bf16 %v2618_v44, %v2602_v11  ;;  %v7182_v11 = vld [vmem:[#allocation4 + $0x160] sm:$0xff]   ;;  %v7186_v44 = vld [vmem:[#allocation4 + $0x158] sm:$0xff]  }
 0x14b   : > { %v4353_v50 = vadd.f32 %v4352_v23, %v2619_v10  ;;  %v8367_v0 = vmax.f32 %v7832_v39, 0.0  ;;  %v7845_v62 = vadd.f32 %v2058_v28, %v7728_v26  ;;  %2490 = vmatprep.mubr.bf16.mxu0 %v7657_v6  ;;  %v8369_v25 = vmax.f32 %v7839_v32, 0.0  ;;  %2561 = vmatprep.mubr.bf16.mxu1 %v7657_v6  ;;  %v7165_v23 = vld [vmem:[#allocation4 + $0x88] sm:$0xff]  }
 0x14c   : > { %v4379_v13 = vadd.f32 %v4378_v55, %v2621_v24  ;;  %v7852_v33 = vadd.f32 %v2129_v17, %v7736_v29  ;;  %v2060_v5 = vpop.f32.mrf.mxu0  ;;  %v2131_v1 = vpop.f32.mrf.mxu1  ;;  %v7166_v55 = vld [vmem:[#allocation4 + $0x40] sm:$0xff]  }
 0x14d   : > { %v4340_v28 = vadd.f32 %v4339_v9, %v8367_v0  ;;  %v2635_v43 = vmax.f32 %v7845_v62, 0.0  ;;  %v7859_v2 = vadd.f32 %v2060_v5, %v7721_v22  ;;  %6609 = vmatpush3.bf16.msra.mxu0 %v7160_v53  ;;  %v4367_v4 = vadd.f32 %v4366_v19, %v8369_v25  ;;  %6649 = vmatpush3.bf16.msra.mxu1 %v7161_v8  ;;  %v7167_v9 = vld [vmem:[#allocation4 + $0xc0] sm:$0xff]  }
 0x14e   : > { %v8370_v17 = vmax.f32 %v7852_v33, 0.0  ;;  %v7865_v57 = vadd.f32 %v2131_v1, %v7716_v21  ;;  %v2062_v6 = vpop.f32.mrf.mxu0  ;;  %6610 = vmatprep.subr.bf16.mxu0 %v7162_v16  ;;  %v2133_v20 = vpop.f32.mrf.mxu1  ;;  %6650 = vmatprep.subr.bf16.mxu1 %v7163_v48  ;;  %v8376_v62 = vmax.f32 %v7832_v39, 0.0  ;;  %v7189_v39 = vld [vmem:[#allocation4 + $0x198] sm:$0xff]  }
 0x14f   : > { %v4354_v0 = vadd.f32 %v4353_v50, %v2635_v43  ;;  %v2650_v5 = vmax.f32 %v7859_v2, 0.0  ;;  %v7871_v53 = vadd.f32 %v2062_v6, %v7728_v26  ;;  %v7877_v8 = vadd.f32 %v2133_v20, %v7736_v29  ;;  %v7168_v6 = vld [vmem:[#allocation4] sm:$0xff]   ;;  %v7190_v2 = vld [vmem:[#allocation4 + $0x150] sm:$0xff]  }
 0x150   : > { %v4380_v19 = vadd.f32 %v4379_v13, %v8370_v17  ;;  %v2652_v1 = vmax.f32 %v7865_v57, 0.0  ;;  %v2066_v16 = vpop.f32.mrf.mxu0  ;;  %2491 = vmatmul.mubr.bf16.gmra.mxu0 %v7664_v18  ;;  %v2683_v50 = vpack.c.bf16 %v2587_v59, %v2571_v56  ;;  %v2137_v17 = vpop.f32.mrf.mxu1  ;;  %2562 = vmatmul.mubr.bf16.gmra.mxu1 %v7664_v18  ;;  %v7169_v20 = vld [vmem:[#allocation4 + $0x80] sm:$0xff]   ;;  %v7192_v57 = vld [vmem:[#allocation4 + $0x110] sm:$0xff]  }
 0x151   : > { %v4341_v48 = vadd.f32 %v4340_v28, %v2650_v5  ;;  %v2651_v25 = vmax.f32 %v7871_v53, 0.0  ;;  %v2067_v13 = vadd.f32 %v2066_v16, %v7721_v22  ;;  %6611 = vmatpush3.bf16.msra.mxu0 %v7164_v34  ;;  %v2653_v56 = vmax.f32 %v7877_v8, 0.0  ;;  %6651 = vmatpush3.bf16.msra.mxu1 %v7165_v23  ;;  %v7170_v28 = vld [vmem:[#allocation4 + $0x178] sm:$0xff]  }
 0x152   : > { %v4368_v47 = vadd.f32 %v4367_v4, %v2652_v1  ;;  %v2138_v59 = vadd.f32 %v2137_v17, %v7716_v21  ;;  %3809 = vmatprep.mubr.bf16.mxu0 %v2683_v50  ;;  %v2068_v22 = vpop.f32.mrf.mxu0  ;;  %3873 = vmatprep.mubr.bf16.mxu1 %v2685_v35  ;;  %v2139_v52 = vpop.f32.mrf.mxu1  ;;  %v7172_v23 = vld [vmem:[#allocation4 + $0x138] sm:$0xff]  }
 0x153   : > { %v4355_v18 = vadd.f32 %v4354_v0, %v2651_v25  ;;  %v7899_v34 = vmax.f32 %v2067_v13, 0.0  ;;  %v2069_v41 = vadd.f32 %v2068_v22, %v7728_v26  ;;  %6612 = vmatprep.subr.bf16.mxu0 %v7166_v55  ;;  %v4381_v4 = vadd.f32 %v4380_v19, %v2653_v56  ;;  %6652 = vmatprep.subr.bf16.mxu1 %v7167_v9 }
 0x154   : > { %v7902_v3 = vmax.f32 %v2138_v59, 0.0  ;;  %v2140_v21 = vadd.f32 %v2139_v52, %v7736_v29  ;;  %v2070_v17 = vpop.f32.mrf.mxu0  ;;  %v2682_v0 = vpack.c.bf16 %v2586_v46, %v2570_v45  ;;  %v2699_v55 = vpack.c.bf16 %v2619_v10, %v2603_v30  ;;  %v7173_v29 = vld [vmem:[#allocation4 + $0x1b8] sm:$0xff]   ;;  %v2141_v9 = vpop.f32.mrf.mxu1  ;;  %v7174_v10 = vld [vmem:[#allocation4 + $0x170] sm:$0xff]  }
 0x155   : > { %v4343_v8 = vsel %vm4331_vm0, %v7899_v34, 0.0  ;;  %v7911_v26 = vmax.f32 %v2069_v41, 0.0  ;;  %6613 = vmatpush3.bf16.msra.mxu0 %v7168_v6  ;;  %6653 = vmatpush3.bf16.msra.mxu1 %v7169_v20  ;;  %v2701_v45 = vpack.c.bf16 %v2621_v24, %v2605_v37  ;;  %v7175_v37 = vld [vmem:[#allocation4 + $0x1f0] sm:$0xff]   ;;  %v7179_v24 = vld [vmem:[#allocation4 + $0x1e8] sm:$0xff]   ;;  %v8373_v6 = vmax.f32 %v7783_v7, 0.0  ;;  %v7183_v7 = vld [vmem:[#allocation4 + $0x1e0] sm:$0xff]  }
 0x156   : > { %v7917_v19 = vadd.f32 %v4343_v8, %v4341_v48  ;;  %v4369_v15 = vsel %vm4331_vm0, %v7902_v3, 0.0  ;;  %v7921_v36 = vmax.f32 %v2140_v21, 0.0  ;;  %6678 = vmatprep.subr.bf16.mxu0 %v7170_v28  ;;  %v2071_v46 = vpop.f32.mrf.mxu0  ;;  %6718 = vmatprep.subr.bf16.mxu1 %v7171_v63  ;;  %v2142_v16 = vpop.f32.mrf.mxu1  ;;  %v8374_v48 = vmax.f32 %v7813_v38, 0.0  ;;  %v7180_v20 = vld [vmem:[#allocation4 + $0x128] sm:$0xff]   ;;  %v7185_v38 = vld [vmem:[#allocation4 + $0x1a0] sm:$0xff]   ;;  %v7188_v28 = vld [vmem:[#allocation4 + $0x118] sm:$0xff]  }
 0x157   : > { %v7931_v30 = vadd.f32 %v4369_v15, %v4368_v47  ;;  %v4356_v49 = vsel %vm4331_vm0, %v7911_v26, 0.0  ;;  %v2715_v35 = vpack.c.bf16 %v2651_v25, %v2635_v43  ;;  %v8375_v47 = vmax.f32 %v7852_v33, 0.0  ;;  %v7187_v33 = vld [vmem:[#allocation4 + $0x1d8] sm:$0xff]   ;;  %v7195_v41 = vld [vmem:[#allocation4 + $0x1c8] sm:$0xff]   ;;  %v7198_v21 = vld [vmem:[#allocation4 + $0x140] sm:$0xff]  }
 0x158   : > { %v7935_v50 = vadd.f32 %v4356_v49, %v4355_v18  ;;  %v4382_v58 = vsel %vm4331_vm0, %v7921_v36, 0.0  ;;  %3810 = vmatmul.mubr.bf16.vlgmr.msra.gmra.mxu0 %v2682_v0  ;;  %3874 = vmatmul.mubr.bf16.vlgmr.msra.gmra.mxu1 %v2684_v12  ;;  %v2700_v13 = vpack.c.bf16 %v8374_v48, %v8373_v6  ;;  %v2714_v25 = vpack.c.bf16 %v2650_v5, %v8376_v62  ;;  %v7191_v5 = vld [vmem:[#allocation4 + $0x1d0] sm:$0xff]   ;;  %v7196_v63 = vld [vmem:[#allocation4 + $0x108] sm:$0xff]   ;;  %v7200_v0 = vld [vmem:[#allocation4 + $0x100] sm:$0xff]  }
 0x159   : > { %v7939_v61 = vadd.f32 %v4382_v58, %v4381_v4  ;;  %3817 = vmatprep.mubr.bf16.mxu0 %v2699_v55  ;;  %3881 = vmatprep.mubr.bf16.mxu1 %v2701_v45  ;;  %v2717_v59 = vpack.c.bf16 %v2653_v56, %v8375_v47  ;;  %v8377_v43 = vmax.f32 %v7839_v32, 0.0  ;;  %v2731_v56 = vpack.c.bf16 %v7911_v26, %v7911_v26  ;;  %v7193_v32 = vld [vmem:[#allocation4 + $0x190] sm:$0xff]   ;;  %v7197_v4 = vld [vmem:[#allocation4 + $0x188] sm:$0xff]   ;;  %v7201_v8 = vld [vmem:[#allocation4 + $0x180] sm:$0xff]  }
 0x15a   : > { %6679 = vmatpush3.bf16.msra.mxu0 %v7172_v23  ;;  %6719 = vmatpush3.bf16.msra.mxu1 %v7173_v29  ;;  %v2733_v22 = vpack.c.bf16 %v7921_v36, %v7921_v36  ;;  %v2730_v18 = vpack.c.bf16 %v7899_v34, %v7899_v34  ;;  %v2732_v52 = vpack.c.bf16 %v7902_v3, %v7902_v3  ;;  %v7199_v23 = vld [vmem:[#allocation4 + $0x1c0] sm:$0xff]   ;;  %v668_v17 = vsub.s32 6, %v7702_v54  ;;  %v7202_v3 = vld [vmem:[#allocation4 + $0x278] sm:$0xff]  }
 0x15b   : > { %6680 = vmatprep.subr.bf16.mxu0 %v7174_v10  ;;  %6720 = vmatprep.subr.bf16.mxu1 %v7175_v37  ;;  %v2716_v53 = vpack.c.bf16 %v2652_v1, %v8377_v43  ;;  %v7194_v1 = vld [vmem:[#allocation4 + $0x148] sm:$0xff]   ;;  %v660_v34 = vsub.s32 4, %v7702_v54  ;;  %v664_v26 = vsub.s32 5, %v7702_v54  ;;  %v7203_v55 = vld [vmem:[#allocation4 + $0x2f8] sm:$0xff]   ;;  %v672_v29 = vsub.s32 7, %v7702_v54 }
 0x15c   : > { %v7978_v9 = vrot.slane %v7711_v14, %v668_v17 }
 0x15d   : > { %v7983_v15 = vrot.slane %v7711_v14, %v660_v34  ;;  %v7988_v45 = vrot.slane %v7711_v14, %v664_v26  ;;  %v7993_v12 = vrot.slane %v7711_v14, %v672_v29 }
 0x15e   : > { %6681 = vmatpush3.bf16.msra.mxu0 %v7176_v27  ;;  %6721 = vmatpush3.bf16.msra.mxu1 %v7177_v40 }
 0x15f   : > { %6682 = vmatprep.subr.bf16.mxu0 %v7178_v42  ;;  %6722 = vmatprep.subr.bf16.mxu1 %v7179_v24 }
 0x160   : > { %3818 = vmatmul.mubr.bf16.gmra.mxu0 %v2698_v51  ;;  %3882 = vmatmul.mubr.bf16.gmra.mxu1 %v2700_v13 }
 0x161   : > { %3825 = vmatprep.mubr.bf16.mxu0 %v2715_v35  ;;  %3889 = vmatprep.mubr.bf16.mxu1 %v2717_v59 }
 0x162   : > { %6683 = vmatpush3.bf16.msra.mxu0 %v7180_v20  ;;  %6723 = vmatpush3.bf16.msra.mxu1 %v7181_v60 }
 0x163   : > { %6684 = vmatprep.subr.bf16.mxu0 %v7182_v11  ;;  %6724 = vmatprep.subr.bf16.mxu1 %v7183_v7 }
 0x166   : > { %6685 = vmatpush3.bf16.msra.mxu0 %v7184_v31  ;;  %6725 = vmatpush3.bf16.msra.mxu1 %v7185_v38 }
 0x167   : > { %6686 = vmatprep.subr.bf16.mxu0 %v7186_v44  ;;  %6726 = vmatprep.subr.bf16.mxu1 %v7187_v33 }
 0x168   : > { %3826 = vmatmul.mubr.bf16.gmra.mxu0 %v2714_v25  ;;  %3890 = vmatmul.mubr.bf16.gmra.mxu1 %v2716_v53 }
 0x169   : > { %3833 = vmatprep.mubr.bf16.mxu0 %v2731_v56  ;;  %3897 = vmatprep.mubr.bf16.mxu1 %v2733_v22 }
 0x16a   : > { %6687 = vmatpush3.bf16.msra.mxu0 %v7188_v28  ;;  %6727 = vmatpush3.bf16.msra.mxu1 %v7189_v39 }
 0x16b   : > { %6688 = vmatprep.subr.bf16.mxu0 %v7190_v2  ;;  %6728 = vmatprep.subr.bf16.mxu1 %v7191_v5 }
 0x16e   : > { %6689 = vmatpush3.bf16.msra.mxu0 %v7192_v57  ;;  %6729 = vmatpush3.bf16.msra.mxu1 %v7193_v32  ;;  %v7204_v57 = vld [vmem:[#allocation4 + $0x238] sm:$0xff]  }
 0x16f   : > { %6690 = vmatprep.subr.bf16.mxu0 %v7194_v1  ;;  %6730 = vmatprep.subr.bf16.mxu1 %v7195_v41 }
 0x170   : > { %3834 = vmatmul.mubr.bf16.gmra.mxu0 %v2730_v18  ;;  %3898 = vmatmul.mubr.bf16.gmra.mxu1 %v2732_v52 }
 0x172   : > { %6691 = vmatpush3.bf16.msra.mxu0 %v7196_v63  ;;  %6731 = vmatpush3.bf16.msra.mxu1 %v7197_v4  ;;  %v7205_v63 = vld [vmem:[#allocation4 + $0x2b8] sm:$0xff]   ;;  %v7206_v4 = vld [vmem:[#allocation4 + $0x270] sm:$0xff]  }
 0x173   : > { %6692 = vmatprep.subr.bf16.mxu0 %v7198_v21  ;;  %6732 = vmatprep.subr.bf16.mxu1 %v7199_v23 }
 0x176   : > { %6693 = vmatpush3.bf16.msra.mxu0 %v7200_v0  ;;  %6733 = vmatpush3.bf16.msra.mxu1 %v7201_v8 }
 0x177   : > { %6758 = vmatprep.subr.bf16.mxu0 %v7202_v3  ;;  %6798 = vmatprep.subr.bf16.mxu1 %v7203_v55  ;;  %v7207_v55 = vld [vmem:[#allocation4 + $0x2f0] sm:$0xff]  }
 0x178   : > { %v2178_v36 = vpop.f32.mrf.mxu0  ;;  %v2249_v46 = vpop.f32.mrf.mxu1 }
 0x179   : > { %v2250_v49 = vadd.f32 %v2249_v46, %v7978_v9  ;;  %v2179_v16 = vadd.f32 %v2178_v36, %v7983_v15 }
 0x17a   : > { %v2180_v10 = vpop.f32.mrf.mxu0  ;;  %v2251_v58 = vpop.f32.mrf.mxu1 }
 0x17b   : > { %v2181_v37 = vadd.f32 %v2180_v10, %v7988_v45  ;;  %v2252_v40 = vadd.f32 %v2251_v58, %v7993_v12  ;;  %v2576_v24 = vmax.f32 %v2250_v49, 0.0  ;;  %v2574_v14 = vmax.f32 %v2179_v16, 0.0 }
 0x17c   : > { %v2182_v27 = vpop.f32.mrf.mxu0  ;;  %v2253_v51 = vpop.f32.mrf.mxu1 }
 0x17d   : > { %v2183_v42 = vadd.f32 %v2182_v27, %v7983_v15  ;;  %v2254_v6 = vadd.f32 %v2253_v51, %v7978_v9  ;;  %v2575_v47 = vmax.f32 %v2181_v37, 0.0  ;;  %v2577_v7 = vmax.f32 %v2252_v40, 0.0  ;;  %v7208_v40 = vld [vmem:[#allocation4 + $0x230] sm:$0xff]  }
 0x17e   : > { %v2184_v48 = vpop.f32.mrf.mxu0  ;;  %v2255_v20 = vpop.f32.mrf.mxu1 }
 0x17f   : > { %v2590_v13 = vmax.f32 %v2183_v42, 0.0  ;;  %v2185_v35 = vadd.f32 %v2184_v48, %v7988_v45  ;;  %v2592_v59 = vmax.f32 %v2254_v6, 0.0  ;;  %v2256_v60 = vadd.f32 %v2255_v20, %v7993_v12  ;;  %v7209_v48 = vld [vmem:[#allocation4 + $0x2b0] sm:$0xff]  }
 0x180   : > { %v2188_v11 = vpop.f32.mrf.mxu0  ;;  %v2259_v62 = vpop.f32.mrf.mxu1 }
 0x181   : > { %v4390_v31 = vadd.f32 %v2590_v13, %v2574_v14  ;;  %v2591_v38 = vmax.f32 %v2185_v35, 0.0  ;;  %v2189_v44 = vadd.f32 %v2188_v11, %v7983_v15  ;;  %v2686_v25 = vpack.c.bf16 %v2590_v13, %v2574_v14  ;;  %v7210_v14 = vld [vmem:[#allocation4 + $0x268] sm:$0xff]  }
 0x182   : > { %v4416_v33 = vadd.f32 %v2592_v59, %v2576_v24  ;;  %v2593_v43 = vmax.f32 %v2256_v60, 0.0  ;;  %v2260_v53 = vadd.f32 %v2259_v62, %v7978_v9  ;;  %v2190_v56 = vpop.f32.mrf.mxu0  ;;  %v2261_v2 = vpop.f32.mrf.mxu1  ;;  %v2688_v21 = vpack.c.bf16 %v2592_v59, %v2576_v24  ;;  %v7211_v60 = vld [vmem:[#allocation4 + $0x2e8] sm:$0xff]  }
 0x183   : > { %v4403_v22 = vadd.f32 %v2591_v38, %v2575_v47  ;;  %v2606_v28 = vmax.f32 %v2189_v44, 0.0  ;;  %v2191_v39 = vadd.f32 %v2190_v56, %v7988_v45  ;;  %v2687_v5 = vpack.c.bf16 %v2591_v38, %v2575_v47  ;;  %v7212_v56 = vld [vmem:[#allocation4 + $0x228] sm:$0xff]  }
 0x184   : > { %v4429_v32 = vadd.f32 %v2593_v43, %v2577_v7  ;;  %v2608_v1 = vmax.f32 %v2260_v53, 0.0  ;;  %v2262_v18 = vadd.f32 %v2261_v2, %v7993_v12  ;;  %v2192_v41 = vpop.f32.mrf.mxu0  ;;  %v2689_v52 = vpack.c.bf16 %v2593_v43, %v2577_v7  ;;  %v2263_v3 = vpop.f32.mrf.mxu1 }
 0x185   : > { %v4391_v23 = vadd.f32 %v4390_v31, %v2606_v28  ;;  %v2607_v0 = vmax.f32 %v2191_v39, 0.0  ;;  %v2193_v8 = vadd.f32 %v2192_v41, %v7983_v15  ;;  %3937 = vmatprep.mubr.bf16.mxu0 %v2687_v5  ;;  %v2264_v49 = vadd.f32 %v2263_v3, %v7978_v9 }
 0x186   : > { %v4417_v36 = vadd.f32 %v4416_v33, %v2608_v1  ;;  %v2609_v46 = vmax.f32 %v2262_v18, 0.0  ;;  %4001 = vmatprep.mubr.bf16.mxu1 %v2689_v52  ;;  %v2194_v10 = vpop.f32.mrf.mxu0  ;;  %3938 = vmatmul.mubr.bf16.vlgmr.msra.gmra.mxu0 %v2686_v25  ;;  %v2265_v27 = vpop.f32.mrf.mxu1 }
 0x187   : > { %v4404_v16 = vadd.f32 %v4403_v22, %v2607_v0  ;;  %v2622_v58 = vmax.f32 %v2193_v8, 0.0  ;;  %v2195_v37 = vadd.f32 %v2194_v10, %v7988_v45  ;;  %4002 = vmatmul.mubr.bf16.vlgmr.msra.gmra.mxu1 %v2688_v21  ;;  %6759 = vmatpush3.bf16.msra.mxu0 %v7204_v57  ;;  %v2624_v51 = vmax.f32 %v2264_v49, 0.0  ;;  %v7213_v57 = vld [vmem:[#allocation4 + $0x2a8] sm:$0xff]  }
 0x188   : > { %v4430_v42 = vadd.f32 %v4429_v32, %v2609_v46  ;;  %v2266_v24 = vadd.f32 %v2265_v27, %v7993_v12  ;;  %v2198_v6 = vpop.f32.mrf.mxu0  ;;  %6799 = vmatpush3.bf16.msra.mxu1 %v7205_v63  ;;  %6760 = vmatprep.subr.bf16.mxu0 %v7206_v4  ;;  %v2269_v59 = vpop.f32.mrf.mxu1  ;;  %v7214_v32 = vld [vmem:[#allocation4 + $0x260] sm:$0xff]   ;;  %v7218_v27 = vld [vmem:[#allocation4 + $0x258] sm:$0xff]  }
 0x189   : > { %v2702_v13 = vpack.c.bf16 %v2622_v58, %v2606_v28  ;;  %v4392_v35 = vadd.f32 %v4391_v23, %v2622_v58  ;;  %v2623_v20 = vmax.f32 %v2195_v37, 0.0  ;;  %v2199_v47 = vadd.f32 %v2198_v6, %v7983_v15  ;;  %6800 = vmatprep.subr.bf16.mxu1 %v7207_v55  ;;  %v7215_v63 = vld [vmem:[#allocation4 + $0x2e0] sm:$0xff]  }
 0x18a   : > { %v2704_v11 = vpack.c.bf16 %v2624_v51, %v2608_v1  ;;  %v4418_v7 = vadd.f32 %v4417_v36, %v2624_v51  ;;  %v2625_v31 = vmax.f32 %v2266_v24, 0.0  ;;  %v2270_v38 = vadd.f32 %v2269_v59, %v7978_v9  ;;  %v2200_v44 = vpop.f32.mrf.mxu0  ;;  %v2271_v43 = vpop.f32.mrf.mxu1  ;;  %v7217_v37 = vld [vmem:[#allocation4 + $0x2a0] sm:$0xff]  }
 0x18b   : > { %v4405_v62 = vadd.f32 %v4404_v16, %v2623_v20  ;;  %v2638_v25 = vmax.f32 %v2199_v47, 0.0  ;;  %v2201_v33 = vadd.f32 %v2200_v44, %v7988_v45  ;;  %v2703_v53 = vpack.c.bf16 %v2623_v20, %v2607_v0  ;;  %6761 = vmatpush3.bf16.msra.mxu0 %v7208_v40 }
 0x18c   : > { %v4431_v22 = vadd.f32 %v4430_v42, %v2625_v31  ;;  %v2640_v28 = vmax.f32 %v2270_v38, 0.0  ;;  %v2272_v39 = vadd.f32 %v2271_v43, %v7993_v12  ;;  %v2202_v2 = vpop.f32.mrf.mxu0  ;;  %v2705_v5 = vpack.c.bf16 %v2625_v31, %v2609_v46  ;;  %6801 = vmatpush3.bf16.msra.mxu1 %v7209_v48  ;;  %6762 = vmatprep.subr.bf16.mxu0 %v7210_v14  ;;  %v2273_v52 = vpop.f32.mrf.mxu1  ;;  %v7216_v46 = vld [vmem:[#allocation4 + $0x220] sm:$0xff]   ;;  %v7219_v48 = vld [vmem:[#allocation4 + $0x2d8] sm:$0xff]  }
 0x18d   : > { %v4393_v1 = vadd.f32 %v4392_v35, %v2638_v25  ;;  %v2639_v18 = vmax.f32 %v2201_v33, 0.0  ;;  %v2203_v41 = vadd.f32 %v2202_v2, %v7983_v15  ;;  %3945 = vmatprep.mubr.bf16.mxu0 %v2703_v53  ;;  %6802 = vmatprep.subr.bf16.mxu1 %v7211_v60  ;;  %v2274_v23 = vadd.f32 %v2273_v52, %v7978_v9  ;;  %v7220_v38 = vld [vmem:[#allocation4 + $0x218] sm:$0xff]   ;;  %v7222_v53 = vld [vmem:[#allocation4 + $0x250] sm:$0xff]  }
 0x18e   : > { %v4419_v4 = vadd.f32 %v4418_v7, %v2640_v28  ;;  %v2641_v21 = vmax.f32 %v2272_v39, 0.0  ;;  %v2204_v0 = vpop.f32.mrf.mxu0  ;;  %3946 = vmatmul.mubr.bf16.gmra.mxu0 %v2702_v13  ;;  %4009 = vmatprep.mubr.bf16.mxu1 %v2705_v5  ;;  %v2275_v36 = vpop.f32.mrf.mxu1  ;;  %v7221_v43 = vld [vmem:[#allocation4 + $0x298] sm:$0xff]  }
 0x18f   : > { %v4406_v8 = vadd.f32 %v4405_v62, %v2639_v18  ;;  %v2654_v3 = vmax.f32 %v2203_v41, 0.0  ;;  %v2205_v55 = vadd.f32 %v2204_v0, %v7988_v45  ;;  %4010 = vmatmul.mubr.bf16.gmra.mxu1 %v2704_v11  ;;  %6763 = vmatpush3.bf16.msra.mxu0 %v7212_v56  ;;  %v2656_v10 = vmax.f32 %v2274_v23, 0.0  ;;  %v7227_v0 = vld [vmem:[#allocation4 + $0x2c8] sm:$0xff]  }
 0x190   : > { %v4432_v49 = vadd.f32 %v4431_v22, %v2641_v21  ;;  %v2276_v16 = vadd.f32 %v2275_v36, %v7993_v12  ;;  %v2208_v58 = vpop.f32.mrf.mxu0  ;;  %6803 = vmatpush3.bf16.msra.mxu1 %v7213_v57  ;;  %6764 = vmatprep.subr.bf16.mxu0 %v7214_v32  ;;  %v2279_v6 = vpop.f32.mrf.mxu1  ;;  %v7229_v36 = vld [vmem:[#allocation4 + $0x288] sm:$0xff]  }
 0x191   : > { %v2718_v40 = vpack.c.bf16 %v2654_v3, %v2638_v25  ;;  %v4394_v42 = vadd.f32 %v4393_v1, %v2654_v3  ;;  %v2655_v51 = vmax.f32 %v2205_v55, 0.0  ;;  %v2209_v24 = vadd.f32 %v2208_v58, %v7983_v15  ;;  %6804 = vmatprep.subr.bf16.mxu1 %v7215_v63  ;;  %v7228_v55 = vld [vmem:[#allocation4 + $0x208] sm:$0xff]   ;;  %v7234_v58 = vld [vmem:[#allocation4 + $0x378] sm:$0xff]  }
 0x192   : > { %v2720_v14 = vpack.c.bf16 %v2656_v10, %v2640_v28  ;;  %v4420_v13 = vadd.f32 %v4419_v4, %v2656_v10  ;;  %v2657_v35 = vmax.f32 %v2276_v16, 0.0  ;;  %v2280_v20 = vadd.f32 %v2279_v6, %v7978_v9  ;;  %v2210_v47 = vpop.f32.mrf.mxu0  ;;  %v2281_v7 = vpop.f32.mrf.mxu1  ;;  %v7225_v4 = vld [vmem:[#allocation4 + $0x290] sm:$0xff]   ;;  %v7232_v10 = vld [vmem:[#allocation4 + $0x200] sm:$0xff]  }
 0x193   : > { %v4407_v59 = vadd.f32 %v4406_v8, %v2655_v51  ;;  %v2670_v60 = vmax.f32 %v2209_v24, 0.0  ;;  %v2211_v11 = vadd.f32 %v2210_v47, %v7988_v45  ;;  %v2719_v31 = vpack.c.bf16 %v2655_v51, %v2639_v18  ;;  %6765 = vmatpush3.bf16.msra.mxu0 %v7216_v46  ;;  %v7223_v45 = vld [vmem:[#allocation4 + $0x2d0] sm:$0xff]   ;;  %v7230_v46 = vld [vmem:[#allocation4 + $0x240] sm:$0xff]  }
 0x194   : > { %v4433_v44 = vadd.f32 %v4432_v49, %v2657_v35  ;;  %v2672_v62 = vmax.f32 %v2280_v20, 0.0  ;;  %v2282_v15 = vadd.f32 %v2281_v7, %v7993_v12  ;;  %v2721_v25 = vpack.c.bf16 %v2657_v35, %v2641_v21  ;;  %v2212_v33 = vpop.f32.mrf.mxu0  ;;  %6805 = vmatpush3.bf16.msra.mxu1 %v7217_v37  ;;  %6766 = vmatprep.subr.bf16.mxu0 %v7218_v27  ;;  %v2283_v22 = vpop.f32.mrf.mxu1  ;;  %v7224_v18 = vld [vmem:[#allocation4 + $0x210] sm:$0xff]   ;;  %v7226_v21 = vld [vmem:[#allocation4 + $0x248] sm:$0xff]   ;;  %v7231_v49 = vld [vmem:[#allocation4 + $0x2c0] sm:$0xff]  }
 0x195   : > { %v4395_v9 = vsel %vm4331_vm0, %v2670_v60, 0.0  ;;  %v2671_v56 = vmax.f32 %v2211_v11, 0.0  ;;  %3953 = vmatprep.mubr.bf16.mxu0 %v2719_v31  ;;  %6806 = vmatprep.subr.bf16.mxu1 %v7219_v48  ;;  %v2734_v8 = vpack.c.bf16 %v2670_v60, %v2670_v60  ;;  %v7233_v16 = vld [vmem:[#allocation4 + $0x280] sm:$0xff]   ;;  %v7235_v37 = vld [vmem:[#allocation4 + $0x3f8] sm:$0xff]   ;;  %v8038_v27 = vld [vmem:[%s8355_s2 + $0x8] sm:$0xff]  ;;  %v8379_v51 = vsub.s32 0, %v7702_v54 }
 0x196   : > { %v8024_v28 = vadd.f32 %v4395_v9, %v4394_v42  ;;  %v4421_v39 = vsel %vm4331_vm0, %v2672_v62, 0.0  ;;  %v2673_v2 = vmax.f32 %v2282_v15, 0.0  ;;  %3954 = vmatmul.mubr.bf16.gmra.mxu0 %v2718_v40  ;;  %4017 = vmatprep.mubr.bf16.mxu1 %v2721_v25  ;;  %v2213_v12 = vpop.f32.mrf.mxu0  ;;  %v2284_v1 = vpop.f32.mrf.mxu1  ;;  %v2736_v3 = vpack.c.bf16 %v2672_v62, %v2672_v62 }
 0x197   : > { %v8027_v5 = vadd.f32 %v4421_v39, %v4420_v13  ;;  %v2735_v57 = vpack.c.bf16 %v2671_v56, %v2671_v56  ;;  %v4408_v32 = vsel %vm4331_vm0, %v2671_v56, 0.0  ;;  %4018 = vmatmul.mubr.bf16.gmra.mxu1 %v2720_v14  ;;  %6767 = vmatpush3.bf16.msra.mxu0 %v7220_v38  ;;  %v8378_v40 = vsub.s32 2, %v7702_v54 }
 0x198   : > { %v8030_v41 = vadd.f32 %v4408_v32, %v4407_v59  ;;  %v2737_v52 = vpack.c.bf16 %v2673_v2, %v2673_v2  ;;  %v4434_v63 = vsel %vm4331_vm0, %v2673_v2, 0.0  ;;  %6807 = vmatpush3.bf16.msra.mxu1 %v7221_v43  ;;  %6768 = vmatprep.subr.bf16.mxu0 %v7222_v53  ;;  %v8048_v24 = vrot.slane %v8038_v27, %v8379_v51  ;;  %v7237_v51 = vld [vmem:[#allocation4 + $0x3b8] sm:$0xff]  }
 0x199   : > { %v8033_v23 = vadd.f32 %v4434_v63, %v4433_v44  ;;  %3961 = vmatprep.mubr.bf16.mxu0 %v2735_v57  ;;  %6808 = vmatprep.subr.bf16.mxu1 %v7223_v45  ;;  %v8043_v42 = vrot.slane %v8038_v27, %v8378_v40  ;;  %v8380_v48 = vsub.s32 1, %v7702_v54  ;;  %v8381_v35 = vsub.s32 3, %v7702_v54 }
 0x19a   : > { %4025 = vmatprep.mubr.bf16.mxu1 %v2737_v52 }
 0x19b   : > { %6769 = vmatpush3.bf16.msra.mxu0 %v7224_v18  ;;  %v8053_v14 = vrot.slane %v8038_v27, %v8380_v48  ;;  %v8058_v20 = vrot.slane %v8038_v27, %v8381_v35 }
 0x19c   : > { %6809 = vmatpush3.bf16.msra.mxu1 %v7225_v4  ;;  %6770 = vmatprep.subr.bf16.mxu0 %v7226_v21 }
 0x19d   : > { %6810 = vmatprep.subr.bf16.mxu1 %v7227_v0 }
 0x19e   : > { %3962 = vmatmul.mubr.bf16.gmra.mxu0 %v2734_v8 }
 0x19f   : > { %4026 = vmatmul.mubr.bf16.gmra.mxu1 %v2736_v3  ;;  %6771 = vmatpush3.bf16.msra.mxu0 %v7228_v55 }
 0x1a0   : > { %6811 = vmatpush3.bf16.msra.mxu1 %v7229_v36  ;;  %6772 = vmatprep.subr.bf16.mxu0 %v7230_v46 }
 0x1a1   : > { %6812 = vmatprep.subr.bf16.mxu1 %v7231_v49  ;;  %v7236_v49 = vld [vmem:[#allocation4 + $0x338] sm:$0xff]  }
 0x1a3   : > { %6773 = vmatpush3.bf16.msra.mxu0 %v7232_v10 }
 0x1a4   : > { %6813 = vmatpush3.bf16.msra.mxu1 %v7233_v16  ;;  %6838 = vmatprep.subr.bf16.mxu0 %v7234_v58 }
 0x1a5   : > { %6878 = vmatprep.subr.bf16.mxu1 %v7235_v37 }
 0x1b8   : > { %v2320_v6 = vpop.f32.mrf.mxu0  ;;  %v2391_v13 = vpop.f32.mrf.mxu1 }
 0x1b9   : > { %v2392_v47 = vadd.f32 %v2391_v13, %v8043_v42  ;;  %v2321_v60 = vadd.f32 %v2320_v6, %v8048_v24  ;;  %v7238_v6 = vld [vmem:[#allocation4 + $0x370] sm:$0xff]  }
 0x1ba   : > { %v2322_v59 = vpop.f32.mrf.mxu0  ;;  %v2393_v11 = vpop.f32.mrf.mxu1 }
 0x1bb   : > { %v2323_v7 = vadd.f32 %v2322_v59, %v8053_v14  ;;  %v2394_v38 = vadd.f32 %v2393_v11, %v8058_v20  ;;  %v2580_v15 = vmax.f32 %v2392_v47, 0.0  ;;  %v2578_v43 = vmax.f32 %v2321_v60, 0.0  ;;  %v7239_v60 = vld [vmem:[#allocation4 + $0x3f0] sm:$0xff]  }
 0x1bc   : > { %v2324_v31 = vpop.f32.mrf.mxu0  ;;  %v2395_v62 = vpop.f32.mrf.mxu1 }
 0x1bd   : > { %v2325_v44 = vadd.f32 %v2324_v31, %v8048_v24  ;;  %v2396_v25 = vadd.f32 %v2395_v62, %v8043_v42  ;;  %v2579_v22 = vmax.f32 %v2323_v7, 0.0  ;;  %v2581_v12 = vmax.f32 %v2394_v38, 0.0 }
 0x1be   : > { %v2326_v33 = vpop.f32.mrf.mxu0  ;;  %v2397_v56 = vpop.f32.mrf.mxu1 }
 0x1bf   : > { %v2594_v53 = vmax.f32 %v2325_v44, 0.0  ;;  %v2327_v9 = vadd.f32 %v2326_v33, %v8053_v14  ;;  %v2596_v45 = vmax.f32 %v2396_v25, 0.0  ;;  %v2398_v39 = vadd.f32 %v2397_v56, %v8058_v20 }
 0x1c0   : > { %v2330_v2 = vpop.f32.mrf.mxu0  ;;  %v2401_v18 = vpop.f32.mrf.mxu1 }
 0x1c1   : > { %v4442_v57 = vadd.f32 %v2594_v53, %v2578_v43  ;;  %v2595_v32 = vmax.f32 %v2327_v9, 0.0  ;;  %v2331_v1 = vadd.f32 %v2330_v2, %v8048_v24  ;;  %v2690_v52 = vpack.c.bf16 %v2594_v53, %v2578_v43 }
 0x1c2   : > { %v4468_v63 = vadd.f32 %v2596_v45, %v2580_v15  ;;  %v2597_v4 = vmax.f32 %v2398_v39, 0.0  ;;  %v2402_v21 = vadd.f32 %v2401_v18, %v8043_v42  ;;  %v2332_v0 = vpop.f32.mrf.mxu0  ;;  %v2403_v46 = vpop.f32.mrf.mxu1  ;;  %v2692_v48 = vpack.c.bf16 %v2596_v45, %v2580_v15  ;;  %v7240_v15 = vld [vmem:[#allocation4 + $0x330] sm:$0xff]   ;;  %v7242_v45 = vld [vmem:[#allocation4 + $0x368] sm:$0xff]  }
 0x1c3   : > { %v2691_v8 = vpack.c.bf16 %v2595_v32, %v2579_v22  ;;  %v4455_v3 = vadd.f32 %v2595_v32, %v2579_v22  ;;  %v2610_v55 = vmax.f32 %v2331_v1, 0.0  ;;  %v2333_v36 = vadd.f32 %v2332_v0, %v8053_v14  ;;  %v7241_v22 = vld [vmem:[#allocation4 + $0x3b0] sm:$0xff]   ;;  %v7243_v1 = vld [vmem:[#allocation4 + $0x3e8] sm:$0xff]  }
 0x1c4   : > { %v2693_v10 = vpack.c.bf16 %v2597_v4, %v2581_v12  ;;  %v4481_v16 = vadd.f32 %v2597_v4, %v2581_v12  ;;  %v2612_v58 = vmax.f32 %v2402_v21, 0.0  ;;  %v2404_v37 = vadd.f32 %v2403_v46, %v8058_v20  ;;  %v2334_v40 = vpop.f32.mrf.mxu0  ;;  %v2405_v59 = vpop.f32.mrf.mxu1 }
 0x1c5   : > { %v4443_v13 = vadd.f32 %v4442_v57, %v2610_v55  ;;  %v2611_v35 = vmax.f32 %v2333_v36, 0.0  ;;  %v2335_v47 = vadd.f32 %v2334_v40, %v8048_v24  ;;  %4065 = vmatprep.mubr.bf16.mxu0 %v2691_v8  ;;  %v2406_v31 = vadd.f32 %v2405_v59, %v8043_v42 }
 0x1c6   : > { %v4469_v11 = vadd.f32 %v4468_v63, %v2612_v58  ;;  %v2613_v7 = vmax.f32 %v2404_v37, 0.0  ;;  %4129 = vmatprep.mubr.bf16.mxu1 %v2693_v10  ;;  %v2336_v38 = vpop.f32.mrf.mxu0  ;;  %4066 = vmatmul.mubr.bf16.vlgmr.msra.gmra.mxu0 %v2690_v52  ;;  %v2407_v33 = vpop.f32.mrf.mxu1 }
 0x1c7   : > { %v4456_v44 = vadd.f32 %v4455_v3, %v2611_v35  ;;  %v2626_v62 = vmax.f32 %v2335_v47, 0.0  ;;  %v2337_v25 = vadd.f32 %v2336_v38, %v8053_v14  ;;  %4130 = vmatmul.mubr.bf16.vlgmr.msra.gmra.mxu1 %v2692_v48  ;;  %6839 = vmatpush3.bf16.msra.mxu0 %v7236_v49  ;;  %v2628_v53 = vmax.f32 %v2406_v31, 0.0  ;;  %v7247_v47 = vld [vmem:[#allocation4 + $0x3e0] sm:$0xff]  }
 0x1c8   : > { %v4482_v43 = vadd.f32 %v4481_v16, %v2613_v7  ;;  %v2408_v9 = vadd.f32 %v2407_v33, %v8058_v20  ;;  %v2340_v56 = vpop.f32.mrf.mxu0  ;;  %6879 = vmatpush3.bf16.msra.mxu1 %v7237_v51  ;;  %6840 = vmatprep.subr.bf16.mxu0 %v7238_v6  ;;  %v2411_v32 = vpop.f32.mrf.mxu1  ;;  %v7246_v51 = vld [vmem:[#allocation4 + $0x360] sm:$0xff]  }
 0x1c9   : > { %v2706_v39 = vpack.c.bf16 %v2626_v62, %v2610_v55  ;;  %v4444_v2 = vadd.f32 %v4443_v13, %v2626_v62  ;;  %v2627_v12 = vmax.f32 %v2337_v25, 0.0  ;;  %v2341_v57 = vadd.f32 %v2340_v56, %v8048_v24  ;;  %6880 = vmatprep.subr.bf16.mxu1 %v7239_v60  ;;  %v7244_v55 = vld [vmem:[#allocation4 + $0x328] sm:$0xff]   ;;  %v7248_v25 = vld [vmem:[#allocation4 + $0x320] sm:$0xff]   ;;  %v7250_v56 = vld [vmem:[#allocation4 + $0x358] sm:$0xff]  }
 0x1ca   : > { %v2708_v18 = vpack.c.bf16 %v2628_v53, %v2612_v58  ;;  %v4470_v52 = vadd.f32 %v4469_v11, %v2628_v53  ;;  %v2629_v63 = vmax.f32 %v2408_v9, 0.0  ;;  %v2412_v4 = vadd.f32 %v2411_v32, %v8043_v42  ;;  %v2342_v21 = vpop.f32.mrf.mxu0  ;;  %v2413_v46 = vpop.f32.mrf.mxu1  ;;  %v7245_v58 = vld [vmem:[#allocation4 + $0x3a8] sm:$0xff]   ;;  %v7249_v9 = vld [vmem:[#allocation4 + $0x3a0] sm:$0xff]  }
 0x1cb   : > { %v2707_v0 = vpack.c.bf16 %v2627_v12, %v2611_v35  ;;  %v4457_v8 = vadd.f32 %v4456_v44, %v2627_v12  ;;  %v2642_v3 = vmax.f32 %v2341_v57, 0.0  ;;  %v2343_v36 = vadd.f32 %v2342_v21, %v8053_v14  ;;  %6841 = vmatpush3.bf16.msra.mxu0 %v7240_v15  ;;  %v7251_v57 = vld [vmem:[#allocation4 + $0x3d8] sm:$0xff]  }
 0x1cc   : > { %v2709_v49 = vpack.c.bf16 %v2629_v63, %v2613_v7  ;;  %v4483_v10 = vadd.f32 %v4482_v43, %v2629_v63  ;;  %v2644_v16 = vmax.f32 %v2412_v4, 0.0  ;;  %v2414_v37 = vadd.f32 %v2413_v46, %v8058_v20  ;;  %v2344_v40 = vpop.f32.mrf.mxu0  ;;  %6881 = vmatpush3.bf16.msra.mxu1 %v7241_v22  ;;  %6842 = vmatprep.subr.bf16.mxu0 %v7242_v45  ;;  %v2415_v35 = vpop.f32.mrf.mxu1 }
 0x1cd   : > { %v4445_v6 = vadd.f32 %v4444_v2, %v2642_v3  ;;  %v2643_v48 = vmax.f32 %v2343_v36, 0.0  ;;  %v2345_v13 = vadd.f32 %v2344_v40, %v8048_v24  ;;  %4073 = vmatprep.mubr.bf16.mxu0 %v2707_v0  ;;  %6882 = vmatprep.subr.bf16.mxu1 %v7243_v1  ;;  %v2416_v11 = vadd.f32 %v2415_v35, %v8043_v42 }
 0x1ce   : > { %v4471_v59 = vadd.f32 %v4470_v52, %v2644_v16  ;;  %v2645_v60 = vmax.f32 %v2414_v37, 0.0  ;;  %v2346_v7 = vpop.f32.mrf.mxu0  ;;  %4074 = vmatmul.mubr.bf16.gmra.mxu0 %v2706_v39  ;;  %4137 = vmatprep.mubr.bf16.mxu1 %v2709_v49  ;;  %v2417_v62 = vpop.f32.mrf.mxu1  ;;  %v7254_v37 = vld [vmem:[#allocation4 + $0x350] sm:$0xff]  }
 0x1cf   : > { %v4458_v31 = vadd.f32 %v4457_v8, %v2643_v48  ;;  %v2658_v38 = vmax.f32 %v2345_v13, 0.0  ;;  %v2347_v44 = vadd.f32 %v2346_v7, %v8053_v14  ;;  %4138 = vmatmul.mubr.bf16.gmra.mxu1 %v2708_v18  ;;  %6843 = vmatpush3.bf16.msra.mxu0 %v7244_v55  ;;  %v2660_v15 = vmax.f32 %v2416_v11, 0.0 }
 0x1d0   : > { %v4484_v33 = vadd.f32 %v4483_v10, %v2645_v60  ;;  %v2418_v43 = vadd.f32 %v2417_v62, %v8058_v20  ;;  %v2350_v53 = vpop.f32.mrf.mxu0  ;;  %6883 = vmatpush3.bf16.msra.mxu1 %v7245_v58  ;;  %6844 = vmatprep.subr.bf16.mxu0 %v7246_v51  ;;  %v2421_v12 = vpop.f32.mrf.mxu1 }
 0x1d1   : > { %v2722_v22 = vpack.c.bf16 %v2658_v38, %v2642_v3  ;;  %v4446_v45 = vadd.f32 %v4445_v6, %v2658_v38  ;;  %v2659_v39 = vmax.f32 %v2347_v44, 0.0  ;;  %v2351_v2 = vadd.f32 %v2350_v53, %v8048_v24  ;;  %6884 = vmatprep.subr.bf16.mxu1 %v7247_v47  ;;  %v7252_v3 = vld [vmem:[#allocation4 + $0x318] sm:$0xff]   ;;  %v7257_v38 = vld [vmem:[#allocation4 + $0x390] sm:$0xff]   ;;  %v7258_v44 = vld [vmem:[#allocation4 + $0x348] sm:$0xff]  }
 0x1d2   : > { %v2724_v32 = vpack.c.bf16 %v2660_v15, %v2644_v16  ;;  %v4472_v1 = vadd.f32 %v4471_v59, %v2660_v15  ;;  %v2661_v18 = vmax.f32 %v2418_v43, 0.0  ;;  %v2422_v52 = vadd.f32 %v2421_v12, %v8043_v42  ;;  %v2352_v63 = vpop.f32.mrf.mxu0  ;;  %v2423_v36 = vpop.f32.mrf.mxu1  ;;  %v7253_v16 = vld [vmem:[#allocation4 + $0x398] sm:$0xff]   ;;  %v7260_v43 = vld [vmem:[#allocation4 + $0x308] sm:$0xff]  }
 0x1d3   : > { %v2723_v4 = vpack.c.bf16 %v2659_v39, %v2643_v48  ;;  %v4459_v21 = vadd.f32 %v4458_v31, %v2659_v39  ;;  %v2674_v0 = vmax.f32 %v2351_v2, 0.0  ;;  %v2353_v8 = vadd.f32 %v2352_v63, %v8053_v14  ;;  %6845 = vmatpush3.bf16.msra.mxu0 %v7248_v25  ;;  %v7255_v14 = vld [vmem:[#allocation4 + $0x3d0] sm:$0xff]   ;;  %v7259_v25 = vld [vmem:[#allocation4 + $0x3c8] sm:$0xff]   ;;  %v7266_v39 = vld [vmem:[#allocation6 + $0x78] sm:$0xff]  }
 0x1d4   : > { %v2725_v46 = vpack.c.bf16 %v2661_v18, %v2645_v60  ;;  %v4485_v55 = vadd.f32 %v4484_v33, %v2661_v18  ;;  %v2676_v24 = vmax.f32 %v2422_v52, 0.0  ;;  %v2424_v49 = vadd.f32 %v2423_v36, %v8058_v20  ;;  %v2354_v10 = vpop.f32.mrf.mxu0  ;;  %6885 = vmatpush3.bf16.msra.mxu1 %v7249_v9  ;;  %6846 = vmatprep.subr.bf16.mxu0 %v7250_v56  ;;  %v2425_v58 = vpop.f32.mrf.mxu1  ;;  %v7256_v60 = vld [vmem:[#allocation4 + $0x310] sm:$0xff]   ;;  %v7261_v53 = vld [vmem:[#allocation4 + $0x388] sm:$0xff]   ;;  %v7262_v9 = vld [vmem:[#allocation4 + $0x340] sm:$0xff]  }
 0x1d5   : > { %v4447_v42 = vsel %vm4331_vm0, %v2674_v0, 0.0  ;;  %v2675_v40 = vmax.f32 %v2353_v8, 0.0  ;;  %4081 = vmatprep.mubr.bf16.mxu0 %v2723_v4  ;;  %6886 = vmatprep.subr.bf16.mxu1 %v7251_v57  ;;  %v2738_v33 = vpack.c.bf16 %v2674_v0, %v2674_v0  ;;  %v7263_v56 = vld [vmem:[#allocation4 + $0x3c0] sm:$0xff]   ;;  %v7267_v2 = vld [vmem:[#allocation6 + $0xf8] sm:$0xff]   ;;  %v4345_v12 = vrot.slane %v7917_v19, 4 }
 0x1d6   : > { %v8089_v51 = vadd.f32 %v4447_v42, %v4446_v45  ;;  %v4473_v6 = vsel %vm4331_vm0, %v2676_v24, 0.0  ;;  %v2677_v48 = vmax.f32 %v2424_v49, 0.0  ;;  %4082 = vmatmul.mubr.bf16.gmra.mxu0 %v2722_v22  ;;  %4145 = vmatprep.mubr.bf16.mxu1 %v2725_v46  ;;  %v2355_v20 = vpop.f32.mrf.mxu0  ;;  %v2426_v59 = vpop.f32.mrf.mxu1  ;;  %v2740_v15 = vpack.c.bf16 %v2676_v24, %v2676_v24  ;;  %v7264_v22 = vld [vmem:[#allocation4 + $0x300] sm:$0xff]  }
 0x1d7   : > { %v8092_v13 = vadd.f32 %v4473_v6, %v4472_v1  ;;  %v2739_v35 = vpack.c.bf16 %v2675_v40, %v2675_v40  ;;  %v4460_v47 = vsel %vm4331_vm0, %v2675_v40, 0.0  ;;  %4146 = vmatmul.mubr.bf16.gmra.mxu1 %v2724_v32  ;;  %6847 = vmatpush3.bf16.msra.mxu0 %v7252_v3  ;;  %v7265_v45 = vld [vmem:[#allocation4 + $0x380] sm:$0xff]   ;;  %v4371_v57 = vrot.slane %v7931_v30, 4 }
 0x1d8   : > { %v8095_v11 = vadd.f32 %v4460_v47, %v4459_v21  ;;  %v2741_v7 = vpack.c.bf16 %v2677_v48, %v2677_v48  ;;  %v4486_v31 = vsel %vm4331_vm0, %v2677_v48, 0.0  ;;  %6887 = vmatpush3.bf16.msra.mxu1 %v7253_v16  ;;  %6848 = vmatprep.subr.bf16.mxu0 %v7254_v37  ;;  %v4358_v32 = vrot.slane %v7935_v50, 4 }
 0x1d9   : > { %v8098_v62 = vadd.f32 %v4486_v31, %v4485_v55  ;;  %4089 = vmatprep.mubr.bf16.mxu0 %v2739_v35  ;;  %6888 = vmatprep.subr.bf16.mxu1 %v7255_v14  ;;  %v4346_v1 = vadd.f32 %v4345_v12, %v7917_v19  ;;  %v4372_v18 = vadd.f32 %v4371_v57, %v7931_v30  ;;  %v4384_v63 = vrot.slane %v7939_v61, 4 }
 0x1da   : > { %4153 = vmatprep.mubr.bf16.mxu1 %v2741_v7  ;;  %v4359_v52 = vadd.f32 %v4358_v32, %v7935_v50  ;;  %v8110_v4 = vrot.slane %v8038_v27, %v660_v34  ;;  %v8115_v0 = vrot.slane %v8038_v27, %v668_v17  ;;  %v8120_v19 = vrot.slane %v8038_v27, %v664_v26  ;;  %v7268_v32 = vld [vmem:[#allocation6 + $0x38] sm:$0xff]  }
 0x1db   : > { %6849 = vmatpush3.bf16.msra.mxu0 %v7256_v60  ;;  %v4347_v30 = vrot.slane %v4346_v1, 2  ;;  %v4373_v50 = vrot.slane %v4372_v18, 2  ;;  %v8125_v36 = vrot.slane %v8038_v27, %v672_v29  ;;  %v8128_v3 = vadd.f32 %v4384_v63, %v7939_v61 }
 0x1dc   : > { %6889 = vmatpush3.bf16.msra.mxu1 %v7257_v38  ;;  %6850 = vmatprep.subr.bf16.mxu0 %v7258_v44  ;;  %v4360_v34 = vrot.slane %v4359_v52, 2  ;;  %v4410_v37 = vrot.slane %v8030_v41, 4  ;;  %v4436_v14 = vrot.slane %v8033_v23, 4 }
 0x1dd   : > { %6890 = vmatprep.subr.bf16.mxu1 %v7259_v25  ;;  %v8133_v10 = vadd.f32 %v4347_v30, %v4346_v1  ;;  %v8135_v16 = vadd.f32 %v4373_v50, %v4372_v18  ;;  %v4386_v61 = vrot.slane %v8128_v3, 2  ;;  %v7269_v30 = vld [vmem:[#allocation6 + $0xb8] sm:$0xff]   ;;  %v7270_v50 = vld [vmem:[#allocation6 + $0x70] sm:$0xff]  }
 0x1de   : > { %4090 = vmatmul.mubr.bf16.gmra.mxu0 %v2738_v33  ;;  %v8142_v58 = vadd.f32 %v4360_v34, %v4359_v52 }
 0x1df   : > { %4154 = vmatmul.mubr.bf16.gmra.mxu1 %v2740_v15  ;;  %6851 = vmatpush3.bf16.msra.mxu0 %v7260_v43 }
 0x1e0   : > { %6891 = vmatpush3.bf16.msra.mxu1 %v7261_v53  ;;  %6852 = vmatprep.subr.bf16.mxu0 %v7262_v9 }
 0x1e1   : > { %6892 = vmatprep.subr.bf16.mxu1 %v7263_v56 }
 0x1e3   : > { %6853 = vmatpush3.bf16.msra.mxu0 %v7264_v22 }
 0x1e4   : > { %6893 = vmatpush3.bf16.msra.mxu1 %v7265_v45  ;;  %6918 = vmatprep.subr.bf16.mxu0 %v7266_v39 }
 0x1e5   : > { %6940 = vmatprep.subr.bf16.mxu1 %v7267_v2 }
 0x1f8   : > { %v2462_v21 = vpop.f32.mrf.mxu0  ;;  %v2533_v8 = vpop.f32.mrf.mxu1 }
 0x1f9   : > { %v2463_v17 = vadd.f32 %v2462_v21, %v8110_v4  ;;  %v2534_v24 = vadd.f32 %v2533_v8, %v8115_v0 }
 0x1fa   : > { %v2464_v46 = vpop.f32.mrf.mxu0  ;;  %v2535_v55 = vpop.f32.mrf.mxu1 }
 0x1fb   : > { %v2465_v26 = vadd.f32 %v2464_v46, %v8120_v19  ;;  %v2536_v54 = vadd.f32 %v2535_v55, %v8125_v36  ;;  %v2582_v6 = vmax.f32 %v2463_v17, 0.0  ;;  %v2584_v47 = vmax.f32 %v2534_v24, 0.0  ;;  %v7271_v24 = vld [vmem:[#allocation6 + $0xf0] sm:$0xff]  }
 0x1fc   : > { %v2466_v49 = vpop.f32.mrf.mxu0  ;;  %v2537_v27 = vpop.f32.mrf.mxu1 }
 0x1fd   : > { %v2467_v29 = vadd.f32 %v2466_v49, %v8110_v4  ;;  %v2538_v42 = vadd.f32 %v2537_v27, %v8115_v0  ;;  %v2583_v59 = vmax.f32 %v2465_v26, 0.0  ;;  %v2585_v38 = vmax.f32 %v2536_v54, 0.0 }
 0x1fe   : > { %v2468_v40 = vpop.f32.mrf.mxu0  ;;  %v2539_v35 = vpop.f32.mrf.mxu1  ;;  %v8159_v27 = vadd.f32 %v4386_v61, %v8128_v3  ;;  %v7273_v61 = vld [vmem:[#allocation6 + $0xb0] sm:$0xff]  }
 0x1ff   : > { %v2598_v48 = vmax.f32 %v2467_v29, 0.0  ;;  %v2469_v20 = vadd.f32 %v2468_v40, %v8120_v19  ;;  %v2600_v60 = vmax.f32 %v2538_v42, 0.0  ;;  %v2540_v7 = vadd.f32 %v2539_v35, %v8125_v36 }
 0x200   : > { %v2472_v31 = vpop.f32.mrf.mxu0  ;;  %v2543_v15 = vpop.f32.mrf.mxu1  ;;  %v4362_v35 = vrot.slane %v8142_v58, 1 }
 0x201   : > { %v4494_v44 = vadd.f32 %v2598_v48, %v2582_v6  ;;  %v2599_v25 = vmax.f32 %v2469_v20, 0.0  ;;  %v2473_v33 = vadd.f32 %v2472_v31, %v8110_v4  ;;  %v2694_v43 = vpack.c.bf16 %v2598_v48, %v2582_v6  ;;  %v7272_v20 = vld [vmem:[#allocation6 + $0x30] sm:$0xff]   ;;  %v7274_v31 = vld [vmem:[#allocation6 + $0x68] sm:$0xff]  }
 0x202   : > { %v4520_v53 = vadd.f32 %v2600_v60, %v2584_v47  ;;  %v2601_v9 = vmax.f32 %v2540_v7, 0.0  ;;  %v8149_v56 = vadd.f32 %v2543_v15, %v8115_v0  ;;  %v2474_v22 = vpop.f32.mrf.mxu0  ;;  %v2545_v57 = vpop.f32.mrf.mxu1  ;;  %v2696_v8 = vpack.c.bf16 %v2600_v60, %v2584_v47 }
 0x203   : > { %v2695_v45 = vpack.c.bf16 %v2599_v25, %v2583_v59  ;;  %v4507_v39 = vadd.f32 %v2599_v25, %v2583_v59  ;;  %v2614_v2 = vmax.f32 %v2473_v33, 0.0  ;;  %v2475_v12 = vadd.f32 %v2474_v22, %v8120_v19 }
 0x204   : > { %v2697_v1 = vpack.c.bf16 %v2601_v9, %v2585_v38  ;;  %v4533_v18 = vadd.f32 %v2601_v9, %v2585_v38  ;;  %v2616_v52 = vmax.f32 %v8149_v56, 0.0  ;;  %v2546_v63 = vadd.f32 %v2545_v57, %v8125_v36  ;;  %v2476_v21 = vpop.f32.mrf.mxu0  ;;  %v2547_v55 = vpop.f32.mrf.mxu1  ;;  %v7276_v57 = vld [vmem:[#allocation6 + $0x28] sm:$0xff]  }
 0x205   : > { %v4495_v34 = vadd.f32 %v4494_v44, %v2614_v2  ;;  %v2615_v46 = vmax.f32 %v2475_v12, 0.0  ;;  %v2477_v17 = vadd.f32 %v2476_v21, %v8110_v4  ;;  %4193 = vmatprep.mubr.bf16.mxu0 %v2695_v45  ;;  %v2548_v54 = vadd.f32 %v2547_v55, %v8115_v0  ;;  %v7277_v21 = vld [vmem:[#allocation6 + $0xa8] sm:$0xff]   ;;  %v7279_v55 = vld [vmem:[#allocation6 + $0xe0] sm:$0xff]  }
 0x206   : > { %v4521_v26 = vadd.f32 %v4520_v53, %v2616_v52  ;;  %v2617_v49 = vmax.f32 %v2546_v63, 0.0  ;;  %4257 = vmatprep.mubr.bf16.mxu1 %v2697_v1  ;;  %v2478_v29 = vpop.f32.mrf.mxu0  ;;  %4194 = vmatmul.mubr.bf16.vlgmr.msra.gmra.mxu0 %v2694_v43  ;;  %v2549_v48 = vpop.f32.mrf.mxu1  ;;  %v8164_v47 = vadd.f32 %v4410_v37, %v8030_v41  ;;  %v8170_v38 = vadd.f32 %v4436_v14, %v8033_v23  ;;  %v7275_v37 = vld [vmem:[#allocation6 + $0xe8] sm:$0xff]  }
 0x207   : > { %v4508_v42 = vadd.f32 %v4507_v39, %v2615_v46  ;;  %v2630_v40 = vmax.f32 %v2477_v17, 0.0  ;;  %v2479_v6 = vadd.f32 %v2478_v29, %v8120_v19  ;;  %4258 = vmatmul.mubr.bf16.vlgmr.msra.gmra.mxu1 %v2696_v8  ;;  %6919 = vmatpush3.bf16.msra.mxu0 %v7268_v32  ;;  %v2632_v60 = vmax.f32 %v2548_v54, 0.0 }
 0x208   : > { %v4534_v59 = vadd.f32 %v4533_v18, %v2617_v49  ;;  %v2550_v7 = vadd.f32 %v2549_v48, %v8125_v36  ;;  %6941 = vmatpush3.bf16.msra.mxu1 %v7269_v30  ;;  %v2482_v3 = vpop.f32.mrf.mxu0  ;;  %6920 = vmatprep.subr.bf16.mxu0 %v7270_v50  ;;  %v2553_v41 = vpop.f32.mrf.mxu1  ;;  %v7278_v30 = vld [vmem:[#allocation6 + $0x60] sm:$0xff]   ;;  %v4388_v56 = vrot.slane %v8159_v27, 1  ;;  %v8191_v48 = vadd.f32 %v4362_v35, %v8142_v58  ;;  %v7283_v58 = vld [vmem:[#allocation6 + $0xd8] sm:$0xff]  }
 0x209   : > { %v4496_v44 = vadd.f32 %v4495_v34, %v2630_v40  ;;  %v2631_v25 = vmax.f32 %v2479_v6, 0.0  ;;  %v8173_v33 = vadd.f32 %v2482_v3, %v8110_v4  ;;  %6942 = vmatprep.subr.bf16.mxu1 %v7271_v24  ;;  %v2710_v15 = vpack.c.bf16 %v2630_v40, %v2614_v2  ;;  %v7280_v6 = vld [vmem:[#allocation6 + $0x20] sm:$0xff]  }
 0x20a   : > { %v4522_v43 = vadd.f32 %v4521_v26, %v2632_v60  ;;  %v2633_v53 = vmax.f32 %v2550_v7, 0.0  ;;  %v8176_v9 = vadd.f32 %v2553_v41, %v8115_v0  ;;  %v2484_v22 = vpop.f32.mrf.mxu0  ;;  %v2555_v12 = vpop.f32.mrf.mxu1  ;;  %v2712_v50 = vpack.c.bf16 %v2632_v60, %v2616_v52 }
 0x20b   : > { %v2711_v45 = vpack.c.bf16 %v2631_v25, %v2615_v46  ;;  %v4509_v39 = vadd.f32 %v4508_v42, %v2631_v25  ;;  %v2646_v23 = vmax.f32 %v8173_v33, 0.0  ;;  %v2485_v14 = vadd.f32 %v2484_v22, %v8120_v19  ;;  %6921 = vmatpush3.bf16.msra.mxu0 %v7272_v20 }
 0x20c   : > { %v2713_v32 = vpack.c.bf16 %v2633_v53, %v2617_v49  ;;  %v4535_v1 = vadd.f32 %v4534_v59, %v2633_v53  ;;  %v2648_v18 = vmax.f32 %v8176_v9, 0.0  ;;  %v2556_v2 = vadd.f32 %v2555_v12, %v8125_v36  ;;  %6943 = vmatpush3.bf16.msra.mxu1 %v7273_v61  ;;  %v2486_v63 = vpop.f32.mrf.mxu0  ;;  %6922 = vmatprep.subr.bf16.mxu0 %v7274_v31  ;;  %v2557_v17 = vpop.f32.mrf.mxu1  ;;  %v7281_v61 = vld [vmem:[#allocation6 + $0xa0] sm:$0xff]   ;;  %v7282_v31 = vld [vmem:[#allocation6 + $0x58] sm:$0xff]  }
 0x20d   : > { %v4497_v8 = vadd.f32 %v4496_v44, %v2646_v23  ;;  %v2647_v34 = vmax.f32 %v2485_v14, 0.0  ;;  %v2487_v46 = vadd.f32 %v2486_v63, %v8110_v4  ;;  %4201 = vmatprep.mubr.bf16.mxu0 %v2711_v45  ;;  %6944 = vmatprep.subr.bf16.mxu1 %v7275_v37  ;;  %v2558_v49 = vadd.f32 %v2557_v17, %v8115_v0  ;;  %v7285_v63 = vld [vmem:[#allocation6 + $0x98] sm:$0xff]  }
 0x20e   : > { %v4523_v24 = vadd.f32 %v4522_v43, %v2648_v18  ;;  %v2649_v26 = vmax.f32 %v2556_v2, 0.0  ;;  %4265 = vmatprep.mubr.bf16.mxu1 %v2713_v32  ;;  %v2488_v54 = vpop.f32.mrf.mxu0  ;;  %4202 = vmatmul.mubr.bf16.gmra.mxu0 %v2710_v15  ;;  %v2559_v40 = vpop.f32.mrf.mxu1  ;;  %v4412_v20 = vrot.slane %v8164_v47, 2  ;;  %v4438_v44 = vrot.slane %v8170_v38, 2  ;;  %v7284_v32 = vld [vmem:[#allocation6 + $0x18] sm:$0xff]  }
 0x20f   : > { %v4510_v52 = vadd.f32 %v4509_v39, %v2647_v34  ;;  %v2662_v29 = vmax.f32 %v2487_v46, 0.0  ;;  %v2489_v42 = vadd.f32 %v2488_v54, %v8120_v19  ;;  %4266 = vmatmul.mubr.bf16.gmra.mxu1 %v2712_v50  ;;  %6923 = vmatpush3.bf16.msra.mxu0 %v7276_v57  ;;  %v2664_v60 = vmax.f32 %v2558_v49, 0.0 }
 0x210   : > { %v4536_v59 = vadd.f32 %v4535_v1, %v2649_v26  ;;  %v2560_v7 = vadd.f32 %v2559_v40, %v8125_v36  ;;  %6945 = vmatpush3.bf16.msra.mxu1 %v7277_v21  ;;  %v2492_v3 = vpop.f32.mrf.mxu0  ;;  %6924 = vmatprep.subr.bf16.mxu0 %v7278_v30  ;;  %v2563_v37 = vpop.f32.mrf.mxu1  ;;  %v7286_v21 = vld [vmem:[#allocation6 + $0x50] sm:$0xff]   ;;  %v4389_v46 = vadd.f32 %v4388_v56, %v8159_v27  ;;  %v4349_v56 = vrot.slane %v8133_v10, 1 }
 0x211   : > { %v4498_v25 = vadd.f32 %v4497_v8, %v2662_v29  ;;  %v2663_v33 = vmax.f32 %v2489_v42, 0.0  ;;  %v2493_v41 = vadd.f32 %v2492_v3, %v8110_v4  ;;  %6946 = vmatprep.subr.bf16.mxu1 %v7279_v55  ;;  %v2726_v35 = vpack.c.bf16 %v2662_v29, %v2646_v23  ;;  %v7288_v27 = vld [vmem:[#allocation6 + $0x10] sm:$0xff]   ;;  %v7290_v42 = vld [vmem:[#allocation6 + $0x48] sm:$0xff]  }
 0x212   : > { %v4524_v15 = vadd.f32 %v4523_v24, %v2664_v60  ;;  %v2665_v43 = vmax.f32 %v2560_v7, 0.0  ;;  %v2564_v53 = vadd.f32 %v2563_v37, %v8115_v0  ;;  %v2494_v22 = vpop.f32.mrf.mxu0  ;;  %v2565_v57 = vpop.f32.mrf.mxu1  ;;  %v2728_v30 = vpack.c.bf16 %v2664_v60, %v2648_v18 }
 0x213   : > { %v2727_v45 = vpack.c.bf16 %v2663_v33, %v2647_v34  ;;  %v8198_v39 = vadd.f32 %v4510_v52, %v2663_v33  ;;  %v8200_v14 = vmax.f32 %v2493_v41, 0.0  ;;  %v2495_v12 = vadd.f32 %v2494_v22, %v8120_v19  ;;  %6925 = vmatpush3.bf16.msra.mxu0 %v7280_v6  ;;  %v7287_v34 = vld [vmem:[#allocation6 + $0xd0] sm:$0xff]   ;;  %v7294_v22 = vld [vmem:[#allocation6 + $0x40] sm:$0xff]  }
 0x214   : > { %v2729_v4 = vpack.c.bf16 %v2665_v43, %v2649_v26  ;;  %v8203_v1 = vadd.f32 %v4536_v59, %v2665_v43  ;;  %v8205_v2 = vmax.f32 %v2564_v53, 0.0  ;;  %v2566_v23 = vadd.f32 %v2565_v57, %v8125_v36  ;;  %6947 = vmatpush3.bf16.msra.mxu1 %v7281_v61  ;;  %v2496_v0 = vpop.f32.mrf.mxu0  ;;  %6926 = vmatprep.subr.bf16.mxu0 %v7282_v31  ;;  %v2567_v8 = vpop.f32.mrf.mxu1 }
 0x215   : > { %v4499_v19 = vsel %vm4331_vm0, %v8200_v14, 0.0  ;;  %v8212_v50 = vmax.f32 %v2495_v12, 0.0  ;;  %4209 = vmatprep.mubr.bf16.mxu0 %v2727_v45  ;;  %6948 = vmatprep.subr.bf16.mxu1 %v7283_v58  ;;  %v4413_v18 = vadd.f32 %v4412_v20, %v8164_v47  ;;  %v4439_v54 = vadd.f32 %v4438_v44, %v8170_v38  ;;  %v7289_v47 = vld [vmem:[#allocation6 + $0x90] sm:$0xff]   ;;  %v7291_v20 = vld [vmem:[#allocation6 + $0xc8] sm:$0xff]   ;;  %v8235_v38 = vld [vmem:[%s8357_s4] ss:$0 sm:$0xff] }
 0x216   : > { %v8215_v36 = vadd.f32 %v4499_v19, %v4498_v25  ;;  %v4525_v17 = vsel %vm4331_vm0, %v8205_v2, 0.0  ;;  %v8219_v55 = vmax.f32 %v2566_v23, 0.0  ;;  %4273 = vmatprep.mubr.bf16.mxu1 %v2729_v4  ;;  %v2497_v9 = vpop.f32.mrf.mxu0  ;;  %4210 = vmatmul.mubr.bf16.gmra.mxu0 %v2726_v35  ;;  %v2568_v49 = vpop.f32.mrf.mxu1  ;;  %v4375_v40 = vrot.slane %v8135_v16, 1  ;;  %v7292_v25 = vld [vmem:[#allocation6 + $0x8] sm:$0xff]   ;;  %v7296_v23 = vld [vmem:[#allocation6] sm:$0xff]   ;;  %v7298_v19 = vld [vmem:[#allocation6 + $0x178] sm:$0xff]  }
 0x217   : > { %v8222_v24 = vadd.f32 %v4525_v17, %v4524_v15  ;;  %v2743_v26 = vpack.c.bf16 %v8212_v50, %v8212_v50  ;;  %4274 = vmatmul.mubr.bf16.gmra.mxu1 %v2728_v30  ;;  %6927 = vmatpush3.bf16.msra.mxu0 %v7284_v32  ;;  %v4547_v59 = vmul.f32 0.020408163, %v8191_v48  ;;  %v4549_v7 = vmul.f32 0.020408163, %v4389_v46  ;;  %v7293_v35 = vld [vmem:[#allocation6 + $0x88] sm:$0xff]   ;;  %v7297_v30 = vld [vmem:[#allocation6 + $0x80] sm:$0xff]  }
 0x218   : > { %v2745_v52 = vpack.c.bf16 %v8219_v55, %v8219_v55  ;;  %6949 = vmatpush3.bf16.msra.mxu1 %v7285_v63  ;;  %v6614_v29 = vpop.f32.mrf.mxu0  ;;  %6928 = vmatprep.subr.bf16.mxu0 %v7286_v21  ;;  %v6654_v6 = vpop.f32.mrf.mxu1  ;;  %v4414_v3 = vrot.slane %v4413_v18, 1  ;;  %v2744_v61 = vpack.c.bf16 %v8205_v2, %v8205_v2  ;;  %v4440_v33 = vrot.slane %v4439_v54, 1  ;;  %v7299_v17 = vld [vmem:[#allocation6 + $0x1f8] sm:$0xff]  }
 0x219   : > { %6950 = vmatprep.subr.bf16.mxu1 %v7287_v34  ;;  %4217 = vmatprep.mubr.bf16.mxu0 %v2743_v26  ;;  %v4350_v41 = vadd.f32 %v4349_v56, %v8133_v10  ;;  %v2742_v48 = vpack.c.bf16 %v8200_v14, %v8200_v14  ;;  %v4376_v15 = vadd.f32 %v4375_v40, %v8135_v16  ;;  %v7295_v10 = vld [vmem:[#allocation6 + $0xc0] sm:$0xff]  }
 0x21a   : > { %v6615_v60 = vpop.f32.mrf.mxu0  ;;  %4281 = vmatprep.mubr.bf16.mxu1 %v2745_v52  ;;  %v6655_v44 = vpop.f32.mrf.mxu1  ;;  %v4563_v12 = vpack.c.bf16 %v4547_v59, %v4547_v59  ;;  %v4565_v57 = vpack.c.bf16 %v4549_v7, %v4549_v7  ;;  %v4415_v32 = vadd.f32 %v4414_v3, %v4413_v18  ;;  %v4441_v0 = vadd.f32 %v4440_v33, %v4439_v54  ;;  %v7300_v54 = vld [vmem:[#allocation6 + $0x138] sm:$0xff]   ;;  %v7302_v59 = vld [vmem:[#allocation6 + $0x170] sm:$0xff]  }
 0x21b   : > { %v6616_v31 = vadd.f32 %v6615_v60, %v6614_v29  ;;  %6929 = vmatpush3.bf16.msra.mxu0 %v7288_v27  ;;  %v6656_v37 = vadd.f32 %v6655_v44, %v6654_v6  ;;  %v4546_v16 = vmul.f32 0.020408163, %v4350_v41  ;;  %v4548_v8 = vmul.f32 0.020408163, %v4376_v15  ;;  %v7303_v3 = vld [vmem:[#allocation6 + $0x1f0] sm:$0xff]  }
 0x21c   : > { %6951 = vmatpush3.bf16.msra.mxu1 %v7289_v47  ;;  %v6617_v58 = vpop.f32.mrf.mxu0  ;;  %6930 = vmatprep.subr.bf16.mxu0 %v7290_v42  ;;  %v6657_v53 = vpop.f32.mrf.mxu1  ;;  %v4551_v18 = vmul.f32 0.020408163, %v4415_v32  ;;  %v4553_v56 = vmul.f32 0.020408163, %v4441_v0  ;;  %v7301_v42 = vld [vmem:[#allocation6 + $0x1b8] sm:$0xff]   ;;  %v7304_v33 = vld [vmem:[#allocation6 + $0x130] sm:$0xff]  }
 0x21d   : > { %v3812_v43 = vadd.f32 %v6616_v31, %v8235_v38  ;;  %6952 = vmatprep.subr.bf16.mxu1 %v7291_v20  ;;  %v4562_v52 = vpack.c.bf16 %v4546_v16, %v4546_v16  ;;  %v4564_v40 = vpack.c.bf16 %v4548_v8, %v4548_v8  ;;  %v4397_v41 = vrot.slane %v8024_v28, 4 }
 0x21e   : > { %v6618_v45 = vpop.f32.mrf.mxu0  ;;  %4218 = vmatmul.mubr.bf16.gmra.mxu0 %v2742_v48  ;;  %v6658_v2 = vpop.f32.mrf.mxu1  ;;  %v4567_v60 = vpack.c.bf16 %v4551_v18, %v4551_v18  ;;  %v4569_v31 = vpack.c.bf16 %v4553_v56, %v4553_v56  ;;  %v4423_v15 = vrot.slane %v8027_v5, 4 }
 0x21f   : > { %v8244_v4 = vadd.f32 %v6656_v37, %v3812_v43  ;;  %v6619_v14 = vadd.f32 %v6618_v45, %v6617_v58  ;;  %4282 = vmatmul.mubr.bf16.gmra.mxu1 %v2744_v61  ;;  %6931 = vmatpush3.bf16.msra.mxu0 %v7292_v25  ;;  %v6659_v63 = vadd.f32 %v6658_v2, %v6657_v53  ;;  %v7305_v58 = vld [vmem:[#allocation6 + $0x1b0] sm:$0xff]   ;;  %v4462_v45 = vrot.slane %v8095_v11, 4  ;;  %v7308_v2 = vld [vmem:[#allocation6 + $0x128] sm:$0xff]  }
 0x220   : > { %6953 = vmatpush3.bf16.msra.mxu1 %v7293_v35  ;;  %5635 = vmatprep.mubr.bf16.mxu0 %v4563_v12  ;;  %v6620_v21 = vpop.f32.mrf.mxu0  ;;  %v6660_v46 = vpop.f32.mrf.mxu1  ;;  %v7306_v35 = vld [vmem:[#allocation6 + $0x168] sm:$0xff]  }
 0x221   : > { %v3815_v34 = vadd.f32 %v6619_v14, %v8235_v38  ;;  %5675 = vmatprep.mubr.bf16.mxu1 %v4565_v57  ;;  %6932 = vmatprep.subr.bf16.mxu0 %v7294_v22  ;;  %v7307_v22 = vld [vmem:[#allocation6 + $0x1e8] sm:$0xff]   ;;  %v4488_v57 = vrot.slane %v8098_v62, 4 }
 0x222   : > { %6954 = vmatprep.subr.bf16.mxu1 %v7295_v10  ;;  %v6621_v9 = vpop.f32.mrf.mxu0  ;;  %v6661_v27 = vpop.f32.mrf.mxu1 }
 0x223   : > { %v8247_v26 = vadd.f32 %v6659_v63, %v3815_v34  ;;  %6933 = vmatpush3.bf16.msra.mxu0 %v7296_v23  ;;  %v6622_v49 = vadd.f32 %v6621_v9, %v6620_v21  ;;  %v6662_v47 = vadd.f32 %v6661_v27, %v6660_v46  ;;  %v4398_v23 = vadd.f32 %v4397_v41, %v8024_v28  ;;  %v7309_v63 = vld [vmem:[#allocation6 + $0x1a8] sm:$0xff]   ;;  %v7310_v21 = vld [vmem:[#allocation6 + $0x160] sm:$0xff]   ;;  %v7318_v41 = vld [vmem:[#allocation6 + $0x150] sm:$0xff]  }
 0x224   : > { %6955 = vmatpush3.bf16.msra.mxu1 %v7297_v30  ;;  %6962 = vmatprep.subr.bf16.mxu0 %v7298_v19  ;;  %v6623_v29 = vpop.f32.mrf.mxu0  ;;  %v6663_v20 = vpop.f32.mrf.mxu1  ;;  %v4424_v30 = vadd.f32 %v4423_v15, %v8027_v5  ;;  %v7311_v34 = vld [vmem:[#allocation6 + $0x1e0] sm:$0xff]   ;;  %v4463_v46 = vadd.f32 %v4462_v45, %v8095_v11  ;;  %v4489_v9 = vadd.f32 %v4488_v57, %v8098_v62  ;;  %v7320_v45 = vld [vmem:[#allocation6 + $0x110] sm:$0xff]  }
 0x225   : > { %v3820_v6 = vadd.f32 %v6622_v49, %v8235_v38  ;;  %6984 = vmatprep.subr.bf16.mxu1 %v7299_v17  ;;  %v7312_v27 = vld [vmem:[#allocation6 + $0x120] sm:$0xff]  }
 0x226   : > { %5636 = vmatmul.mubr.bf16.vlgmr.msra.gmra.mxu0 %v4562_v52  ;;  %v6624_v7 = vpop.f32.mrf.mxu0  ;;  %v6664_v25 = vpop.f32.mrf.mxu1  ;;  %v7313_v52 = vld [vmem:[#allocation6 + $0x1a0] sm:$0xff]   ;;  %v4464_v62 = vrot.slane %v4463_v46, 2 }
 0x227   : > { %v8250_v61 = vadd.f32 %v6662_v47, %v3820_v6  ;;  %5676 = vmatmul.mubr.bf16.vlgmr.msra.gmra.mxu1 %v4564_v40  ;;  %6963 = vmatpush3.bf16.msra.mxu0 %v7300_v54  ;;  %v6625_v44 = vadd.f32 %v6624_v7, %v6623_v29  ;;  %v6665_v37 = vadd.f32 %v6664_v25, %v6663_v20  ;;  %v4399_v54 = vrot.slane %v4398_v23, 2  ;;  %v7314_v29 = vld [vmem:[#allocation6 + $0x158] sm:$0xff]  }
 0x228   : > { %6985 = vmatpush3.bf16.msra.mxu1 %v7301_v42  ;;  %5715 = vmatprep.mubr.bf16.mxu0 %v4567_v60  ;;  %v6626_v48 = vpop.f32.mrf.mxu0  ;;  %v6666_v53 = vpop.f32.mrf.mxu1  ;;  %v4425_v47 = vrot.slane %v4424_v30, 2  ;;  %v7315_v40 = vld [vmem:[#allocation6 + $0x1d8] sm:$0xff]   ;;  %v4490_v20 = vrot.slane %v4489_v9, 2 }
 0x229   : > { %5755 = vmatprep.mubr.bf16.mxu1 %v4569_v31  ;;  %v3823_v43 = vadd.f32 %v6625_v44, %v8235_v38  ;;  %6964 = vmatprep.subr.bf16.mxu0 %v7302_v59  ;;  %v4400_v31 = vadd.f32 %v4399_v54, %v4398_v23  ;;  %v7323_v23 = vld [vmem:[#allocation6 + $0x1c8] sm:$0xff]   ;;  %v7331_v54 = vld [vmem:[#allocation6 + $0x2f8] sm:$0xff]  }
 0x22a   : > { %6986 = vmatprep.subr.bf16.mxu1 %v7303_v3  ;;  %v6627_v12 = vpop.f32.mrf.mxu0  ;;  %v6667_v14 = vpop.f32.mrf.mxu1  ;;  %v7316_v3 = vld [vmem:[#allocation6 + $0x118] sm:$0xff]  }
 0x22b   : > { %v8257_v10 = vadd.f32 %v6665_v37, %v3823_v43  ;;  %6965 = vmatpush3.bf16.msra.mxu0 %v7304_v33  ;;  %v6628_v32 = vadd.f32 %v6627_v12, %v6626_v48  ;;  %v6668_v16 = vadd.f32 %v6667_v14, %v6666_v53  ;;  %v7317_v33 = vld [vmem:[#allocation6 + $0x198] sm:$0xff]   ;;  %v4426_v48 = vadd.f32 %v4425_v47, %v4424_v30  ;;  %v7322_v14 = vld [vmem:[#allocation6 + $0x148] sm:$0xff]   ;;  %v7326_v30 = vld [vmem:[#allocation6 + $0x140] sm:$0xff]  }
 0x22c   : > { %6987 = vmatpush3.bf16.msra.mxu1 %v7305_v58  ;;  %6966 = vmatprep.subr.bf16.mxu0 %v7306_v35  ;;  %v6629_v0 = vpop.f32.mrf.mxu0  ;;  %v6669_v8 = vpop.f32.mrf.mxu1  ;;  %v7319_v35 = vld [vmem:[#allocation6 + $0x1d0] sm:$0xff]   ;;  %v4465_v43 = vadd.f32 %v4464_v62, %v4463_v46  ;;  %v4491_v12 = vadd.f32 %v4490_v20, %v4489_v9  ;;  %v4401_v57 = vrot.slane %v4400_v31, 1  ;;  %v7328_v46 = vld [vmem:[#allocation6 + $0x100] sm:$0xff]  }
 0x22d   : > { %v3828_v19 = vadd.f32 %v6628_v32, %v8235_v38  ;;  %6988 = vmatprep.subr.bf16.mxu1 %v7307_v22  ;;  %v7321_v32 = vld [vmem:[#allocation6 + $0x190] sm:$0xff]  }
 0x22e   : > { %v6630_v17 = vpop.f32.mrf.mxu0  ;;  %v6670_v49 = vpop.f32.mrf.mxu1  ;;  %v7334_v62 = vld [vmem:[#allocation6 + $0x270] sm:$0xff]  }
 0x22f   : > { %v8264_v18 = vadd.f32 %v6668_v16, %v3828_v19  ;;  %6967 = vmatpush3.bf16.msra.mxu0 %v7308_v2  ;;  %v6631_v28 = vadd.f32 %v6630_v17, %v6629_v0  ;;  %v6671_v56 = vadd.f32 %v6670_v49, %v6669_v8  ;;  %v4427_v2 = vrot.slane %v4426_v48, 1  ;;  %v7324_v0 = vld [vmem:[#allocation6 + $0x108] sm:$0xff]   ;;  %v7327_v8 = vld [vmem:[#allocation6 + $0x1c0] sm:$0xff]   ;;  %v7330_v49 = vld [vmem:[#allocation6 + $0x278] sm:$0xff]  }
 0x230   : > { %6989 = vmatpush3.bf16.msra.mxu1 %v7309_v63  ;;  %6968 = vmatprep.subr.bf16.mxu0 %v7310_v21  ;;  %v6632_v5 = vpop.f32.mrf.mxu0  ;;  %v6672_v11 = vpop.f32.mrf.mxu1  ;;  %v4492_v16 = vrot.slane %v4491_v12, 1  ;;  %v4402_v63 = vadd.f32 %v4401_v57, %v4400_v31  ;;  %v7325_v21 = vld [vmem:[#allocation6 + $0x188] sm:$0xff]  }
 0x231   : > { %v3831_v42 = vadd.f32 %v6631_v28, %v8235_v38  ;;  %6990 = vmatprep.subr.bf16.mxu1 %v7311_v34  ;;  %v4428_v19 = vadd.f32 %v4427_v2, %v4426_v48  ;;  %v7329_v28 = vld [vmem:[#allocation6 + $0x180] sm:$0xff]  }
 0x232   : > { %v6633_v6 = vpop.f32.mrf.mxu0  ;;  %v6673_v7 = vpop.f32.mrf.mxu1  ;;  %v4493_v17 = vadd.f32 %v4492_v16, %v4491_v12  ;;  %v4550_v9 = vmul.f32 0.020408163, %v4402_v63  ;;  %v7340_v12 = vld [vmem:[#allocation6 + $0x228] sm:$0xff]   ;;  %v7342_v2 = vld [vmem:[#allocation6 + $0x260] sm:$0xff]  }
 0x233   : > { %v8267_v59 = vadd.f32 %v6671_v56, %v3831_v42  ;;  %6969 = vmatpush3.bf16.msra.mxu0 %v7312_v27  ;;  %v6634_v60 = vadd.f32 %v6633_v6, %v6632_v5  ;;  %v6674_v25 = vadd.f32 %v6673_v7, %v6672_v11  ;;  %v4552_v27 = vmul.f32 0.020408163, %v4428_v19  ;;  %v7333_v11 = vld [vmem:[#allocation6 + $0x2b8] sm:$0xff]   ;;  %v7335_v7 = vld [vmem:[#allocation6 + $0x2f0] sm:$0xff]   ;;  %v7343_v63 = vld [vmem:[#allocation6 + $0x2e0] sm:$0xff]  }
 0x234   : > { %6991 = vmatpush3.bf16.msra.mxu1 %v7313_v52  ;;  %6970 = vmatprep.subr.bf16.mxu0 %v7314_v29  ;;  %v6635_v44 = vpop.f32.mrf.mxu0  ;;  %v6675_v58 = vpop.f32.mrf.mxu1  ;;  %v4512_v56 = vsel %vm4331_vm0, %v8212_v50, 0.0  ;;  %v7332_v52 = vld [vmem:[#allocation6 + $0x238] sm:$0xff]   ;;  %v4557_v29 = vmul.f32 0.020408163, %v4493_v17  ;;  %v4566_v47 = vpack.c.bf16 %v4550_v9, %v4550_v9  ;;  %v4538_v42 = vsel %vm4331_vm0, %v8219_v55, 0.0 }
 0x235   : > { %v3836_v37 = vadd.f32 %v6634_v60, %v8235_v38  ;;  %6992 = vmatprep.subr.bf16.mxu1 %v7315_v40  ;;  %v4466_v38 = vrot.slane %v4465_v43, 1  ;;  %v4568_v40 = vpack.c.bf16 %v4552_v27, %v4552_v27  ;;  %v4513_v6 = vadd.f32 %v4512_v56, %v8198_v39  ;;  %v7336_v44 = vld [vmem:[#allocation6 + $0x230] sm:$0xff]   ;;  %v7339_v58 = vld [vmem:[#allocation6 + $0x2e8] sm:$0xff]   ;;  %v7346_v9 = vld [vmem:[#allocation6 + $0x258] sm:$0xff]  }
 0x236   : > { %v6636_v15 = vpop.f32.mrf.mxu0  ;;  %v6676_v22 = vpop.f32.mrf.mxu1  ;;  %v4539_v50 = vadd.f32 %v4538_v42, %v8203_v1  ;;  %v4573_v31 = vpack.c.bf16 %v4557_v29, %v4557_v29  ;;  %v4449_v55 = vrot.slane %v8089_v51, 4  ;;  %v4475_v39 = vrot.slane %v8092_v13, 4 }
 0x237   : > { %v8270_v53 = vadd.f32 %v6674_v25, %v3836_v37  ;;  %6971 = vmatpush3.bf16.msra.mxu0 %v7316_v3  ;;  %v4467_v34 = vadd.f32 %v4466_v38, %v4465_v43  ;;  %v4514_v1 = vrot.slane %v4513_v6, 4 }
 0x238   : > { %6993 = vmatpush3.bf16.msra.mxu1 %v7317_v33  ;;  %6972 = vmatprep.subr.bf16.mxu0 %v7318_v41  ;;  %v7337_v33 = vld [vmem:[#allocation6 + $0x2b0] sm:$0xff]   ;;  %v7338_v41 = vld [vmem:[#allocation6 + $0x268] sm:$0xff]   ;;  %v4540_v43 = vrot.slane %v4539_v50, 4  ;;  %v4450_v57 = vadd.f32 %v4449_v55, %v8089_v51 }
 0x239   : > { %6994 = vmatprep.subr.bf16.mxu1 %v7319_v35  ;;  %v4555_v5 = vmul.f32 0.020408163, %v4467_v34  ;;  %v7344_v34 = vld [vmem:[#allocation6 + $0x220] sm:$0xff]  }
 0x23a   : > { %v4541_v19 = vadd.f32 %v4540_v43, %v4539_v50 }
 0x23b   : > { %6973 = vmatpush3.bf16.msra.mxu0 %v7320_v45  ;;  %v4571_v60 = vpack.c.bf16 %v4555_v5, %v4555_v5  ;;  %v7347_v5 = vld [vmem:[#allocation6 + $0x2d8] sm:$0xff]  }
 0x23c   : > { %6995 = vmatpush3.bf16.msra.mxu1 %v7321_v32  ;;  %6974 = vmatprep.subr.bf16.mxu0 %v7322_v14  ;;  %v7341_v14 = vld [vmem:[#allocation6 + $0x2a8] sm:$0xff]  }
 0x23d   : > { %6996 = vmatprep.subr.bf16.mxu1 %v7323_v23  ;;  %v4476_v23 = vadd.f32 %v4475_v39, %v8092_v13  ;;  %v7345_v13 = vld [vmem:[#allocation6 + $0x2a0] sm:$0xff]  }
 0x23f   : > { %6975 = vmatpush3.bf16.msra.mxu0 %v7324_v0 }
 0x240   : > { %6997 = vmatpush3.bf16.msra.mxu1 %v7325_v21  ;;  %6976 = vmatprep.subr.bf16.mxu0 %v7326_v30  ;;  %v4515_v21 = vadd.f32 %v4514_v1, %v4513_v6  ;;  %v7349_v6 = vld [vmem:[#allocation6 + $0x298] sm:$0xff]   ;;  %v7354_v1 = vld [vmem:[#allocation6 + $0x248] sm:$0xff]  }
 0x241   : > { %6998 = vmatprep.subr.bf16.mxu1 %v7327_v8 }
 0x242   : > { %v4516_v56 = vrot.slane %v4515_v21, 2 }
 0x243   : > { %6977 = vmatpush3.bf16.msra.mxu0 %v7328_v46  ;;  %v4451_v46 = vrot.slane %v4450_v57, 2 }
 0x244   : > { %6999 = vmatpush3.bf16.msra.mxu1 %v7329_v28  ;;  %7006 = vmatprep.subr.bf16.mxu0 %v7330_v49  ;;  %v4477_v28 = vrot.slane %v4476_v23, 2 }
 0x245   : > { %7028 = vmatprep.subr.bf16.mxu1 %v7331_v54 }
 0x246   : > { %5716 = vmatmul.mubr.bf16.vlgmr.msra.gmra.mxu0 %v4566_v47  ;;  %v6694_v20 = vpop.f32.mrf.mxu0 }
 0x247   : > { %5756 = vmatmul.mubr.bf16.vlgmr.msra.gmra.mxu1 %v4568_v40  ;;  %v6734_v3 = vpop.f32.mrf.mxu1  ;;  %7007 = vmatpush3.bf16.msra.mxu0 %v7332_v52  ;;  %v4452_v40 = vadd.f32 %v4451_v46, %v4450_v57 }
 0x248   : > { %5795 = vmatprep.mubr.bf16.mxu0 %v4571_v60  ;;  %7029 = vmatpush3.bf16.msra.mxu1 %v7333_v11  ;;  %v6695_v25 = vpop.f32.mrf.mxu0  ;;  %v7348_v11 = vld [vmem:[#allocation6 + $0x218] sm:$0xff]   ;;  %v4478_v60 = vadd.f32 %v4477_v28, %v4476_v23 }
 0x249   : > { %5835 = vmatprep.mubr.bf16.mxu1 %v4573_v31  ;;  %v6696_v48 = vadd.f32 %v6695_v25, %v6694_v20  ;;  %v6735_v37 = vpop.f32.mrf.mxu1  ;;  %7008 = vmatprep.subr.bf16.mxu0 %v7334_v62  ;;  %v7350_v20 = vld [vmem:[#allocation6 + $0x250] sm:$0xff]   ;;  %v4517_v25 = vadd.f32 %v4516_v56, %v4515_v21  ;;  %v7358_v21 = vld [vmem:[#allocation6 + $0x240] sm:$0xff]   ;;  %v7362_v56 = vld [vmem:[#allocation6 + $0x378] sm:$0xff]  }
 0x24a   : > { %v6736_v35 = vadd.f32 %v6735_v37, %v6734_v3  ;;  %7030 = vmatprep.subr.bf16.mxu1 %v7335_v7  ;;  %v6697_v15 = vpop.f32.mrf.mxu0  ;;  %v7351_v31 = vld [vmem:[#allocation6 + $0x2d0] sm:$0xff]  }
 0x24b   : > { %v3940_v22 = vadd.f32 %v6696_v48, %v8244_v4  ;;  %v6737_v45 = vpop.f32.mrf.mxu1  ;;  %7009 = vmatpush3.bf16.msra.mxu0 %v7336_v44  ;;  %v4453_v48 = vrot.slane %v4452_v40, 1 }
 0x24c   : > { %7031 = vmatpush3.bf16.msra.mxu1 %v7337_v33  ;;  %v6698_v32 = vpop.f32.mrf.mxu0  ;;  %7010 = vmatprep.subr.bf16.mxu0 %v7338_v41  ;;  %v7352_v41 = vld [vmem:[#allocation6 + $0x210] sm:$0xff]  }
 0x24d   : > { %v8283_v38 = vadd.f32 %v6736_v35, %v3940_v22  ;;  %v6699_v0 = vadd.f32 %v6698_v32, %v6697_v15  ;;  %v6738_v16 = vpop.f32.mrf.mxu1  ;;  %7032 = vmatprep.subr.bf16.mxu1 %v7339_v58  ;;  %v7353_v58 = vld [vmem:[#allocation6 + $0x290] sm:$0xff]   ;;  %v4479_v35 = vrot.slane %v4478_v60, 1 }
 0x24e   : > { %v6739_v4 = vadd.f32 %v6738_v16, %v6737_v45  ;;  %v6700_v30 = vpop.f32.mrf.mxu0  ;;  %v7355_v45 = vld [vmem:[#allocation6 + $0x2c8] sm:$0xff]  }
 0x24f   : > { %v3943_v8 = vadd.f32 %v6699_v0, %v8247_v26  ;;  %7011 = vmatpush3.bf16.msra.mxu0 %v7340_v12  ;;  %v6740_v51 = vpop.f32.mrf.mxu1  ;;  %v4542_v26 = vrot.slane %v4541_v19, 2  ;;  %v4454_v0 = vadd.f32 %v4453_v48, %v4452_v40  ;;  %v4501_v48 = vrot.slane %v8215_v36, 4 }
 0x250   : > { %7033 = vmatpush3.bf16.msra.mxu1 %v7341_v14  ;;  %v6701_v17 = vpop.f32.mrf.mxu0  ;;  %7012 = vmatprep.subr.bf16.mxu0 %v7342_v2  ;;  %v7356_v2 = vld [vmem:[#allocation6 + $0x208] sm:$0xff]  }
 0x251   : > { %v8286_v49 = vadd.f32 %v6739_v4, %v3943_v8  ;;  %v6702_v27 = vadd.f32 %v6701_v17, %v6700_v30  ;;  %7034 = vmatprep.subr.bf16.mxu1 %v7343_v63  ;;  %v6741_v54 = vpop.f32.mrf.mxu1  ;;  %v4543_v39 = vadd.f32 %v4542_v26, %v4541_v19  ;;  %v7357_v63 = vld [vmem:[#allocation6 + $0x288] sm:$0xff]   ;;  %v4480_v4 = vadd.f32 %v4479_v35, %v4478_v60 }
 0x252   : > { %v6703_v52 = vpop.f32.mrf.mxu0  ;;  %v6742_v29 = vadd.f32 %v6741_v54, %v6740_v51  ;;  %v7359_v51 = vld [vmem:[#allocation6 + $0x2c0] sm:$0xff]   ;;  %v7371_v35 = vld [vmem:[#allocation6 + $0x3e8] sm:$0xff]  }
 0x253   : > { %v3948_v47 = vadd.f32 %v6702_v27, %v8250_v61  ;;  %7013 = vmatpush3.bf16.msra.mxu0 %v7344_v34  ;;  %v6743_v42 = vpop.f32.mrf.mxu1  ;;  %v4544_v23 = vrot.slane %v4543_v39, 1  ;;  %v4554_v27 = vmul.f32 0.020408163, %v4454_v0 }
 0x254   : > { %7035 = vmatpush3.bf16.msra.mxu1 %v7345_v13  ;;  %v6704_v62 = vpop.f32.mrf.mxu0  ;;  %7014 = vmatprep.subr.bf16.mxu0 %v7346_v9  ;;  %v7360_v9 = vld [vmem:[#allocation6 + $0x200] sm:$0xff]  }
 0x255   : > { %v8289_v7 = vadd.f32 %v6742_v29, %v3948_v47  ;;  %v6705_v50 = vadd.f32 %v6704_v62, %v6703_v52  ;;  %7036 = vmatprep.subr.bf16.mxu1 %v7347_v5  ;;  %v6744_v3 = vpop.f32.mrf.mxu1  ;;  %v4545_v28 = vadd.f32 %v4544_v23, %v4543_v39  ;;  %v7361_v5 = vld [vmem:[#allocation6 + $0x280] sm:$0xff]   ;;  %v4556_v52 = vmul.f32 0.020408163, %v4480_v4  ;;  %v7368_v39 = vld [vmem:[#allocation6 + $0x330] sm:$0xff]   ;;  %v7378_v23 = vld [vmem:[#allocation6 + $0x358] sm:$0xff]  }
 0x256   : > { %v6706_v44 = vpop.f32.mrf.mxu0  ;;  %v6745_v55 = vadd.f32 %v6744_v3, %v6743_v42  ;;  %v7363_v42 = vld [vmem:[#allocation6 + $0x3f8] sm:$0xff]   ;;  %v7382_v4 = vld [vmem:[#allocation6 + $0x350] sm:$0xff]  }
 0x257   : > { %v3951_v61 = vadd.f32 %v6705_v50, %v8257_v10  ;;  %7015 = vmatpush3.bf16.msra.mxu0 %v7348_v11  ;;  %v6746_v33 = vpop.f32.mrf.mxu1  ;;  %v4518_v10 = vrot.slane %v4517_v25, 1  ;;  %v4570_v50 = vpack.c.bf16 %v4554_v27, %v4554_v27  ;;  %v7365_v3 = vld [vmem:[#allocation6 + $0x3b8] sm:$0xff]   ;;  %v7390_v27 = vld [vmem:[#allocation6 + $0x340] sm:$0xff]  }
 0x258   : > { %7037 = vmatpush3.bf16.msra.mxu1 %v7349_v6  ;;  %v6707_v37 = vpop.f32.mrf.mxu0  ;;  %7016 = vmatprep.subr.bf16.mxu0 %v7350_v20  ;;  %v7364_v6 = vld [vmem:[#allocation6 + $0x338] sm:$0xff]   ;;  %v4561_v20 = vmul.f32 0.020408163, %v4545_v28  ;;  %v7389_v28 = vld [vmem:[#allocation6 + $0x388] sm:$0xff]  }
 0x259   : > { %v8292_v15 = vadd.f32 %v6745_v55, %v3951_v61  ;;  %v6708_v43 = vadd.f32 %v6707_v37, %v6706_v44  ;;  %7038 = vmatprep.subr.bf16.mxu1 %v7351_v31  ;;  %v6747_v22 = vpop.f32.mrf.mxu1  ;;  %v4572_v44 = vpack.c.bf16 %v4556_v52, %v4556_v52  ;;  %v7369_v37 = vld [vmem:[#allocation6 + $0x3b0] sm:$0xff]  }
 0x25a   : > { %v6709_v12 = vpop.f32.mrf.mxu0  ;;  %v6748_v57 = vadd.f32 %v6747_v22, %v6746_v33  ;;  %v4502_v22 = vadd.f32 %v4501_v48, %v8215_v36  ;;  %v7380_v36 = vld [vmem:[#allocation6 + $0x318] sm:$0xff]  }
 0x25b   : > { %v3956_v32 = vadd.f32 %v6708_v43, %v8264_v18  ;;  %7017 = vmatpush3.bf16.msra.mxu0 %v7352_v41  ;;  %v6749_v14 = vpop.f32.mrf.mxu1  ;;  %v4519_v18 = vadd.f32 %v4518_v10, %v4517_v25  ;;  %v7366_v25 = vld [vmem:[#allocation6 + $0x370] sm:$0xff]   ;;  %v7372_v43 = vld [vmem:[#allocation6 + $0x328] sm:$0xff]   ;;  %v7375_v10 = vld [vmem:[#allocation6 + $0x3e0] sm:$0xff]  }
 0x25c   : > { %7039 = vmatpush3.bf16.msra.mxu1 %v7353_v58  ;;  %v6710_v16 = vpop.f32.mrf.mxu0  ;;  %7018 = vmatprep.subr.bf16.mxu0 %v7354_v1  ;;  %v7367_v41 = vld [vmem:[#allocation6 + $0x3f0] sm:$0xff]   ;;  %v7370_v58 = vld [vmem:[#allocation6 + $0x368] sm:$0xff]   ;;  %v4527_v1 = vrot.slane %v8222_v24, 4 }
 0x25d   : > { %v8295_v30 = vadd.f32 %v6748_v57, %v3956_v32  ;;  %v6711_v19 = vadd.f32 %v6710_v16, %v6709_v12  ;;  %7040 = vmatprep.subr.bf16.mxu1 %v7355_v45  ;;  %v6750_v8 = vpop.f32.mrf.mxu1  ;;  %v4559_v40 = vmul.f32 0.020408163, %v4519_v18  ;;  %v7373_v45 = vld [vmem:[#allocation6 + $0x3a8] sm:$0xff]   ;;  %v7374_v12 = vld [vmem:[#allocation6 + $0x360] sm:$0xff]   ;;  %v7379_v16 = vld [vmem:[#allocation6 + $0x3d8] sm:$0xff]  }
 0x25e   : > { %v6712_v34 = vpop.f32.mrf.mxu0  ;;  %v6751_v46 = vadd.f32 %v6750_v8, %v6749_v14  ;;  %v4528_v57 = vadd.f32 %v4527_v1, %v8222_v24  ;;  %v7376_v32 = vld [vmem:[#allocation6 + $0x320] sm:$0xff]   ;;  %v4503_v14 = vrot.slane %v4502_v22, 2  ;;  %v7384_v8 = vld [vmem:[#allocation6 + $0x310] sm:$0xff]  }
 0x25f   : > { %v3959_v17 = vadd.f32 %v6711_v19, %v8267_v59  ;;  %7019 = vmatpush3.bf16.msra.mxu0 %v7356_v2  ;;  %v6752_v13 = vpop.f32.mrf.mxu1  ;;  %v4575_v33 = vpack.c.bf16 %v4559_v40, %v4559_v40  ;;  %v7377_v2 = vld [vmem:[#allocation6 + $0x3a0] sm:$0xff]   ;;  %v7383_v19 = vld [vmem:[#allocation6 + $0x3d0] sm:$0xff]  }
 0x260   : > { %7041 = vmatpush3.bf16.msra.mxu1 %v7357_v63  ;;  %v6713_v54 = vpop.f32.mrf.mxu0  ;;  %7020 = vmatprep.subr.bf16.mxu0 %v7358_v21  ;;  %v4529_v0 = vrot.slane %v4528_v57, 2  ;;  %v4504_v63 = vadd.f32 %v4503_v14, %v4502_v22  ;;  %v7381_v21 = vld [vmem:[#allocation6 + $0x398] sm:$0xff]  }
 0x261   : > { %v8298_v29 = vadd.f32 %v6751_v46, %v3959_v17  ;;  %v6714_v26 = vadd.f32 %v6713_v54, %v6712_v34  ;;  %7042 = vmatprep.subr.bf16.mxu1 %v7359_v51  ;;  %v6753_v47 = vpop.f32.mrf.mxu1  ;;  %v7385_v34 = vld [vmem:[#allocation6 + $0x390] sm:$0xff]   ;;  %v7386_v46 = vld [vmem:[#allocation6 + $0x348] sm:$0xff]  }
 0x262   : > { %v6754_v11 = vadd.f32 %v6753_v47, %v6752_v13  ;;  %v6715_v59 = vpop.f32.mrf.mxu0  ;;  %v4530_v24 = vadd.f32 %v4529_v0, %v4528_v57  ;;  %v4505_v51 = vrot.slane %v4504_v63, 1  ;;  %v7387_v17 = vld [vmem:[#allocation6 + $0x3c8] sm:$0xff]  }
 0x263   : > { %v3964_v62 = vadd.f32 %v6714_v26, %v8270_v53  ;;  %7021 = vmatpush3.bf16.msra.mxu0 %v7360_v9  ;;  %v6755_v60 = vpop.f32.mrf.mxu1  ;;  %v4577_v53 = vpack.c.bf16 %v4561_v20, %v4561_v20  ;;  %v7388_v13 = vld [vmem:[#allocation6 + $0x308] sm:$0xff]   ;;  %v7393_v26 = vld [vmem:[#allocation6 + $0x380] sm:$0xff]  }
 0x264   : > { %7043 = vmatpush3.bf16.msra.mxu1 %v7361_v5  ;;  %7050 = vmatprep.subr.bf16.mxu0 %v7362_v56  ;;  %v6716_v31 = vpop.f32.mrf.mxu0  ;;  %v4531_v18 = vrot.slane %v4530_v24, 1  ;;  %v4506_v9 = vadd.f32 %v4505_v51, %v4504_v63  ;;  %v7391_v5 = vld [vmem:[#allocation6 + $0x3c0] sm:$0xff]  }
 0x265   : > { %v8301_v55 = vadd.f32 %v6754_v11, %v3964_v62  ;;  %7072 = vmatprep.subr.bf16.mxu1 %v7363_v42  ;;  %v6756_v61 = vpop.f32.mrf.mxu1  ;;  %v7392_v56 = vld [vmem:[#allocation6 + $0x300] sm:$0xff]  }
 0x266   : > { %5796 = vmatmul.mubr.bf16.vlgmr.msra.gmra.mxu0 %v4570_v50  ;;  %v4532_v54 = vadd.f32 %v4531_v18, %v4530_v24  ;;  %v4558_v52 = vmul.f32 0.020408163, %v4506_v9 }
 0x267   : > { %5836 = vmatmul.mubr.bf16.vlgmr.msra.gmra.mxu1 %v4572_v44  ;;  %7051 = vmatpush3.bf16.msra.mxu0 %v7364_v6 }
 0x268   : > { %5875 = vmatprep.mubr.bf16.mxu0 %v4575_v33  ;;  %7073 = vmatpush3.bf16.msra.mxu1 %v7365_v3  ;;  %v4560_v47 = vmul.f32 0.020408163, %v4532_v54  ;;  %v4574_v42 = vpack.c.bf16 %v4558_v52, %v4558_v52 }
 0x269   : > { %5915 = vmatprep.mubr.bf16.mxu1 %v4577_v53  ;;  %7052 = vmatprep.subr.bf16.mxu0 %v7366_v25 }
 0x26a   : > { %7074 = vmatprep.subr.bf16.mxu1 %v7367_v41  ;;  %v4576_v11 = vpack.c.bf16 %v4560_v47, %v4560_v47 }
 0x26b   : > { %7053 = vmatpush3.bf16.msra.mxu0 %v7368_v39 }
 0x26c   : > { %7075 = vmatpush3.bf16.msra.mxu1 %v7369_v37  ;;  %7054 = vmatprep.subr.bf16.mxu0 %v7370_v58 }
 0x26d   : > { %7076 = vmatprep.subr.bf16.mxu1 %v7371_v35 }
 0x26f   : > { %7055 = vmatpush3.bf16.msra.mxu0 %v7372_v43 }
 0x270   : > { %7077 = vmatpush3.bf16.msra.mxu1 %v7373_v45  ;;  %7056 = vmatprep.subr.bf16.mxu0 %v7374_v12 }
 0x271   : > { %7078 = vmatprep.subr.bf16.mxu1 %v7375_v10 }
 0x273   : > { %7057 = vmatpush3.bf16.msra.mxu0 %v7376_v32 }
 0x274   : > { %7079 = vmatpush3.bf16.msra.mxu1 %v7377_v2  ;;  %7058 = vmatprep.subr.bf16.mxu0 %v7378_v23 }
 0x275   : > { %7080 = vmatprep.subr.bf16.mxu1 %v7379_v16 }
 0x277   : > { %7059 = vmatpush3.bf16.msra.mxu0 %v7380_v36 }
 0x278   : > { %7081 = vmatpush3.bf16.msra.mxu1 %v7381_v21  ;;  %7060 = vmatprep.subr.bf16.mxu0 %v7382_v4 }
 0x279   : > { %7082 = vmatprep.subr.bf16.mxu1 %v7383_v19 }
 0x27b   : > { %7061 = vmatpush3.bf16.msra.mxu0 %v7384_v8 }
 0x27c   : > { %7083 = vmatpush3.bf16.msra.mxu1 %v7385_v34  ;;  %7062 = vmatprep.subr.bf16.mxu0 %v7386_v46 }
 0x27d   : > { %7084 = vmatprep.subr.bf16.mxu1 %v7387_v17 }
 0x27f   : > { %7063 = vmatpush3.bf16.msra.mxu0 %v7388_v13 }
 0x280   : > { %7085 = vmatpush3.bf16.msra.mxu1 %v7389_v28  ;;  %7064 = vmatprep.subr.bf16.mxu0 %v7390_v27 }
 0x281   : > { %7086 = vmatprep.subr.bf16.mxu1 %v7391_v5 }
 0x283   : > { %7065 = vmatpush3.bf16.msra.mxu0 %v7392_v56 }
 0x284   : > { %7087 = vmatpush3.bf16.msra.mxu1 %v7393_v26 }
 0x286   : > { %5876 = vmatmul.mubr.bf16.vlgmr.msra.gmra.mxu0 %v4574_v42  ;;  %v6774_v40 = vpop.f32.mrf.mxu0 }
 0x287   : > { %5916 = vmatmul.mubr.bf16.vlgmr.msra.gmra.mxu1 %v4576_v11  ;;  %v6814_v59 = vpop.f32.mrf.mxu1 }
 0x288   : > { %v6775_v62 = vpop.f32.mrf.mxu0 }
 0x289   : > { %v6776_v6 = vadd.f32 %v6775_v62, %v6774_v40  ;;  %v6815_v20 = vpop.f32.mrf.mxu1 }
 0x28a   : > { %v6816_v60 = vadd.f32 %v6815_v20, %v6814_v59  ;;  %v6777_v50 = vpop.f32.mrf.mxu0 }
 0x28b   : > { %v4068_v3 = vadd.f32 %v6776_v6, %v8283_v38  ;;  %v6817_v31 = vpop.f32.mrf.mxu1 }
 0x28c   : > { %v6778_v44 = vpop.f32.mrf.mxu0 }
 0x28d   : > { %v4132_v25 = vadd.f32 %v6816_v60, %v4068_v3  ;;  %v6818_v61 = vpop.f32.mrf.mxu1  ;;  %v6779_v46 = vadd.f32 %v6778_v44, %v6777_v50 }
 0x28e   : > { %v6780_v33 = vpop.f32.mrf.mxu0  ;;  %v6819_v54 = vadd.f32 %v6818_v61, %v6817_v31 }
 0x28f   : > { %v6820_v41 = vpop.f32.mrf.mxu1 }
 0x290   : > { %v6781_v53 = vpop.f32.mrf.mxu0 }
 0x291   : > { %v6782_v39 = vadd.f32 %v6781_v53, %v6780_v33  ;;  %v6821_v48 = vpop.f32.mrf.mxu1 }
 0x292   : > { %v6783_v37 = vpop.f32.mrf.mxu0  ;;  %v6822_v58 = vadd.f32 %v6821_v48, %v6820_v41 }
 0x293   : > { %v4076_v1 = vadd.f32 %v6782_v39, %v8289_v7  ;;  %v6823_v35 = vpop.f32.mrf.mxu1 }
 0x294   : > { %v6784_v43 = vpop.f32.mrf.mxu0 }
 0x295   : > { %v4140_v22 = vadd.f32 %v6822_v58, %v4076_v1  ;;  %v6824_v45 = vpop.f32.mrf.mxu1  ;;  %v6785_v47 = vadd.f32 %v6784_v43, %v6783_v37 }
 0x296   : > { %v6786_v12 = vpop.f32.mrf.mxu0  ;;  %v6825_v3 = vadd.f32 %v6824_v45, %v6823_v35 }
 0x297   : > { %v6826_v57 = vpop.f32.mrf.mxu1  ;;  %v4079_v50 = vadd.f32 %v6785_v47, %v8292_v15 }
 0x298   : > { %v6787_v38 = vpop.f32.mrf.mxu0 }
 0x299   : > { %v6788_v10 = vadd.f32 %v6787_v38, %v6786_v12  ;;  %v6827_v32 = vpop.f32.mrf.mxu1  ;;  %v4143_v58 = vadd.f32 %v6825_v3, %v4079_v50 }
 0x29a   : > { %v6789_v14 = vpop.f32.mrf.mxu0  ;;  %v6828_v2 = vadd.f32 %v6827_v32, %v6826_v57 }
 0x29b   : > { %v4084_v23 = vadd.f32 %v6788_v10, %v8295_v30  ;;  %v6829_v0 = vpop.f32.mrf.mxu1  ;;  %v4071_v30 = vadd.f32 %v6779_v46, %v8286_v49 }
 0x29c   : > { %v6790_v16 = vpop.f32.mrf.mxu0 }
 0x29d   : > { %v8310_v36 = vadd.f32 %v6828_v2, %v4084_v23  ;;  %v6830_v63 = vpop.f32.mrf.mxu1  ;;  %v4135_v26 = vadd.f32 %v6819_v54, %v4071_v30  ;;  %v6791_v48 = vadd.f32 %v6790_v16, %v6789_v14 }
 0x29e   : > { %v6792_v21 = vpop.f32.mrf.mxu0  ;;  %v6831_v32 = vadd.f32 %v6830_v63, %v6829_v0 }
 0x29f   : > { %v8312_v7 = vpop.f32.mrf.mxu1  ;;  %v4087_v10 = vadd.f32 %v6791_v48, %v8298_v29 }
 0x2a0   : > { %v6793_v4 = vpop.f32.mrf.mxu0 }
 0x2a1   : > { %v8314_v24 = vpop.f32.mrf.mxu1  ;;  %v6794_v2 = vadd.f32 %v6793_v4, %v6792_v21 }
 0x2a2   : > { %v6795_v19 = vpop.f32.mrf.mxu0 }
 0x2a3   : > { %v6835_v8 = vpop.f32.mrf.mxu1  ;;  %v4092_v29 = vadd.f32 %v6794_v2, %v8301_v55 }
 0x2a4   : > { %v6796_v51 = vpop.f32.mrf.mxu0 }
 0x2a5   : > { %v6836_v34 = vpop.f32.mrf.mxu1 }
 0x2c6   : > { %v6854_v18 = vpop.f32.mrf.mxu0 }
 0x2c7   : > { %v6894_v17 = vpop.f32.mrf.mxu1 }
 0x2c8   : > { %v6855_v13 = vpop.f32.mrf.mxu0 }
 0x2c9   : > { %v6856_v9 = vadd.f32 %v6855_v13, %v6854_v18  ;;  %v6895_v28 = vpop.f32.mrf.mxu1  ;;  %v6834_v13 = vadd.f32 %v8314_v24, %v8312_v7 }
 0x2ca   : > { %v6857_v27 = vpop.f32.mrf.mxu0  ;;  %v6896_v42 = vadd.f32 %v6895_v28, %v6894_v17  ;;  %v4151_v17 = vadd.f32 %v6831_v32, %v4087_v10 }
 0x2cb   : > { %v4196_v5 = vadd.f32 %v6856_v9, %v4132_v25  ;;  %v6897_v56 = vpop.f32.mrf.mxu1 }
 0x2cc   : > { %v6858_v52 = vpop.f32.mrf.mxu0 }
 0x2cd   : > { %v6859_v11 = vadd.f32 %v6858_v52, %v6857_v27  ;;  %v6898_v40 = vpop.f32.mrf.mxu1  ;;  %v4260_v62 = vadd.f32 %v6896_v42, %v4196_v5 }
 0x2ce   : > { %v6860_v59 = vpop.f32.mrf.mxu0  ;;  %v6899_v20 = vadd.f32 %v6898_v40, %v6897_v56 }
 0x2cf   : > { %v4199_v6 = vadd.f32 %v6859_v11, %v4135_v26  ;;  %v6900_v60 = vpop.f32.mrf.mxu1  ;;  %v4289_v33 = vmax.f32 %v4260_v62, 0.0 }
 0x2d0   : > { %v6861_v49 = vpop.f32.mrf.mxu0 }
 0x2d1   : > { %v4263_v44 = vadd.f32 %v6899_v20, %v4199_v6  ;;  %v6862_v31 = vadd.f32 %v6861_v49, %v6860_v59  ;;  %v6901_v25 = vpop.f32.mrf.mxu1 }
 0x2d2   : > { %v6863_v61 = vpop.f32.mrf.mxu0  ;;  %v6902_v15 = vadd.f32 %v6901_v25, %v6900_v60 }
 0x2d3   : > { %v4290_v41 = vmax.f32 %v4263_v44, 0.0  ;;  %v4204_v53 = vadd.f32 %v6862_v31, %v4140_v22  ;;  %v6903_v39 = vpop.f32.mrf.mxu1  ;;  %v4334_v44 = vld [vmem:[%s8322_s20 + $0x18] sm:$0x1]  ;;  %v4834_v31 = vld [vmem:[%s8359_s6] sm:$0x1] }
 0x2d4   : > { %v6864_v37 = vpop.f32.mrf.mxu0 }
 0x2d5   : > { %v6584_v1 = vpack.c.bf16 %v4290_v41, %v4289_v33  ;;  %v6865_v35 = vadd.f32 %v6864_v37, %v6863_v61  ;;  %v6904_v43 = vpop.f32.mrf.mxu1  ;;  %v4268_v12 = vadd.f32 %v6902_v15, %v4204_v53 }
 0x2d6   : > { %v6866_v45 = vpop.f32.mrf.mxu0  ;;  %v6905_v38 = vadd.f32 %v6904_v43, %v6903_v39 }
 0x2d7   : > { %6585 = vst [vmem:[%s8322_s20] sm:$0xff] %v6584_v1   ;;  %v4207_v57 = vadd.f32 %v6865_v35, %v4143_v58  ;;  %v6906_v22 = vpop.f32.mrf.mxu1  ;;  %v4291_v51 = vmax.f32 %v4268_v12, 0.0 }
 0x2d8   : > { %v6867_v14 = vpop.f32.mrf.mxu0 }
 0x2d9   : > { %v4271_v23 = vadd.f32 %v6905_v38, %v4207_v57  ;;  %v6868_v16 = vadd.f32 %v6867_v14, %v6866_v45  ;;  %v6907_v19 = vpop.f32.mrf.mxu1 }
 0x2da   : > { %v6869_v8 = vpop.f32.mrf.mxu0  ;;  %v6908_v63 = vadd.f32 %v6907_v19, %v6906_v22 }
 0x2db   : > { %v4292_v34 = vmax.f32 %v4271_v23, 0.0  ;;  %v4212_v46 = vadd.f32 %v6868_v16, %v8310_v36  ;;  %v6909_v18 = vpop.f32.mrf.mxu1  ;;  %v4156_v36 = vadd.f32 %v6834_v13, %v4092_v29 }
 0x2dc   : > { %v6870_v30 = vpop.f32.mrf.mxu0 }
 0x2dd   : > { %v6589_v0 = vpack.c.bf16 %v4292_v34, %v4291_v51  ;;  %v6871_v21 = vadd.f32 %v6870_v30, %v6869_v8  ;;  %v6910_v4 = vpop.f32.mrf.mxu1  ;;  %v4276_v28 = vadd.f32 %v6908_v63, %v4212_v46 }
 0x2de   : > { %v6872_v9 = vpop.f32.mrf.mxu0  ;;  %v6911_v54 = vadd.f32 %v6910_v4, %v6909_v18 }
 0x2df   : > { %6596 = vst [vmem:[%s8322_s20 + $0x8] sm:$0xff] %v6589_v0   ;;  %v4215_v27 = vadd.f32 %v6871_v21, %v4151_v17  ;;  %v6912_v5 = vpop.f32.mrf.mxu1  ;;  %v4293_v24 = vmax.f32 %v4276_v28, 0.0 }
 0x2e0   : > { %v6873_v56 = vpop.f32.mrf.mxu0 }
 0x2e1   : > { %v4279_v52 = vadd.f32 %v6911_v54, %v4215_v27  ;;  %v6874_v26 = vadd.f32 %v6873_v56, %v6872_v9  ;;  %v6913_v47 = vpop.f32.mrf.mxu1 }
 0x2e2   : > { %v6875_v7 = vpop.f32.mrf.mxu0  ;;  %v6914_v11 = vadd.f32 %v6913_v47, %v6912_v5 }
 0x2e3   : > { %v4294_v55 = vmax.f32 %v4279_v52, 0.0  ;;  %v4220_v42 = vadd.f32 %v6874_v26, %v4156_v36  ;;  %v6915_v40 = vpop.f32.mrf.mxu1 }
 0x2e4   : > { %v6876_v59 = vpop.f32.mrf.mxu0 }
 0x2e5   : > { %v6594_v62 = vpack.c.bf16 %v4294_v55, %v4293_v24  ;;  %v4284_v6 = vadd.f32 %v6914_v11, %v4220_v42  ;;  %v6916_v20 = vpop.f32.mrf.mxu1  ;;  %v5925_v24 = vld [vmem:[%s358_s25] sm:$0x1] }
 0x2e6   : > { %v6934_v60 = vpop.f32.mrf.mxu0 }
 0x2e7   : > { %6597 = vst [vmem:[%s8322_s20 + $0x10] sm:$0xff] %v6594_v62   ;;  %v4295_v49 = vmax.f32 %v4284_v6, 0.0  ;;  %v6956_v50 = vpop.f32.mrf.mxu1 }
 0x2e8   : > { %v6935_v25 = vpop.f32.mrf.mxu0 }
 0x2e9   : > { %v6580_v61 = vpack.c.bf16 %v4295_v49, %v4295_v49  ;;  %v6936_v33 = vadd.f32 %v6935_v25, %v6934_v60  ;;  %v6957_v41 = vpop.f32.mrf.mxu1 }
 0x2ea   : > { %v6958_v53 = vadd.f32 %v6957_v41, %v6956_v50  ;;  %v6937_v39 = vpop.f32.mrf.mxu0 }
 0x2eb   : > { %v4335_v48 = vsel %vm8333_vm2, %v6580_v61, %v4334_v44  ;;  %v5638_v37 = vadd.f32 %v6936_v33, %v4834_v31  ;;  %v6959_v58 = vpop.f32.mrf.mxu1 }
 0x2ec   : > { %4336 = vst [vmem:[%s8322_s20 + $0x18] sm:$0x1] %v4335_v48  ;;  %v6938_v1 = vpop.f32.mrf.mxu0 }
 0x2ed   : > { %v5678_v15 = vadd.f32 %v6958_v53, %v5638_v37  ;;  %v6960_v35 = vpop.f32.mrf.mxu1 }
 0x306   : > { %v6978_v43 = vpop.f32.mrf.mxu0 }
 0x307   : > { %v7000_v45 = vpop.f32.mrf.mxu1 }
 0x308   : > { %v6979_v12 = vpop.f32.mrf.mxu0 }
 0x309   : > { %v7001_v57 = vpop.f32.mrf.mxu1  ;;  %v6980_v46 = vadd.f32 %v6979_v12, %v6978_v43 }
 0x30a   : > { %v6981_v38 = vpop.f32.mrf.mxu0  ;;  %v7002_v17 = vadd.f32 %v7001_v57, %v7000_v45 }
 0x30b   : > { %v7003_v22 = vpop.f32.mrf.mxu1  ;;  %v5718_v18 = vadd.f32 %v6980_v46, %v5678_v15 }
 0x30c   : > { %v6982_v10 = vpop.f32.mrf.mxu0 }
 0x30d   : > { %v7004_v32 = vpop.f32.mrf.mxu1  ;;  %v5758_v30 = vadd.f32 %v7002_v17, %v5718_v18 }
 0x326   : > { %v7022_v14 = vpop.f32.mrf.mxu0 }
 0x327   : > { %v7044_v2 = vpop.f32.mrf.mxu1 }
 0x328   : > { %v7023_v23 = vpop.f32.mrf.mxu0 }
 0x329   : > { %v7045_v16 = vpop.f32.mrf.mxu1  ;;  %v7024_v13 = vadd.f32 %v7023_v23, %v7022_v14 }
 0x32a   : > { %v7025_v19 = vpop.f32.mrf.mxu0  ;;  %v7046_v63 = vadd.f32 %v7045_v16, %v7044_v2 }
 0x32b   : > { %v7047_v8 = vpop.f32.mrf.mxu1  ;;  %v5798_v29 = vadd.f32 %v7024_v13, %v5758_v30 }
 0x32c   : > { %v7026_v51 = vpop.f32.mrf.mxu0 }
 0x32d   : > { %v7048_v34 = vpop.f32.mrf.mxu1  ;;  %v5838_v9 = vadd.f32 %v7046_v63, %v5798_v29 }
 0x346   : > { %v7066_v0 = vpop.f32.mrf.mxu0 }
 0x347   : > { %v7088_v21 = vpop.f32.mrf.mxu1 }
 0x348   : > { %v7067_v4 = vpop.f32.mrf.mxu0 }
 0x349   : > { %v7068_v28 = vadd.f32 %v7067_v4, %v7066_v0  ;;  %v7089_v27 = vpop.f32.mrf.mxu1 }
 0x34a   : > { %v7069_v54 = vpop.f32.mrf.mxu0  ;;  %v7090_v56 = vadd.f32 %v7089_v27, %v7088_v21 }
 0x34b   : > { %v5878_v5 = vadd.f32 %v7068_v28, %v5838_v9  ;;  %v7091_v36 = vpop.f32.mrf.mxu1 }
 0x34c   : > { %v7070_v52 = vpop.f32.mrf.mxu0 }
 0x34d   : > { %v5918_v26 = vadd.f32 %v7090_v56, %v5878_v5  ;;  %v7092_v47 = vpop.f32.mrf.mxu1 }
 0x34f   : > { %v5923_v7 = vmax.f32 %v5918_v26, 0.0 }
 0x351   : > { %v5924_v55 = vpack.c.bf16 %v5923_v7, %v5923_v7 }
 0x353   : > { %v5926_v42 = vsel %vm8333_vm2, %v5924_v55, %v5925_v24 }
 0x354   : > { %5927 = vst [vmem:[%s358_s25] sm:$0x1] %v5926_v42 }
 0x355 PF: > { %s21_s27 = sadd.s32 1, %s7486_s27  }
 0x356   : > { %p18_p3 = scmp.ge.s32.totalorder %s21_s27, 4  }
 0x358   :  { %20 = sbr.rel (!%p18_p3) target bundleno = 2 (0x2), region = 103 }
 0x35d   :  { %5961 = vsyncpa [#allocation3], 1 }
 0x35e   :  { %5963 = vsyncpa [#allocation3 + $0x1], 1 }
 0x35f   :  { %5964 = vsyncpa [#allocation5], 1 }

</bundles_post_ra>
